<compile_context>
chip_gen: v6e
topology: v6e:2x2x1
jax: 0.10.0
libtpu: 0.0.40
codegen_flags: <defaults>
</compile_context>

<pallas_src>
import jax
import jax.numpy as jnp
from jax.experimental import pallas as pl
from jax.experimental.pallas import tpu as pltpu

EPS = 1e-5
NUM_HEADS = 8          # documentation only; heads collapse under seq_len == 1
PAD_CLASSES = 128      # lane-dense output width

# Packed-bias layout (fixed by the module: 1024 | 512 | 128 lanes).
_B1_OFF, _B1_END = 0, 1024
_B2_OFF, _B2_END = 1024, 1536
_B3_OFF, _B3_END = 1536, 1664


# --------------------------------------------------------------------------- #
# Kernel: three back-to-back MXU matmuls on bf16 weights, f32 accumulation.
# --------------------------------------------------------------------------- #
def head_kernel(x_ref, WA_ref, WB_ref, WC_ref, bias_ref, out_ref):
    f32 = jnp.float32
    bf16 = jnp.bfloat16

    bA = bias_ref[:, _B1_OFF:_B1_END]   # [1, 1024]
    bB = bias_ref[:, _B2_OFF:_B2_END]   # [1, 512]
    bC = bias_ref[:, _B3_OFF:_B3_END]   # [1, 128]

    # ---- (backbone stub ∘ fc1 ∘ BN1-eval) + ReLU ----------------------------
    h = jnp.dot(x_ref[...], WA_ref[...], preferred_element_type=f32) + bA
    h = jnp.maximum(h, 0.0).astype(bf16)

    # ---- (attention1 Wv@Wo ∘ dropout1-eval ∘ fc2 ∘ BN2-eval) + ReLU ----------
    h = jnp.dot(h, WB_ref[...], preferred_element_type=f32) + bB
    h = jnp.maximum(h, 0.0).astype(bf16)

    # ---- (attention2 Wv@Wo ∘ dropout2-eval ∘ fc3), padded to 128 lanes -------
    out_ref[...] = jnp.dot(h, WC_ref[...], preferred_element_type=f32) + bC


# --------------------------------------------------------------------------- #
# Raw (PyTorch-style) parameter construction — full module structure,
# including the Q/K projections that the folding step later proves dead.
# --------------------------------------------------------------------------- #
def make_params(key, in_feats, num_classes):
    ks = iter(jax.random.split(key, 64))

    def nrm(shape, scale=0.02):
        return scale * jax.random.normal(next(ks), shape, jnp.float32)

    def bn(d):
        gamma = 1.0 + nrm((1, d), 0.1)
        beta = nrm((1, d), 0.1)
        rmean = nrm((1, d), 0.1)
        rvar = jax.random.uniform(next(ks), (1, d), jnp.float32, 0.5, 1.5)
        return [gamma, beta, rmean, rvar]

    p = []
    p += [nrm((in_feats, 512)), nrm((1, 512), 0.01)]             # backbone stub
    p += [nrm((512, 1024)), nrm((1, 1024), 0.01)]                # fc1 (pre-transposed)
    p += bn(1024)                                                # bn1
    for _ in range(3):                                           # attn1 Wq/Wk/Wv
        p += [nrm((1024, 1024)), nrm((1, 1024), 0.01)]
    p += [nrm((1024, 1024)), nrm((1, 1024), 0.01)]               # attn1 out_proj
    p += [nrm((1024, 512)), nrm((1, 512), 0.01)]                 # fc2 (pre-transposed)
    p += bn(512)                                                 # bn2
    for _ in range(3):                                           # attn2 Wq/Wk/Wv
        p += [nrm((512, 512)), nrm((1, 512), 0.01)]
    p += [nrm((512, 512)), nrm((1, 512), 0.01)]                  # attn2 out_proj
    p += [nrm((512, num_classes)), nrm((1, num_classes), 0.01)]  # fc3
    return p


# --------------------------------------------------------------------------- #
# One-time folding (call ONCE at parameter-prep time, NOT per forward):
#   BN into fc, Wv@Wo per attention, then every linear∘linear pair, fc3
#   padded to 128 lanes, biases packed into one array. All folds in f32;
#   weights cast to bf16 exactly once at the end.
# --------------------------------------------------------------------------- #
def fold_params(raw, weight_dtype=jnp.bfloat16, pad_classes=PAD_CLASSES):
    (Wb, bb,
     W1, b1, g1, be1, rm1, rv1,
     _Wq1, _bq1, _Wk1, _bk1, Wv1, bv1, Wo1, bo1,
     W2, b2, g2, be2, rm2, rv2,
     _Wq2, _bq2, _Wk2, _bk2, Wv2, bv2, Wo2, bo2,
     W3, b3) = raw

    def fold_bn(W, b, g, be, rm, rv):
        scale = g * jax.lax.rsqrt(rv + EPS)            # [1, D_out]
        return W * scale, (b - rm) * scale + be

    W1f, b1f = fold_bn(W1, b1, g1, be1, rm1, rv1)       # fc1 + BN1
    W2f, b2f = fold_bn(W2, b2, g2, be2, rm2, rv2)       # fc2 + BN2

    # seq_len == 1 MHA: attn(x) = (x @ Wv + bv) @ Wo + bo
    Wa1 = jnp.dot(Wv1, Wo1)
    ba1 = jnp.dot(bv1, Wo1) + bo1
    Wa2 = jnp.dot(Wv2, Wo2)
    ba2 = jnp.dot(bv2, Wo2) + bo2

    # fc3 padded to 128 output lanes (unmasked lane-dense stores)
    num_classes = W3.shape[-1]
    W3p = jnp.zeros((W3.shape[0], pad_classes), jnp.float32).at[:, :num_classes].set(W3)
    b3p = jnp.zeros((1, pad_classes), jnp.float32).at[:, :num_classes].set(b3)

    # linear∘linear chain folds (no nonlinearity in between) — all f32
    WA = jnp.dot(Wb, W1f)                               # [in_feats, 1024]
    bA = jnp.dot(bb, W1f) + b1f                         # [1, 1024]
    WB = jnp.dot(Wa1, W2f)                              # [1024, 512]
    bB = jnp.dot(ba1, W2f) + b2f                        # [1, 512]
    WC = jnp.dot(Wa2, W3p)                              # [512, 128]
    bC = jnp.dot(ba2, W3p) + b3p                        # [1, 128]

    bias_packed = jnp.concatenate([bA, bB, bC], axis=-1)   # [1, 1664] f32

    w = lambda a: a.astype(weight_dtype)
    return w(WA), w(WB), w(WC), bias_packed


# --------------------------------------------------------------------------- #
# Forward: one fused pallas_call. Takes already-folded params.
# --------------------------------------------------------------------------- #
def efficientnet_b6_forward(x_nchw, folded_params, num_classes):
    WA, WB, WC, bias = folded_params
    B = x_nchw.shape[0]
    xf = x_nchw.reshape(B, -1).astype(jnp.bfloat16)     # glue: flatten NCHW, cast once
    in_feats = xf.shape[-1]

    # Advisory cost model: weight-streaming dominates.
    weight_bytes = 2 * (WA.size + WB.size + WC.size)                 # bf16
    act_bytes = 2 * xf.size + 4 * bias.size + 4 * B * PAD_CLASSES
    flops = 2 * B * (in_feats * 1024 + 1024 * 512 + 512 * PAD_CLASSES)
    cost = pl.CostEstimate(flops=flops, transcendentals=0,
                           bytes_accessed=weight_bytes + act_bytes)

    vmem = lambda: pl.BlockSpec(memory_space=pltpu.MemorySpace.VMEM)
    # TODO(synk): for large batch sizes, add a grid over the batch axis
    # (parallel semantics, weights with constant index_maps) to use both
    # TensorCores on v7x; at toy B=8 a gridless call is optimal.
    out_padded = pl.pallas_call(
        head_kernel,
        out_shape=jax.ShapeDtypeStruct((B, PAD_CLASSES), jnp.float32),
        in_specs=[vmem() for _ in range(5)],
        out_specs=vmem(),
        compiler_params=pltpu.CompilerParams(vmem_limit_bytes=8 * 1024 * 1024),
        cost_estimate=cost,
    )(xf, WA, WB, WC, bias)
    return out_padded[:, :num_classes]


if __name__ == "__main__":
    key = jax.random.PRNGKey(0)
    kx, kp = jax.random.split(key)

    B, C, H, W = 8, 3, 16, 16
    NUM_CLASSES = 16

    x = jax.random.normal(kx, (B, C, H, W), jnp.float32)
    raw_params = make_params(kp, C * H * W, NUM_CLASSES)

    # Fold ONCE (parameter-prep time) — not part of the per-call forward path.
    folded = fold_params(raw_params)
    folded = jax.tree_util.tree_map(jax.block_until_ready, folded)

    fwd = jax.jit(efficientnet_b6_forward, static_argnums=(2,))
    out = fwd(x, folded, NUM_CLASSES)
    jax.block_until_ready(out)

    assert out.shape == (B, NUM_CLASSES)
    print("KERNEL_OK")
</pallas_src>

<mosaic_0001>
module attributes {stable_mosaic.version = 11 : i64} {
  func.func @head_kernel(%arg0: memref<8x768xbf16, #tpu.memory_space<vmem>>, %arg1: memref<768x1024xbf16, #tpu.memory_space<vmem>>, %arg2: memref<1024x512xbf16, #tpu.memory_space<vmem>>, %arg3: memref<512x128xbf16, #tpu.memory_space<vmem>>, %arg4: memref<1x1664xf32, #tpu.memory_space<vmem>>, %arg5: memref<8x128xf32, #tpu.memory_space<vmem>>) attributes {dimension_semantics = [], scalar_prefetch = 0 : i64, scratch_operands = 0 : i64, tpu.core_type = #tpu.core_type<tc>} {
    %c0 = arith.constant 0 : index
    %c0_0 = arith.constant 0 : index
    %0 = vector.load %arg4[%c0, %c0_0] : memref<1x1664xf32, #tpu.memory_space<vmem>>, vector<1x1024xf32>
    %c0_1 = arith.constant 0 : index
    %c1024 = arith.constant 1024 : index
    %1 = vector.load %arg4[%c0_1, %c1024] : memref<1x1664xf32, #tpu.memory_space<vmem>>, vector<1x512xf32>
    %c0_2 = arith.constant 0 : index
    %c1536 = arith.constant 1536 : index
    %2 = vector.load %arg4[%c0_2, %c1536] : memref<1x1664xf32, #tpu.memory_space<vmem>>, vector<1x128xf32>
    %c0_3 = arith.constant 0 : index
    %c0_4 = arith.constant 0 : index
    %3 = vector.load %arg0[%c0_3, %c0_4] : memref<8x768xbf16, #tpu.memory_space<vmem>>, vector<8x768xbf16>
    %c0_5 = arith.constant 0 : index
    %c0_6 = arith.constant 0 : index
    %4 = vector.load %arg1[%c0_5, %c0_6] : memref<768x1024xbf16, #tpu.memory_space<vmem>>, vector<768x1024xbf16>
    %cst = arith.constant dense<0.000000e+00> : vector<8x1024xf32>
    %5 = tpu.matmul %3, %4, %cst {dimension_numbers = #tpu.dot_dimension_numbers<[1], [0], [0], [1], [0, 0, 1, 1], [], []>} : vector<8x768xbf16>, vector<768x1024xbf16>, vector<8x1024xf32> -> vector<8x1024xf32>
    %6 = vector.broadcast %0 : vector<1x1024xf32> to vector<8x1024xf32>
    %7 = arith.addf %5, %6 : vector<8x1024xf32>
    %cst_7 = arith.constant 0.000000e+00 : f32
    %8 = vector.broadcast %cst_7 : f32 to vector<8x1024xf32>
    %9 = arith.maximumf %7, %8 : vector<8x1024xf32>
    %10 = arith.truncf %9 : vector<8x1024xf32> to vector<8x1024xbf16>
    %c0_8 = arith.constant 0 : index
    %c0_9 = arith.constant 0 : index
    %11 = vector.load %arg2[%c0_8, %c0_9] : memref<1024x512xbf16, #tpu.memory_space<vmem>>, vector<1024x512xbf16>
    %cst_10 = arith.constant dense<0.000000e+00> : vector<8x512xf32>
    %12 = tpu.matmul %10, %11, %cst_10 {dimension_numbers = #tpu.dot_dimension_numbers<[1], [0], [0], [1], [0, 0, 1, 1], [], []>} : vector<8x1024xbf16>, vector<1024x512xbf16>, vector<8x512xf32> -> vector<8x512xf32>
    %13 = vector.broadcast %1 : vector<1x512xf32> to vector<8x512xf32>
    %14 = arith.addf %12, %13 : vector<8x512xf32>
    %cst_11 = arith.constant 0.000000e+00 : f32
    %15 = vector.broadcast %cst_11 : f32 to vector<8x512xf32>
    %16 = arith.maximumf %14, %15 : vector<8x512xf32>
    %17 = arith.truncf %16 : vector<8x512xf32> to vector<8x512xbf16>
    %c0_12 = arith.constant 0 : index
    %c0_13 = arith.constant 0 : index
    %18 = vector.load %arg3[%c0_12, %c0_13] : memref<512x128xbf16, #tpu.memory_space<vmem>>, vector<512x128xbf16>
    %cst_14 = arith.constant dense<0.000000e+00> : vector<8x128xf32>
    %19 = tpu.matmul %17, %18, %cst_14 {dimension_numbers = #tpu.dot_dimension_numbers<[1], [0], [0], [1], [0, 0, 1, 1], [], []>} : vector<8x512xbf16>, vector<512x128xbf16>, vector<8x128xf32> -> vector<8x128xf32>
    %20 = vector.broadcast %2 : vector<1x128xf32> to vector<8x128xf32>
    %21 = arith.addf %19, %20 : vector<8x128xf32>
    %c0_15 = arith.constant 0 : index
    %c0_16 = arith.constant 0 : index
    %22 = vector.load %arg5[%c0_15, %c0_16] : memref<8x128xf32, #tpu.memory_space<vmem>>, vector<8x128xf32>
    tpu.vector_store %arg5[%c0_15, %c0_16], %21 {strides = array<i32>} : memref<8x128xf32, #tpu.memory_space<vmem>>, vector<8x128xf32>,
    return
  }
}

</mosaic_0001>

<bundles_post_ra>
// kernel: efficientnet_b6_forward.1
= control target key start
LH: loop header
LB: loop body
LE: loop exit
PB: predicated region body
PF: predicated region fallthrough
CT: control target
= control target key end

     0   :  { %10 = vsyncpa [#allocation3], 0  ;;  %s6716_s0 = inlined_call_operand.vmem [shape: bf16[8,768], index: 0, kind: input, shape index: {}]   ;;  %s6717_s1 = inlined_call_operand.hbm [shape: bf16[768,1024], index: 1, kind: input, shape index: {}]   ;;  %s6718_s2 = inlined_call_operand.hbm [shape: bf16[1024,512], index: 2, kind: input, shape index: {}]   ;;  %s6719_s3 = inlined_call_operand.hbm [shape: bf16[512,128], index: 3, kind: input, shape index: {}]   ;;  %s6720_s4 = inlined_call_operand.hbm [shape: f32[1,1664], index: 4, kind: input, shape index: {}]   ;;  %s6721_s5 = inlined_call_operand.hbm [shape: f32[8,128], index: 5, kind: output, shape index: {}]  }
   0x1   :  { %11 = vsyncpa [#allocation6], 0 }
   0x2   :  { %12 = vsyncpa [#allocation9], 0 }
   0x3   :  { %13 = vsyncpa [#allocation4], 0  ;;  %s6473_s18 = smov [#allocation5]  }
   0x4   :  { %s33_s19 = sshll.u32 %s6473_s18, 4  ;;  %s34_s19 = int_to_ptr.vmem [resolvable:$true] %s33_s19 }
   0x5   :  { %s6373_s20 = scalar_lea.vmem %s34_s19, 32768  ;;  %p6378_p1 = scmp.lt.s32.totalorder %s34_s19, %s34_s19 }
   0x6   :  { %p6374_p0 = scmp.ne.s32.totalorder %s34_s19, %s6373_s20  ;;  %p6379_p2 = scmp.lt.s32.totalorder %s6373_s20, %s6373_s20 }
   0x8   :  { %p6380_p3 = por %p6379_p2, %p6378_p1 }
   0xa   :  { %p6381_p4 = pnand %p6380_p3, %p6374_p0 }
   0xc   :  { %6384 = shalt.err (!%p6381_p4)
}
   0xd   :  { %s6474_s21 = smov 256   ;;  %s6475_s22 = smov 16  }
   0xe   :  { %39 = dma.hbm_to_vmem [thread:$0]  %s6718_s2, 32768, %s34_s19, [#allocation6], %s6474_s21, %s6474_s21, %s6475_s22  }
   0xf   :  { %s6476_s25 = smov [#allocation2]  }
  0x10   :  { %s21_s26 = sshll.u32 %s6476_s25, 4  ;;  %s22_s26 = int_to_ptr.vmem [resolvable:$true] %s21_s26 }
  0x11   :  { %s6393_s27 = scalar_lea.vmem %s22_s26, 49152  ;;  %p6398_p6 = scmp.lt.s32.totalorder %s22_s26, %s22_s26 }
  0x12   :  { %p6394_p5 = scmp.ne.s32.totalorder %s22_s26, %s6393_s27  ;;  %p6399_p7 = scmp.lt.s32.totalorder %s6393_s27, %s6393_s27 }
  0x14   :  { %p6400_p8 = por %p6399_p7, %p6398_p6 }
  0x16   :  { %p6401_p9 = pnand %p6400_p8, %p6394_p5 }
  0x18   :  { %6404 = shalt.err (!%p6401_p9)
}
  0x19   :  { %s6477_s28 = smov 512   ;;  %s6478_s29 = smov 32  }
  0x1a   :  { %27 = dma.hbm_to_vmem [thread:$0]  %s6717_s1, 49152, %s22_s26, [#allocation3], %s6477_s28, %s6477_s28, %s6478_s29  }
  0x1b   :  { %s6479_s7 = smov [#allocation7]  }
  0x1c   :  { %s45_s8 = sshll.u32 %s6479_s7, 4  ;;  %s46_s8 = int_to_ptr.vmem [resolvable:$true] %s45_s8 }
  0x1d   :  { %s6413_s2 = scalar_lea.vmem %s46_s8, 4096  ;;  %p6418_p11 = scmp.lt.s32.totalorder %s46_s8, %s46_s8 }
  0x1e   :  { %p6414_p10 = scmp.ne.s32.totalorder %s46_s8, %s6413_s2  ;;  %p6419_p12 = scmp.lt.s32.totalorder %s6413_s2, %s6413_s2 }
  0x20   :  { %p6420_p13 = por %p6419_p12, %p6418_p11 }
  0x22   :  { %p6421_p0 = pnand %p6420_p13, %p6414_p10 }
  0x24   :  { %6424 = shalt.err (!%p6421_p0)
}
  0x25   :  { %s6480_s9 = smov 64   ;;  %s6481_s10 = smov 4  }
  0x26   :  { %51 = dma.hbm_to_vmem [thread:$0]  %s6719_s3, 4096, %s46_s8, [#allocation6], %s6480_s9, %s6480_s9, %s6481_s10  }
  0x27   :  { %s6482_s13 = smov [#allocation8]  }
  0x28   :  { %s58_s14 = sshll.u32 %s6482_s13, 4  ;;  %s59_s14 = int_to_ptr.vmem [resolvable:$true] %s58_s14 }
  0x29   :  { %s6433_s1 = scalar_lea.vmem %s59_s14, 208  ;;  %s6437_s15 = scalar_lea.vmem %s59_s14, 224 }
  0x2a   :  { %p6434_p1 = scmp.ne.s32.totalorder %s59_s14, %s6433_s1  ;;  %p6438_p2 = scmp.lt.s32.totalorder %s59_s14, %s59_s14 }
  0x2b   :  { %p6439_p3 = scmp.lt.s32.totalorder %s6437_s15, %s6433_s1 }
  0x2d   :  { %p6440_p4 = por %p6439_p3, %p6438_p2 }
  0x2f   :  { %p6441_p5 = pnand %p6440_p4, %p6434_p1 }
  0x31   :  { %6444 = shalt.err (!%p6441_p5)
}
  0x32   :  { %61 = dma.hbm_to_vmem [thread:$0]  %s6720_s4, 208, %s59_s14, [#allocation9]  }
  0x33   :  { %6465 = dma.done.wait [#allocation3], 49152  }
  0x34   :  { %6466 = vsyncadd [#allocation3], 4294918144 }
  0x35   :  { %6467 = dma.done.wait [#allocation6], 36864  }
  0x36   :  { %6468 = vsyncadd [#allocation6], 4294930432 }
  0x37   :  { %6469 = dma.done.wait [#allocation9], 208  }
  0x38   :  { %6470 = vsyncadd [#allocation9], 4294967088  ;;  %v137_v0 = vld [vmem:[#allocation2 + $0x1c0] sm:$0xff]  ;;  %v6534_v54 = vld [vmem:[%s6716_s0 + $0x8] sm:$0xff] }
  0x39   :  { %v141_v1 = vld [vmem:[#allocation2 + $0x1e0] sm:$0xff]  ;;  %v6542_v59 = vcombine.high %v6534_v54, %v6534_v54 }
  0x3a   :  { %v265_v2 = vld [vmem:[#allocation2 + $0x5c0] sm:$0xff]  ;;  %v5271_v3 = vcombine.high %v137_v0, %v141_v1  ;;  %v5270_v5 = vcombine.low %v137_v0, %v141_v1 }
  0x3b   :  { %v269_v4 = vld [vmem:[#allocation2 + $0x5e0] sm:$0xff]  ;;  %2520 = vmatprep.mubr.bf16.mxu1 %v6542_v59 }
  0x3c   :  { %v129_v6 = vld [vmem:[#allocation2 + $0x180] sm:$0xff]  ;;  %v5399_v8 = vcombine.high %v265_v2, %v269_v4  ;;  %v5398_v9 = vcombine.low %v265_v2, %v269_v4  ;;  %2447 = vmatprep.subr.bf16.mxu0 %v5271_v3 }
  0x3d   :  { %v133_v7 = vld [vmem:[#allocation2 + $0x1a0] sm:$0xff]  ;;  %2448 = vmatpush1.bf16.msra.mxu0 %v5270_v5 }
  0x3e   :  { %v5263_v10 = vcombine.high %v129_v6, %v133_v7  ;;  %v257_v11 = vld [vmem:[#allocation2 + $0x580] sm:$0xff]  ;;  %2488 = vmatprep.subr.bf16.mxu1 %v5399_v8  ;;  %v5262_v18 = vcombine.low %v129_v6, %v133_v7 }
  0x3f   :  { %v261_v12 = vld [vmem:[#allocation2 + $0x5a0] sm:$0xff]  ;;  %2489 = vmatpush1.bf16.msra.mxu1 %v5398_v9 }
  0x40   :  { %v121_v13 = vld [vmem:[#allocation2 + $0x140] sm:$0xff]  ;;  %v5391_v14 = vcombine.high %v257_v11, %v261_v12  ;;  %2449 = vmatprep.subr.bf16.mxu0 %v5263_v10  ;;  %v5390_v19 = vcombine.low %v257_v11, %v261_v12 }
  0x41   :  { %v125_v15 = vld [vmem:[#allocation2 + $0x160] sm:$0xff]  ;;  %2450 = vmatpush1.bf16.msra.mxu0 %v5262_v18 }
  0x42   :  { %v249_v16 = vld [vmem:[#allocation2 + $0x540] sm:$0xff]  ;;  %v5255_v20 = vcombine.high %v121_v13, %v125_v15  ;;  %2490 = vmatprep.subr.bf16.mxu1 %v5391_v14  ;;  %v5254_v26 = vcombine.low %v121_v13, %v125_v15 }
  0x43   :  { %v253_v17 = vld [vmem:[#allocation2 + $0x560] sm:$0xff]  ;;  %2491 = vmatpush1.bf16.msra.mxu1 %v5390_v19 }
  0x44   :  { %v5383_v21 = vcombine.high %v249_v16, %v253_v17  ;;  %v113_v22 = vld [vmem:[#allocation2 + $0x100] sm:$0xff]  ;;  %2451 = vmatprep.subr.bf16.mxu0 %v5255_v20  ;;  %v5382_v27 = vcombine.low %v249_v16, %v253_v17 }
  0x45   :  { %v117_v23 = vld [vmem:[#allocation2 + $0x120] sm:$0xff]  ;;  %2452 = vmatpush1.bf16.msra.mxu0 %v5254_v26 }
  0x46   :  { %v241_v24 = vld [vmem:[#allocation2 + $0x500] sm:$0xff]  ;;  %v5247_v28 = vcombine.high %v113_v22, %v117_v23  ;;  %2492 = vmatprep.subr.bf16.mxu1 %v5383_v21  ;;  %v5246_v34 = vcombine.low %v113_v22, %v117_v23 }
  0x47   :  { %v245_v25 = vld [vmem:[#allocation2 + $0x520] sm:$0xff]  ;;  %2493 = vmatpush1.bf16.msra.mxu1 %v5382_v27 }
  0x48   :  { %v5375_v29 = vcombine.high %v241_v24, %v245_v25  ;;  %v105_v30 = vld [vmem:[#allocation2 + $0xc0] sm:$0xff]  ;;  %2453 = vmatprep.subr.bf16.mxu0 %v5247_v28  ;;  %v5374_v35 = vcombine.low %v241_v24, %v245_v25 }
  0x49   :  { %v109_v31 = vld [vmem:[#allocation2 + $0xe0] sm:$0xff]  ;;  %2454 = vmatpush1.bf16.msra.mxu0 %v5246_v34 }
  0x4a   :  { %v233_v32 = vld [vmem:[#allocation2 + $0x4c0] sm:$0xff]  ;;  %v5239_v36 = vcombine.high %v105_v30, %v109_v31  ;;  %2494 = vmatprep.subr.bf16.mxu1 %v5375_v29  ;;  %v5238_v42 = vcombine.low %v105_v30, %v109_v31 }
  0x4b   :  { %v237_v33 = vld [vmem:[#allocation2 + $0x4e0] sm:$0xff]  ;;  %2495 = vmatpush1.bf16.msra.mxu1 %v5374_v35 }
  0x4c   :  { %v5367_v37 = vcombine.high %v233_v32, %v237_v33  ;;  %v97_v38 = vld [vmem:[#allocation2 + $0x80] sm:$0xff]  ;;  %2455 = vmatprep.subr.bf16.mxu0 %v5239_v36  ;;  %v5366_v43 = vcombine.low %v233_v32, %v237_v33 }
  0x4d   :  { %v101_v39 = vld [vmem:[#allocation2 + $0xa0] sm:$0xff]  ;;  %2456 = vmatpush1.bf16.msra.mxu0 %v5238_v42 }
  0x4e   :  { %v225_v40 = vld [vmem:[#allocation2 + $0x480] sm:$0xff]  ;;  %v5231_v44 = vcombine.high %v97_v38, %v101_v39  ;;  %2496 = vmatprep.subr.bf16.mxu1 %v5367_v37  ;;  %v5230_v50 = vcombine.low %v97_v38, %v101_v39 }
  0x4f   :  { %v229_v41 = vld [vmem:[#allocation2 + $0x4a0] sm:$0xff]  ;;  %2497 = vmatpush1.bf16.msra.mxu1 %v5366_v43 }
  0x50   :  { %v5359_v45 = vcombine.high %v225_v40, %v229_v41  ;;  %v89_v46 = vld [vmem:[#allocation2 + $0x40] sm:$0xff]  ;;  %2457 = vmatprep.subr.bf16.mxu0 %v5231_v44  ;;  %v5358_v51 = vcombine.low %v225_v40, %v229_v41 }
  0x51   :  { %v93_v47 = vld [vmem:[#allocation2 + $0x60] sm:$0xff]  ;;  %2458 = vmatpush1.bf16.msra.mxu0 %v5230_v50 }
  0x52   :  { %v217_v48 = vld [vmem:[#allocation2 + $0x440] sm:$0xff]  ;;  %v5223_v52 = vcombine.high %v89_v46, %v93_v47  ;;  %2498 = vmatprep.subr.bf16.mxu1 %v5359_v45  ;;  %v5222_v62 = vcombine.low %v89_v46, %v93_v47 }
  0x53   :  { %v221_v49 = vld [vmem:[#allocation2 + $0x460] sm:$0xff]  ;;  %2499 = vmatpush1.bf16.msra.mxu1 %v5358_v51 }
  0x54   :  { %v6529_v53 = vld [vmem:[%s6716_s0] sm:$0xff]  ;;  %v5351_v55 = vcombine.high %v217_v48, %v221_v49  ;;  %2459 = vmatprep.subr.bf16.mxu0 %v5223_v52  ;;  %v5350_v63 = vcombine.low %v217_v48, %v221_v49 }
  0x55   :  { %v81_v56 = vld [vmem:[#allocation2] sm:$0xff]  ;;  %v6538_v58 = vcombine.high %v6529_v53, %v6529_v53  ;;  %2460 = vmatpush1.bf16.msra.mxu0 %v5222_v62 }
  0x56   :  { %v85_v57 = vld [vmem:[#allocation2 + $0x20] sm:$0xff]  ;;  %2500 = vmatprep.subr.bf16.mxu1 %v5351_v55 }
  0x57   :  { %v209_v60 = vld [vmem:[#allocation2 + $0x400] sm:$0xff]  ;;  %2479 = vmatprep.mubr.bf16.mxu0 %v6538_v58  ;;  %v5215_v0 = vcombine.high %v81_v56, %v85_v57  ;;  %v5214_v6 = vcombine.low %v81_v56, %v85_v57  ;;  %2501 = vmatpush1.bf16.msra.mxu1 %v5350_v63 }
  0x58   :  { %v213_v61 = vld [vmem:[#allocation2 + $0x420] sm:$0xff] }
  0x59   :  { %v5343_v1 = vcombine.high %v209_v60, %v213_v61  ;;  %v201_v2 = vld [vmem:[#allocation2 + $0x3c0] sm:$0xff]  ;;  %2461 = vmatprep.subr.bf16.mxu0 %v5215_v0  ;;  %v5342_v7 = vcombine.low %v209_v60, %v213_v61 }
  0x5a   :  { %v205_v3 = vld [vmem:[#allocation2 + $0x3e0] sm:$0xff]  ;;  %2462 = vmatpush1.bf16.msra.mxu0 %v5214_v6 }
  0x5b   :  { %v329_v4 = vld [vmem:[#allocation2 + $0x7c0] sm:$0xff]  ;;  %v5335_v8 = vcombine.high %v201_v2, %v205_v3  ;;  %2502 = vmatprep.subr.bf16.mxu1 %v5343_v1  ;;  %v5334_v14 = vcombine.low %v201_v2, %v205_v3 }
  0x5c   :  { %v333_v5 = vld [vmem:[#allocation2 + $0x7e0] sm:$0xff]  ;;  %2503 = vmatpush1.bf16.msra.mxu1 %v5342_v7 }
  0x5d   :  { %v5463_v9 = vcombine.high %v329_v4, %v333_v5  ;;  %v193_v10 = vld [vmem:[#allocation2 + $0x380] sm:$0xff]  ;;  %2463 = vmatprep.subr.bf16.mxu0 %v5335_v8  ;;  %v5462_v15 = vcombine.low %v329_v4, %v333_v5  ;;  %v138_v8 = vld [vmem:[#allocation2 + $0x1c8] sm:$0xff] }
  0x5e   :  { %v197_v11 = vld [vmem:[#allocation2 + $0x3a0] sm:$0xff]  ;;  %2464 = vmatpush2.bf16.msra.mxu0 %v5334_v14 }
  0x5f   :  { %v321_v12 = vld [vmem:[#allocation2 + $0x780] sm:$0xff]  ;;  %v5327_v16 = vcombine.high %v193_v10, %v197_v11  ;;  %2504 = vmatprep.subr.bf16.mxu1 %v5463_v9  ;;  %v5326_v22 = vcombine.low %v193_v10, %v197_v11  ;;  %v142_v9 = vld [vmem:[#allocation2 + $0x1e8] sm:$0xff] }
  0x60   :  { %v325_v13 = vld [vmem:[#allocation2 + $0x7a0] sm:$0xff]  ;;  %2505 = vmatpush2.bf16.msra.mxu1 %v5462_v15 }
  0x61   :  { %v5455_v17 = vcombine.high %v321_v12, %v325_v13  ;;  %v185_v18 = vld [vmem:[#allocation2 + $0x340] sm:$0xff]  ;;  %2465 = vmatprep.subr.bf16.mxu0 %v5327_v16  ;;  %v5454_v23 = vcombine.low %v321_v12, %v325_v13  ;;  %v5273_v13 = vcombine.high %v138_v8, %v142_v9  ;;  %v6548_v16 = vcombine.low %v6529_v53, %v6529_v53 }
  0x62   :  { %v189_v19 = vld [vmem:[#allocation2 + $0x360] sm:$0xff]  ;;  %2466 = vmatpush2.bf16.msra.mxu0 %v5326_v22  ;;  %v5272_v22 = vcombine.low %v138_v8, %v142_v9 }
  0x63   :  { %v313_v20 = vld [vmem:[#allocation2 + $0x740] sm:$0xff]  ;;  %v5319_v24 = vcombine.high %v185_v18, %v189_v19  ;;  %2506 = vmatprep.subr.bf16.mxu1 %v5455_v17  ;;  %v5318_v30 = vcombine.low %v185_v18, %v189_v19  ;;  %v130_v17 = vld [vmem:[#allocation2 + $0x188] sm:$0xff]  ;;  %v6553_v19 = vld [vmem:[%s6716_s0 + $0x10] sm:$0xff]  ;;  %s6483_s0 = smov [#allocation10]  }
  0x64   :  { %v317_v21 = vld [vmem:[#allocation2 + $0x760] sm:$0xff]  ;;  %2507 = vmatpush2.bf16.msra.mxu1 %v5454_v23  ;;  %v134_v18 = vld [vmem:[#allocation2 + $0x1a8] sm:$0xff]  ;;  %s5197_s22 = sshll.u32 %s6483_s0, 4  ;;  %s5198_s22 = int_to_ptr.vmem [resolvable:$true] %s5197_s22 }
  0x65   :  { %v5447_v25 = vcombine.high %v313_v20, %v317_v21  ;;  %v177_v26 = vld [vmem:[#allocation2 + $0x300] sm:$0xff]  ;;  %2467 = vmatprep.subr.bf16.mxu0 %v5319_v24  ;;  %v5446_v31 = vcombine.low %v313_v20, %v317_v21  ;;  %v6557_v20 = vcombine.low %v6534_v54, %v6534_v54  ;;  %s6445_s23 = scalar_lea.vmem %s5198_s22, 128  ;;  %p6450_p7 = scmp.lt.s32.totalorder %s5198_s22, %s5198_s22 }
  0x66   :  { %v181_v27 = vld [vmem:[#allocation2 + $0x320] sm:$0xff]  ;;  %2468 = vmatpush2.bf16.msra.mxu0 %v5318_v30  ;;  %p6446_p6 = scmp.ne.s32.totalorder %s5198_s22, %s6445_s23  ;;  %p6451_p8 = scmp.lt.s32.totalorder %s6445_s23, %s6445_s23 }
  0x67   :  { %v305_v28 = vld [vmem:[#allocation2 + $0x700] sm:$0xff]  ;;  %v5311_v32 = vcombine.high %v177_v26, %v181_v27  ;;  %2508 = vmatprep.subr.bf16.mxu1 %v5447_v25  ;;  %v5310_v38 = vcombine.low %v177_v26, %v181_v27  ;;  %v122_v25 = vld [vmem:[#allocation2 + $0x148] sm:$0xff]  ;;  %v5265_v26 = vcombine.high %v130_v17, %v134_v18 }
  0x68   :  { %v309_v29 = vld [vmem:[#allocation2 + $0x720] sm:$0xff]  ;;  %2509 = vmatpush2.bf16.msra.mxu1 %v5446_v31  ;;  %v126_v27 = vld [vmem:[#allocation2 + $0x168] sm:$0xff]  ;;  %p6452_p9 = por %p6451_p8, %p6450_p7 }
  0x69   :  { %v5439_v33 = vcombine.high %v305_v28, %v309_v29  ;;  %v169_v34 = vld [vmem:[#allocation2 + $0x2c0] sm:$0xff]  ;;  %2469 = vmatprep.subr.bf16.mxu0 %v5311_v32  ;;  %v5438_v39 = vcombine.low %v305_v28, %v309_v29  ;;  %v6561_v28 = vcombine.high %v6553_v19, %v6553_v19  ;;  %v5264_v29 = vcombine.low %v130_v17, %v134_v18 }
  0x6a   :  { %v173_v35 = vld [vmem:[#allocation2 + $0x2e0] sm:$0xff]  ;;  %2470 = vmatpush2.bf16.msra.mxu0 %v5310_v38  ;;  %p6453_p10 = pnand %p6452_p9, %p6446_p6 }
  0x6b   :  { %v297_v36 = vld [vmem:[#allocation2 + $0x6c0] sm:$0xff]  ;;  %v5303_v40 = vcombine.high %v169_v34, %v173_v35  ;;  %2510 = vmatprep.subr.bf16.mxu1 %v5439_v33  ;;  %v5302_v46 = vcombine.low %v169_v34, %v173_v35  ;;  %v114_v33 = vld [vmem:[#allocation2 + $0x108] sm:$0xff]  ;;  %v5257_v34 = vcombine.high %v122_v25, %v126_v27 }
  0x6c   :  { %v301_v37 = vld [vmem:[#allocation2 + $0x6e0] sm:$0xff]  ;;  %2511 = vmatpush2.bf16.msra.mxu1 %v5438_v39  ;;  %v118_v35 = vld [vmem:[#allocation2 + $0x128] sm:$0xff] }
  0x6d   :  { %v5431_v41 = vcombine.high %v297_v36, %v301_v37  ;;  %v161_v42 = vld [vmem:[#allocation2 + $0x280] sm:$0xff]  ;;  %2471 = vmatprep.subr.bf16.mxu0 %v5303_v40  ;;  %v5430_v47 = vcombine.low %v297_v36, %v301_v37  ;;  %v5256_v37 = vcombine.low %v122_v25, %v126_v27  ;;  %v198_v25 = vld [vmem:[#allocation2 + $0x3a8] sm:$0xff] }
  0x6e   :  { %v165_v43 = vld [vmem:[#allocation2 + $0x2a0] sm:$0xff]  ;;  %2472 = vmatpush2.bf16.msra.mxu0 %v5302_v46 }
  0x6f   :  { %v289_v44 = vld [vmem:[#allocation2 + $0x680] sm:$0xff]  ;;  %v5295_v48 = vcombine.high %v161_v42, %v165_v43  ;;  %2512 = vmatprep.subr.bf16.mxu1 %v5431_v41  ;;  %v5294_v56 = vcombine.low %v161_v42, %v165_v43  ;;  %v106_v41 = vld [vmem:[#allocation2 + $0xc8] sm:$0xff]  ;;  %v5249_v42 = vcombine.high %v114_v33, %v118_v35 }
  0x70   :  { %v293_v45 = vld [vmem:[#allocation2 + $0x6a0] sm:$0xff]  ;;  %2513 = vmatpush2.bf16.msra.mxu1 %v5430_v47  ;;  %v110_v43 = vld [vmem:[#allocation2 + $0xe8] sm:$0xff] }
  0x71   :  { %v5423_v49 = vcombine.high %v289_v44, %v293_v45  ;;  %v153_v50 = vld [vmem:[#allocation2 + $0x240] sm:$0xff]  ;;  %2473 = vmatprep.subr.bf16.mxu0 %v5295_v48  ;;  %v5422_v57 = vcombine.low %v289_v44, %v293_v45  ;;  %v5248_v45 = vcombine.low %v114_v33, %v118_v35  ;;  %v190_v33 = vld [vmem:[#allocation2 + $0x368] sm:$0xff] }
  0x72   :  { %v157_v51 = vld [vmem:[#allocation2 + $0x260] sm:$0xff]  ;;  %2474 = vmatpush2.bf16.msra.mxu0 %v5294_v56 }
  0x73   :  { %v281_v52 = vld [vmem:[#allocation2 + $0x640] sm:$0xff]  ;;  %v5287_v60 = vcombine.high %v153_v50, %v157_v51  ;;  %2514 = vmatprep.subr.bf16.mxu1 %v5423_v49  ;;  %v5286_v2 = vcombine.low %v153_v50, %v157_v51  ;;  %v98_v49 = vld [vmem:[#allocation2 + $0x88] sm:$0xff]  ;;  %v5241_v50 = vcombine.high %v106_v41, %v110_v43 }
  0x74   :  { %v285_v55 = vld [vmem:[#allocation2 + $0x660] sm:$0xff]  ;;  %2515 = vmatpush2.bf16.msra.mxu1 %v5422_v57  ;;  %v102_v51 = vld [vmem:[#allocation2 + $0xa8] sm:$0xff] }
  0x75   :  { %v5415_v61 = vcombine.high %v281_v52, %v285_v55  ;;  %v145_v62 = vld [vmem:[#allocation2 + $0x200] sm:$0xff]  ;;  %2475 = vmatprep.subr.bf16.mxu0 %v5287_v60  ;;  %v5414_v3 = vcombine.low %v281_v52, %v285_v55  ;;  %v5240_v55 = vcombine.low %v106_v41, %v110_v43  ;;  %v182_v41 = vld [vmem:[#allocation2 + $0x328] sm:$0xff] }
  0x76   :  { %v149_v63 = vld [vmem:[#allocation2 + $0x220] sm:$0xff]  ;;  %2476 = vmatpush2.bf16.msra.mxu0 %v5286_v2 }
  0x77   :  { %v273_v0 = vld [vmem:[#allocation2 + $0x600] sm:$0xff]  ;;  %v5279_v4 = vcombine.high %v145_v62, %v149_v63  ;;  %2516 = vmatprep.subr.bf16.mxu1 %v5415_v61  ;;  %v5278_v10 = vcombine.low %v145_v62, %v149_v63  ;;  %v90_v61 = vld [vmem:[#allocation2 + $0x48] sm:$0xff]  ;;  %v5233_v62 = vcombine.high %v98_v49, %v102_v51 }
  0x78   :  { %v277_v1 = vld [vmem:[#allocation2 + $0x620] sm:$0xff]  ;;  %2517 = vmatpush2.bf16.msra.mxu1 %v5414_v3  ;;  %v94_v63 = vld [vmem:[#allocation2 + $0x68] sm:$0xff] }
  0x79   :  { %v5407_v5 = vcombine.high %v273_v0, %v277_v1  ;;  %v393_v6 = vld [vmem:[#allocation2 + $0x9c0] sm:$0xff]  ;;  %2477 = vmatprep.subr.bf16.mxu0 %v5279_v4  ;;  %v5406_v11 = vcombine.low %v273_v0, %v277_v1  ;;  %v5232_v1 = vcombine.low %v98_v49, %v102_v51  ;;  %v5224_v9 = vcombine.low %v90_v61, %v94_v63  ;;  %v174_v49 = vld [vmem:[#allocation2 + $0x2e8] sm:$0xff] }
  0x7a   :  { %v397_v7 = vld [vmem:[#allocation2 + $0x9e0] sm:$0xff]  ;;  %2478 = vmatpush2.bf16.msra.mxu0 %v5278_v10 }
  0x7b   :  { %v5527_v12 = vcombine.high %v393_v6, %v397_v7  ;;  %2518 = vmatprep.subr.bf16.mxu1 %v5407_v5  ;;  %v385_v14 = vld [vmem:[#allocation2 + $0x980] sm:$0xff]  ;;  %v5526_v21 = vcombine.low %v393_v6, %v397_v7  ;;  %v82_v5 = vld [vmem:[#allocation2 + $0x8] sm:$0xff]  ;;  %v5225_v6 = vcombine.high %v90_v61, %v94_v63 }
  0x7c   :  { %v389_v15 = vld [vmem:[#allocation2 + $0x9a0] sm:$0xff]  ;;  %2519 = vmatpush2.bf16.msra.mxu1 %v5406_v11  ;;  %v86_v7 = vld [vmem:[#allocation2 + $0x28] sm:$0xff] }
  0x7d   :  { %2529 = vmatprep.subr.bf16.mxu0 %v5527_v12  ;;  %v5519_v23 = vcombine.high %v385_v14, %v389_v15  ;;  %v377_v24 = vld [vmem:[#allocation2 + $0x940] sm:$0xff]  ;;  %2570 = vmatprep.subr.bf16.mxu1 %v5273_v13  ;;  %v5518_v54 = vcombine.low %v385_v14, %v389_v15  ;;  %v202_v13 = vld [vmem:[#allocation2 + $0x3c8] sm:$0xff]  ;;  %v5217_v14 = vcombine.high %v82_v5, %v86_v7 }
  0x7e   :  { %v381_v53 = vld [vmem:[#allocation2 + $0x960] sm:$0xff]  ;;  %2480 = vmatmul.mubr.bf16.vlgmr.msra.gmra.mxu0 %v6548_v16  ;;  %v206_v15 = vld [vmem:[#allocation2 + $0x3e8] sm:$0xff]  ;;  %v5216_v18 = vcombine.low %v82_v5, %v86_v7 }
  0x7f   :  { %2521 = vmatmul.mubr.bf16.vlgmr.msra.gmra.mxu1 %v6557_v20  ;;  %2530 = vmatpush1.bf16.msra.mxu0 %v5526_v21  ;;  %v5511_v30 = vcombine.high %v377_v24, %v381_v53  ;;  %v369_v31 = vld [vmem:[#allocation2 + $0x900] sm:$0xff]  ;;  %v5510_v36 = vcombine.low %v377_v24, %v381_v53  ;;  %v194_v24 = vld [vmem:[#allocation2 + $0x388] sm:$0xff]  ;;  %v5337_v53 = vcombine.high %v202_v13, %v206_v15 }
  0x80   :  { %2571 = vmatpush1.bf16.msra.mxu1 %v5272_v22  ;;  %2531 = vmatprep.subr.bf16.mxu0 %v5519_v23  ;;  %v373_v32 = vld [vmem:[#allocation2 + $0x920] sm:$0xff]  ;;  %v5336_v27 = vcombine.low %v202_v13, %v206_v15  ;;  %v5328_v35 = vcombine.low %v194_v24, %v198_v25  ;;  %v166_v61 = vld [vmem:[#allocation2 + $0x2a8] sm:$0xff] }
  0x81   :  { %2572 = vmatprep.subr.bf16.mxu1 %v5265_v26  ;;  %2561 = vmatprep.mubr.bf16.mxu0 %v6561_v28  ;;  %v5503_v38 = vcombine.high %v369_v31, %v373_v32  ;;  %v361_v39 = vld [vmem:[#allocation2 + $0x8c0] sm:$0xff]  ;;  %v5502_v44 = vcombine.low %v369_v31, %v373_v32  ;;  %v186_v31 = vld [vmem:[#allocation2 + $0x348] sm:$0xff]  ;;  %v5329_v32 = vcombine.high %v194_v24, %v198_v25 }
  0x82   :  { %2602 = vmatprep.mubr.bf16.mxu1 %v6538_v58  ;;  %v365_v40 = vld [vmem:[#allocation2 + $0x8e0] sm:$0xff]  ;;  %v5320_v43 = vcombine.low %v186_v31, %v190_v33  ;;  %v158_v5 = vld [vmem:[#allocation2 + $0x268] sm:$0xff] }
  0x83   :  { %2532 = vmatpush1.bf16.msra.mxu0 %v5518_v54  ;;  %v5495_v46 = vcombine.high %v361_v39, %v365_v40  ;;  %v353_v47 = vld [vmem:[#allocation2 + $0x880] sm:$0xff]  ;;  %v5494_v52 = vcombine.low %v361_v39, %v365_v40  ;;  %v178_v39 = vld [vmem:[#allocation2 + $0x308] sm:$0xff]  ;;  %v5321_v40 = vcombine.high %v186_v31, %v190_v33 }
  0x84   :  { %2573 = vmatpush1.bf16.msra.mxu1 %v5264_v29  ;;  %2533 = vmatprep.subr.bf16.mxu0 %v5511_v30  ;;  %v357_v48 = vld [vmem:[#allocation2 + $0x8a0] sm:$0xff]  ;;  %v5312_v51 = vcombine.low %v178_v39, %v182_v41  ;;  %v150_v13 = vld [vmem:[#allocation2 + $0x228] sm:$0xff] }
  0x85   :  { %2574 = vmatprep.subr.bf16.mxu1 %v5257_v34  ;;  %v5487_v56 = vcombine.high %v353_v47, %v357_v48  ;;  %v345_v57 = vld [vmem:[#allocation2 + $0x840] sm:$0xff]  ;;  %v5486_v0 = vcombine.low %v353_v47, %v357_v48  ;;  %v170_v47 = vld [vmem:[#allocation2 + $0x2c8] sm:$0xff]  ;;  %v5313_v48 = vcombine.high %v178_v39, %v182_v41 }
  0x86   :  { %v349_v60 = vld [vmem:[#allocation2 + $0x860] sm:$0xff]  ;;  %v5304_v63 = vcombine.low %v170_v47, %v174_v49  ;;  %v398_v24 = vld [vmem:[#allocation2 + $0x9e8] sm:$0xff] }
  0x87   :  { %2534 = vmatpush1.bf16.msra.mxu0 %v5510_v36  ;;  %v5479_v2 = vcombine.high %v345_v57, %v349_v60  ;;  %v337_v3 = vld [vmem:[#allocation2 + $0x800] sm:$0xff]  ;;  %v5478_v8 = vcombine.low %v345_v57, %v349_v60  ;;  %v162_v57 = vld [vmem:[#allocation2 + $0x288] sm:$0xff]  ;;  %v5305_v60 = vcombine.high %v170_v47, %v174_v49 }
  0x88   :  { %2575 = vmatpush1.bf16.msra.mxu1 %v5256_v37  ;;  %2535 = vmatprep.subr.bf16.mxu0 %v5503_v38  ;;  %v341_v4 = vld [vmem:[#allocation2 + $0x820] sm:$0xff]  ;;  %v5296_v7 = vcombine.low %v162_v57, %v166_v61  ;;  %v390_v31 = vld [vmem:[#allocation2 + $0x9a8] sm:$0xff] }
  0x89   :  { %2576 = vmatprep.subr.bf16.mxu1 %v5249_v42  ;;  %v5471_v10 = vcombine.high %v337_v3, %v341_v4  ;;  %v457_v11 = vld [vmem:[#allocation2 + $0xbc0] sm:$0xff]  ;;  %v5470_v17 = vcombine.low %v337_v3, %v341_v4  ;;  %v154_v3 = vld [vmem:[#allocation2 + $0x248] sm:$0xff]  ;;  %v5297_v4 = vcombine.high %v162_v57, %v166_v61 }
  0x8a   :  { %v461_v12 = vld [vmem:[#allocation2 + $0xbe0] sm:$0xff]  ;;  %v5288_v15 = vcombine.low %v154_v3, %v158_v5  ;;  %v378_v39 = vld [vmem:[#allocation2 + $0x948] sm:$0xff] }
  0x8b   :  { %2536 = vmatpush1.bf16.msra.mxu0 %v5502_v44  ;;  %v5591_v21 = vcombine.high %v457_v11, %v461_v12  ;;  %v449_v22 = vld [vmem:[#allocation2 + $0xb80] sm:$0xff]  ;;  %v5590_v26 = vcombine.low %v457_v11, %v461_v12  ;;  %v146_v11 = vld [vmem:[#allocation2 + $0x208] sm:$0xff]  ;;  %v5289_v12 = vcombine.high %v154_v3, %v158_v5 }
  0x8c   :  { %2577 = vmatpush1.bf16.msra.mxu1 %v5248_v45  ;;  %2537 = vmatprep.subr.bf16.mxu0 %v5495_v46  ;;  %v453_v23 = vld [vmem:[#allocation2 + $0xba0] sm:$0xff]  ;;  %v5280_v25 = vcombine.low %v146_v11, %v150_v13  ;;  %v374_v47 = vld [vmem:[#allocation2 + $0x928] sm:$0xff] }
  0x8d   :  { %2578 = vmatprep.subr.bf16.mxu1 %v5241_v50  ;;  %v5583_v54 = vcombine.high %v449_v22, %v453_v23  ;;  %v441_v29 = vld [vmem:[#allocation2 + $0xb40] sm:$0xff]  ;;  %v5582_v34 = vcombine.low %v449_v22, %v453_v23  ;;  %v394_v22 = vld [vmem:[#allocation2 + $0x9c8] sm:$0xff]  ;;  %v5281_v23 = vcombine.high %v146_v11, %v150_v13 }
  0x8e   :  { %v445_v30 = vld [vmem:[#allocation2 + $0xb60] sm:$0xff]  ;;  %v366_v57 = vld [vmem:[#allocation2 + $0x8e8] sm:$0xff] }
  0x8f   :  { %2538 = vmatpush1.bf16.msra.mxu0 %v5494_v52  ;;  %v5575_v36 = vcombine.high %v441_v29, %v445_v30  ;;  %v433_v37 = vld [vmem:[#allocation2 + $0xb00] sm:$0xff]  ;;  %v5574_v42 = vcombine.low %v441_v29, %v445_v30  ;;  %v386_v29 = vld [vmem:[#allocation2 + $0x988] sm:$0xff]  ;;  %v5529_v30 = vcombine.high %v394_v22, %v398_v24 }
  0x90   :  { %2579 = vmatpush1.bf16.msra.mxu1 %v5240_v55  ;;  %2539 = vmatprep.subr.bf16.mxu0 %v5487_v56  ;;  %v437_v38 = vld [vmem:[#allocation2 + $0xb20] sm:$0xff]  ;;  %v358_v3 = vld [vmem:[#allocation2 + $0x8a8] sm:$0xff] }
  0x91   :  { %2580 = vmatprep.subr.bf16.mxu1 %v5233_v62  ;;  %v5567_v44 = vcombine.high %v433_v37, %v437_v38  ;;  %v425_v45 = vld [vmem:[#allocation2 + $0xac0] sm:$0xff]  ;;  %v5566_v50 = vcombine.low %v433_v37, %v437_v38  ;;  %v254_v37 = vld [vmem:[#allocation2 + $0x568] sm:$0xff]  ;;  %v5521_v38 = vcombine.high %v386_v29, %v390_v31 }
  0x92   :  { %v429_v46 = vld [vmem:[#allocation2 + $0xae0] sm:$0xff]  ;;  %v350_v11 = vld [vmem:[#allocation2 + $0x868] sm:$0xff] }
  0x93   :  { %2540 = vmatpush1.bf16.msra.mxu0 %v5486_v0  ;;  %v5559_v52 = vcombine.high %v425_v45, %v429_v46  ;;  %v417_v55 = vld [vmem:[#allocation2 + $0xa80] sm:$0xff]  ;;  %v5558_v62 = vcombine.low %v425_v45, %v429_v46  ;;  %v370_v45 = vld [vmem:[#allocation2 + $0x908] sm:$0xff] }
  0x94   :  { %2581 = vmatpush1.bf16.msra.mxu1 %v5232_v1  ;;  %2541 = vmatprep.subr.bf16.mxu0 %v5479_v2  ;;  %v421_v56 = vld [vmem:[#allocation2 + $0xaa0] sm:$0xff]  ;;  %v5504_v61 = vcombine.low %v370_v45, %v374_v47 }
  0x95   :  { %2582 = vmatprep.subr.bf16.mxu1 %v5225_v6  ;;  %v5551_v0 = vcombine.high %v417_v55, %v421_v56  ;;  %v409_v1 = vld [vmem:[#allocation2 + $0xa40] sm:$0xff]  ;;  %v5550_v6 = vcombine.low %v417_v55, %v421_v56  ;;  %v362_v55 = vld [vmem:[#allocation2 + $0x8c8] sm:$0xff]  ;;  %v5505_v56 = vcombine.high %v370_v45, %v374_v47 }
  0x96   :  { %v413_v2 = vld [vmem:[#allocation2 + $0xa60] sm:$0xff]  ;;  %v5496_v5 = vcombine.low %v362_v55, %v366_v57  ;;  %v446_v45 = vld [vmem:[#allocation2 + $0xb68] sm:$0xff] }
  0x97   :  { %2542 = vmatpush1.bf16.msra.mxu0 %v5478_v8  ;;  %v5543_v8 = vcombine.high %v409_v1, %v413_v2 }
  0x98   :  { %2583 = vmatpush1.bf16.msra.mxu1 %v5224_v9  ;;  %2543 = vmatprep.subr.bf16.mxu0 %v5471_v10  ;;  %v401_v9 = vld [vmem:[#allocation2 + $0xa00] sm:$0xff] }
  0x99   :  { %2584 = vmatprep.subr.bf16.mxu1 %v5217_v14  ;;  %v405_v10 = vld [vmem:[#allocation2 + $0xa20] sm:$0xff]  ;;  %v5542_v14 = vcombine.low %v409_v1, %v413_v2  ;;  %v354_v1 = vld [vmem:[#allocation2 + $0x888] sm:$0xff]  ;;  %v5497_v2 = vcombine.high %v362_v55, %v366_v57 }
  0x9a   :  { %v5488_v13 = vcombine.low %v354_v1, %v358_v3  ;;  %v438_v55 = vld [vmem:[#allocation2 + $0xb28] sm:$0xff] }
  0x9b   :  { %2544 = vmatpush1.bf16.msra.mxu0 %v5470_v17  ;;  %v5535_v17 = vcombine.high %v401_v9, %v405_v10 }
  0x9c   :  { %2585 = vmatpush1.bf16.msra.mxu1 %v5216_v18  ;;  %2545 = vmatprep.subr.bf16.mxu0 %v5591_v21  ;;  %v266_v18 = vld [vmem:[#allocation2 + $0x5c8] sm:$0xff] }
  0x9d   :  { %2586 = vmatprep.subr.bf16.mxu1 %v5337_v53  ;;  %v270_v21 = vld [vmem:[#allocation2 + $0x5e8] sm:$0xff]  ;;  %v5534_v53 = vcombine.low %v401_v9, %v405_v10  ;;  %v5489_v10 = vcombine.high %v354_v1, %v358_v3 }
  0x9e   :  { %v5400_v33 = vcombine.low %v266_v18, %v270_v21  ;;  %v346_v9 = vld [vmem:[#allocation2 + $0x848] sm:$0xff] }
  0x9f   :  { %2546 = vmatpush2.bf16.msra.mxu0 %v5590_v26  ;;  %v5401_v26 = vcombine.high %v266_v18, %v270_v21  ;;  %v338_v18 = vld [vmem:[#allocation2 + $0x808] sm:$0xff]  ;;  %v5481_v21 = vcombine.high %v346_v9, %v350_v11 }
  0xa0   :  { %2587 = vmatpush2.bf16.msra.mxu1 %v5336_v27  ;;  %2547 = vmatprep.subr.bf16.mxu0 %v5583_v54  ;;  %v258_v27 = vld [vmem:[#allocation2 + $0x588] sm:$0xff] }
  0xa1   :  { %2588 = vmatprep.subr.bf16.mxu1 %v5329_v32  ;;  %v262_v54 = vld [vmem:[#allocation2 + $0x5a8] sm:$0xff]  ;;  %v6569_v32 = vcombine.low %v6553_v19, %v6553_v19  ;;  %v5520_v19 = vcombine.low %v386_v29, %v390_v31 }
  0xa2   :  { %v5392_v41 = vcombine.low %v258_v27, %v262_v54  ;;  %v462_v29 = vld [vmem:[#allocation2 + $0xbe8] sm:$0xff] }
  0xa3   :  { %2548 = vmatpush2.bf16.msra.mxu0 %v5582_v34  ;;  %v5528_v34 = vcombine.low %v394_v22, %v398_v24  ;;  %v342_v22 = vld [vmem:[#allocation2 + $0x828] sm:$0xff]  ;;  %v5480_v24 = vcombine.low %v346_v9, %v350_v11 }
  0xa4   :  { %2589 = vmatpush2.bf16.msra.mxu1 %v5328_v35  ;;  %2549 = vmatprep.subr.bf16.mxu0 %v5575_v36  ;;  %v5393_v35 = vcombine.high %v258_v27, %v262_v54  ;;  %v250_v36 = vld [vmem:[#allocation2 + $0x548] sm:$0xff]  ;;  %v5473_v54 = vcombine.high %v338_v18, %v342_v22  ;;  %v5472_v31 = vcombine.low %v338_v18, %v342_v22 }
  0xa5   :  { %2590 = vmatprep.subr.bf16.mxu1 %v5321_v40  ;;  %v382_v40 = vld [vmem:[#allocation2 + $0x968] sm:$0xff] }
  0xa6   :  { %v5513_v46 = vcombine.high %v378_v39, %v382_v40  ;;  %v5512_v49 = vcombine.low %v378_v39, %v382_v40  ;;  %v458_v27 = vld [vmem:[#allocation2 + $0xbc8] sm:$0xff] }
  0xa7   :  { %2550 = vmatpush2.bf16.msra.mxu0 %v5574_v42  ;;  %v5385_v42 = vcombine.high %v250_v36, %v254_v37  ;;  %v5592_v40 = vcombine.low %v458_v27, %v462_v29  ;;  %v430_v1 = vld [vmem:[#allocation2 + $0xae8] sm:$0xff] }
  0xa8   :  { %2591 = vmatpush2.bf16.msra.mxu1 %v5320_v43  ;;  %2551 = vmatprep.subr.bf16.mxu0 %v5567_v44  ;;  %v242_v43 = vld [vmem:[#allocation2 + $0x508] sm:$0xff] }
  0xa9   :  { %2592 = vmatprep.subr.bf16.mxu1 %v5313_v48  ;;  %v246_v44 = vld [vmem:[#allocation2 + $0x528] sm:$0xff]  ;;  %v5384_v48 = vcombine.low %v250_v36, %v254_v37  ;;  %v5593_v37 = vcombine.high %v458_v27, %v462_v29 }
  0xaa   :  { %v450_v36 = vld [vmem:[#allocation2 + $0xb88] sm:$0xff] }
  0xab   :  { %2552 = vmatpush2.bf16.msra.mxu0 %v5566_v50  ;;  %v5377_v50 = vcombine.high %v242_v43, %v246_v44  ;;  %v422_v9 = vld [vmem:[#allocation2 + $0xaa8] sm:$0xff] }
  0xac   :  { %2593 = vmatpush2.bf16.msra.mxu1 %v5312_v51  ;;  %2553 = vmatprep.subr.bf16.mxu0 %v5559_v52  ;;  %v234_v51 = vld [vmem:[#allocation2 + $0x4c8] sm:$0xff] }
  0xad   :  { %2594 = vmatprep.subr.bf16.mxu1 %v5305_v60  ;;  %v238_v52 = vld [vmem:[#allocation2 + $0x4e8] sm:$0xff]  ;;  %v5376_v60 = vcombine.low %v242_v43, %v246_v44 }
  0xae   :  { %v442_v43 = vld [vmem:[#allocation2 + $0xb48] sm:$0xff] }
  0xaf   :  { %2554 = vmatpush2.bf16.msra.mxu0 %v5558_v62  ;;  %v5369_v62 = vcombine.high %v234_v51, %v238_v52  ;;  %v5576_v57 = vcombine.low %v442_v43, %v446_v45  ;;  %v414_v18 = vld [vmem:[#allocation2 + $0xa68] sm:$0xff] }
  0xb0   :  { %2595 = vmatpush2.bf16.msra.mxu1 %v5304_v63  ;;  %2555 = vmatprep.subr.bf16.mxu0 %v5551_v0  ;;  %v226_v63 = vld [vmem:[#allocation2 + $0x488] sm:$0xff] }
  0xb1   :  { %2596 = vmatprep.subr.bf16.mxu1 %v5297_v4  ;;  %v230_v0 = vld [vmem:[#allocation2 + $0x4a8] sm:$0xff]  ;;  %v5368_v4 = vcombine.low %v234_v51, %v238_v52  ;;  %v5577_v52 = vcombine.high %v442_v43, %v446_v45  ;;  %v263_v43 = vld [vmem:[#allocation2 + $0x5b0] sm:$0xff] }
  0xb2   :  { %v434_v51 = vld [vmem:[#allocation2 + $0xb08] sm:$0xff] }
  0xb3   :  { %2556 = vmatpush2.bf16.msra.mxu0 %v5550_v6  ;;  %v5361_v6 = vcombine.high %v226_v63, %v230_v0  ;;  %v5568_v3 = vcombine.low %v434_v51, %v438_v55  ;;  %v406_v27 = vld [vmem:[#allocation2 + $0xa28] sm:$0xff] }
  0xb4   :  { %2597 = vmatpush2.bf16.msra.mxu1 %v5296_v7  ;;  %2557 = vmatprep.subr.bf16.mxu0 %v5543_v8  ;;  %v218_v7 = vld [vmem:[#allocation2 + $0x448] sm:$0xff] }
  0xb5   :  { %2598 = vmatprep.subr.bf16.mxu1 %v5289_v12  ;;  %v222_v8 = vld [vmem:[#allocation2 + $0x468] sm:$0xff]  ;;  %v5360_v12 = vcombine.low %v226_v63, %v230_v0  ;;  %v5569_v0 = vcombine.high %v434_v51, %v438_v55  ;;  %v255_v51 = vld [vmem:[#allocation2 + $0x570] sm:$0xff] }
  0xb6   :  { %v426_v63 = vld [vmem:[#allocation2 + $0xac8] sm:$0xff] }
  0xb7   :  { %2558 = vmatpush2.bf16.msra.mxu0 %v5542_v14  ;;  %v5353_v14 = vcombine.high %v218_v7, %v222_v8  ;;  %v5560_v11 = vcombine.low %v426_v63, %v430_v1 }
  0xb8   :  { %2599 = vmatpush2.bf16.msra.mxu1 %v5288_v15  ;;  %2559 = vmatprep.subr.bf16.mxu0 %v5535_v17  ;;  %v210_v15 = vld [vmem:[#allocation2 + $0x408] sm:$0xff] }
  0xb9   :  { %2600 = vmatprep.subr.bf16.mxu1 %v5281_v23  ;;  %v214_v17 = vld [vmem:[#allocation2 + $0x428] sm:$0xff]  ;;  %v5352_v23 = vcombine.low %v218_v7, %v222_v8  ;;  %v5561_v8 = vcombine.high %v426_v63, %v430_v1  ;;  %v247_v63 = vld [vmem:[#allocation2 + $0x530] sm:$0xff] }
  0xba   :  { %v418_v7 = vld [vmem:[#allocation2 + $0xa88] sm:$0xff] }
  0xbb   :  { %2560 = vmatpush2.bf16.msra.mxu0 %v5534_v53  ;;  %v5345_v53 = vcombine.high %v210_v15, %v214_v17  ;;  %v5552_v22 = vcombine.low %v418_v7, %v422_v9 }
  0xbc   :  { %2601 = vmatpush2.bf16.msra.mxu1 %v5280_v25  ;;  %2611 = vmatprep.subr.bf16.mxu0 %v5401_v26  ;;  %v330_v25 = vld [vmem:[#allocation2 + $0x7c8] sm:$0xff] }
  0xbd   :  { %2652 = vmatprep.subr.bf16.mxu1 %v5529_v30  ;;  %v334_v26 = vld [vmem:[#allocation2 + $0x7e8] sm:$0xff]  ;;  %v5344_v30 = vcombine.low %v210_v15, %v214_v17  ;;  %v5553_v17 = vcombine.high %v418_v7, %v422_v9  ;;  %v239_v7 = vld [vmem:[#allocation2 + $0x4f0] sm:$0xff] }
  0xbe   :  { %2562 = vmatmul.mubr.bf16.vlgmr.msra.gmra.mxu0 %v6569_v32  ;;  %v5464_v39 = vcombine.low %v330_v25, %v334_v26  ;;  %v410_v15 = vld [vmem:[#allocation2 + $0xa48] sm:$0xff] }
  0xbf   :  { %2603 = vmatmul.mubr.bf16.vlgmr.msra.gmra.mxu1 %v6548_v16  ;;  %2612 = vmatpush1.bf16.msra.mxu0 %v5400_v33  ;;  %v5465_v33 = vcombine.high %v330_v25, %v334_v26  ;;  %v402_v25 = vld [vmem:[#allocation2 + $0xa08] sm:$0xff]  ;;  %v5545_v26 = vcombine.high %v410_v15, %v414_v18  ;;  %v5544_v29 = vcombine.low %v410_v15, %v414_v18  ;;  %v231_v15 = vld [vmem:[#allocation2 + $0x4b0] sm:$0xff] }
  0xc0   :  { %2653 = vmatpush1.bf16.msra.mxu1 %v5528_v34  ;;  %2613 = vmatprep.subr.bf16.mxu0 %v5393_v35  ;;  %v322_v34 = vld [vmem:[#allocation2 + $0x788] sm:$0xff] }
  0xc1   :  { %2654 = vmatprep.subr.bf16.mxu1 %v5521_v38  ;;  %2643 = vmatprep.mubr.bf16.mxu0 %v6542_v59  ;;  %v326_v35 = vld [vmem:[#allocation2 + $0x7a8] sm:$0xff] }
  0xc2   :  { %2684 = vmatprep.mubr.bf16.mxu1 %v6561_v28  ;;  %v454_v38 = vld [vmem:[#allocation2 + $0xba8] sm:$0xff] }
  0xc3   :  { %2614 = vmatpush1.bf16.msra.mxu0 %v5392_v41  ;;  %v5457_v41 = vcombine.high %v322_v34, %v326_v35  ;;  %v5585_v44 = vcombine.high %v450_v36, %v454_v38  ;;  %v5584_v47 = vcombine.low %v450_v36, %v454_v38  ;;  %v271_v36 = vld [vmem:[#allocation2 + $0x5f0] sm:$0xff]  ;;  %v5536_v38 = vcombine.low %v402_v25, %v406_v27 }
  0xc4   :  { %2655 = vmatpush1.bf16.msra.mxu1 %v5520_v19  ;;  %2615 = vmatprep.subr.bf16.mxu0 %v5385_v42  ;;  %v314_v19 = vld [vmem:[#allocation2 + $0x748] sm:$0xff] }
  0xc5   :  { %2656 = vmatprep.subr.bf16.mxu1 %v5513_v46  ;;  %v318_v42 = vld [vmem:[#allocation2 + $0x768] sm:$0xff]  ;;  %v5456_v46 = vcombine.low %v322_v34, %v326_v35  ;;  %v267_v34 = vld [vmem:[#allocation2 + $0x5d0] sm:$0xff]  ;;  %v5537_v35 = vcombine.high %v402_v25, %v406_v27 }
  0xc6   :  { %v5402_v45 = vcombine.low %v267_v34, %v271_v36  ;;  %v223_v25 = vld [vmem:[#allocation2 + $0x470] sm:$0xff] }
  0xc7   :  { %2616 = vmatpush1.bf16.msra.mxu0 %v5384_v48  ;;  %v5449_v48 = vcombine.high %v314_v19, %v318_v42 }
  0xc8   :  { %2657 = vmatpush1.bf16.msra.mxu1 %v5512_v49  ;;  %2617 = vmatprep.subr.bf16.mxu0 %v5377_v50  ;;  %v306_v49 = vld [vmem:[#allocation2 + $0x708] sm:$0xff] }
  0xc9   :  { %2658 = vmatprep.subr.bf16.mxu1 %v5505_v56  ;;  %v310_v50 = vld [vmem:[#allocation2 + $0x728] sm:$0xff]  ;;  %v5448_v56 = vcombine.low %v314_v19, %v318_v42  ;;  %v259_v19 = vld [vmem:[#allocation2 + $0x590] sm:$0xff]  ;;  %v5403_v42 = vcombine.high %v267_v34, %v271_v36 }
  0xca   :  { %v5394_v55 = vcombine.low %v259_v19, %v263_v43  ;;  %v215_v34 = vld [vmem:[#allocation2 + $0x430] sm:$0xff] }
  0xcb   :  { %2618 = vmatpush1.bf16.msra.mxu0 %v5376_v60  ;;  %v5441_v60 = vcombine.high %v306_v49, %v310_v50 }
  0xcc   :  { %2659 = vmatpush1.bf16.msra.mxu1 %v5504_v61  ;;  %2619 = vmatprep.subr.bf16.mxu0 %v5369_v62  ;;  %v298_v61 = vld [vmem:[#allocation2 + $0x6c8] sm:$0xff] }
  0xcd   :  { %2660 = vmatprep.subr.bf16.mxu1 %v5497_v2  ;;  %v302_v62 = vld [vmem:[#allocation2 + $0x6e8] sm:$0xff]  ;;  %v5440_v2 = vcombine.low %v306_v49, %v310_v50  ;;  %v251_v49 = vld [vmem:[#allocation2 + $0x550] sm:$0xff]  ;;  %v5395_v50 = vcombine.high %v259_v19, %v263_v43 }
  0xce   :  { %v5386_v1 = vcombine.low %v251_v49, %v255_v51  ;;  %v335_v19 = vld [vmem:[#allocation2 + $0x7f0] sm:$0xff] }
  0xcf   :  { %2620 = vmatpush1.bf16.msra.mxu0 %v5368_v4  ;;  %v5433_v4 = vcombine.high %v298_v61, %v302_v62 }
  0xd0   :  { %2661 = vmatpush1.bf16.msra.mxu1 %v5496_v5  ;;  %2621 = vmatprep.subr.bf16.mxu0 %v5361_v6  ;;  %v290_v5 = vld [vmem:[#allocation2 + $0x688] sm:$0xff] }
  0xd1   :  { %2662 = vmatprep.subr.bf16.mxu1 %v5489_v10  ;;  %v294_v6 = vld [vmem:[#allocation2 + $0x6a8] sm:$0xff]  ;;  %v5432_v10 = vcombine.low %v298_v61, %v302_v62  ;;  %v243_v61 = vld [vmem:[#allocation2 + $0x510] sm:$0xff]  ;;  %v5387_v62 = vcombine.high %v251_v49, %v255_v51 }
  0xd2   :  { %v5378_v9 = vcombine.low %v243_v61, %v247_v63  ;;  %v327_v49 = vld [vmem:[#allocation2 + $0x7b0] sm:$0xff] }
  0xd3   :  { %2622 = vmatpush1.bf16.msra.mxu0 %v5360_v12  ;;  %v5425_v12 = vcombine.high %v290_v5, %v294_v6 }
  0xd4   :  { %2663 = vmatpush1.bf16.msra.mxu1 %v5488_v13  ;;  %2623 = vmatprep.subr.bf16.mxu0 %v5353_v14  ;;  %v282_v13 = vld [vmem:[#allocation2 + $0x648] sm:$0xff] }
  0xd5   :  { %2664 = vmatprep.subr.bf16.mxu1 %v5481_v21  ;;  %v286_v14 = vld [vmem:[#allocation2 + $0x668] sm:$0xff]  ;;  %v5424_v21 = vcombine.low %v290_v5, %v294_v6  ;;  %v235_v5 = vld [vmem:[#allocation2 + $0x4d0] sm:$0xff]  ;;  %v5379_v6 = vcombine.high %v243_v61, %v247_v63 }
  0xd6   :  { %v5370_v18 = vcombine.low %v235_v5, %v239_v7  ;;  %v319_v61 = vld [vmem:[#allocation2 + $0x770] sm:$0xff] }
  0xd7   :  { %2624 = vmatpush1.bf16.msra.mxu0 %v5352_v23  ;;  %v5417_v23 = vcombine.high %v282_v13, %v286_v14 }
  0xd8   :  { %2665 = vmatpush1.bf16.msra.mxu1 %v5480_v24  ;;  %2625 = vmatprep.subr.bf16.mxu0 %v5345_v53  ;;  %v274_v24 = vld [vmem:[#allocation2 + $0x608] sm:$0xff] }
  0xd9   :  { %2666 = vmatprep.subr.bf16.mxu1 %v5473_v54  ;;  %v278_v53 = vld [vmem:[#allocation2 + $0x628] sm:$0xff]  ;;  %v5416_v54 = vcombine.low %v282_v13, %v286_v14  ;;  %v227_v13 = vld [vmem:[#allocation2 + $0x490] sm:$0xff]  ;;  %v5371_v14 = vcombine.high %v235_v5, %v239_v7 }
  0xda   :  { %v5362_v27 = vcombine.low %v227_v13, %v231_v15  ;;  %v311_v5 = vld [vmem:[#allocation2 + $0x730] sm:$0xff] }
  0xdb   :  { %2626 = vmatpush1.bf16.msra.mxu0 %v5344_v30  ;;  %v5409_v30 = vcombine.high %v274_v24, %v278_v53 }
  0xdc   :  { %2667 = vmatpush1.bf16.msra.mxu1 %v5472_v31  ;;  %2627 = vmatprep.subr.bf16.mxu0 %v5465_v33  ;;  %v139_v31 = vld [vmem:[#allocation2 + $0x1d0] sm:$0xff] }
  0xdd   :  { %2668 = vmatprep.subr.bf16.mxu1 %v5593_v37  ;;  %v143_v33 = vld [vmem:[#allocation2 + $0x1f0] sm:$0xff]  ;;  %v5408_v37 = vcombine.low %v274_v24, %v278_v53  ;;  %v5363_v53 = vcombine.high %v227_v13, %v231_v15 }
  0xde   :  { %v219_v24 = vld [vmem:[#allocation2 + $0x450] sm:$0xff] }
  0xdf   :  { %2628 = vmatpush2.bf16.msra.mxu0 %v5464_v39  ;;  %v5275_v39 = vcombine.high %v139_v31, %v143_v33  ;;  %v5354_v36 = vcombine.low %v219_v24, %v223_v25  ;;  %v303_v13 = vld [vmem:[#allocation2 + $0x6f0] sm:$0xff] }
  0xe0   :  { %2669 = vmatpush2.bf16.msra.mxu1 %v5592_v40  ;;  %2629 = vmatprep.subr.bf16.mxu0 %v5457_v41  ;;  %v131_v40 = vld [vmem:[#allocation2 + $0x190] sm:$0xff] }
  0xe1   :  { %2670 = vmatprep.subr.bf16.mxu1 %v5585_v44  ;;  %v135_v41 = vld [vmem:[#allocation2 + $0x1b0] sm:$0xff]  ;;  %v5274_v44 = vcombine.low %v139_v31, %v143_v33  ;;  %v5355_v33 = vcombine.high %v219_v24, %v223_v25 }
  0xe2   :  { %v211_v31 = vld [vmem:[#allocation2 + $0x410] sm:$0xff] }
  0xe3   :  { %2630 = vmatpush2.bf16.msra.mxu0 %v5456_v46  ;;  %v5267_v46 = vcombine.high %v131_v40, %v135_v41  ;;  %v5346_v43 = vcombine.low %v211_v31, %v215_v34  ;;  %v295_v24 = vld [vmem:[#allocation2 + $0x6b0] sm:$0xff] }
  0xe4   :  { %2671 = vmatpush2.bf16.msra.mxu1 %v5584_v47  ;;  %2631 = vmatprep.subr.bf16.mxu0 %v5449_v48  ;;  %v123_v47 = vld [vmem:[#allocation2 + $0x150] sm:$0xff] }
  0xe5   :  { %2672 = vmatprep.subr.bf16.mxu1 %v5577_v52  ;;  %v127_v48 = vld [vmem:[#allocation2 + $0x170] sm:$0xff]  ;;  %v5266_v52 = vcombine.low %v131_v40, %v135_v41  ;;  %v5347_v41 = vcombine.high %v211_v31, %v215_v34  ;;  %v466_v34 = vlaneseq }
  0xe6   :  { %v331_v40 = vld [vmem:[#allocation2 + $0x7d0] sm:$0xff] }
  0xe7   :  { %2632 = vmatpush2.bf16.msra.mxu0 %v5448_v56  ;;  %v5259_v56 = vcombine.high %v123_v47, %v127_v48  ;;  %v5466_v51 = vcombine.low %v331_v40, %v335_v19  ;;  %v287_v31 = vld [vmem:[#allocation2 + $0x670] sm:$0xff] }
  0xe8   :  { %2673 = vmatpush2.bf16.msra.mxu1 %v5576_v57  ;;  %2633 = vmatprep.subr.bf16.mxu0 %v5441_v60  ;;  %v115_v57 = vld [vmem:[#allocation2 + $0x110] sm:$0xff] }
  0xe9   :  { %2674 = vmatprep.subr.bf16.mxu1 %v5569_v0  ;;  %v119_v60 = vld [vmem:[#allocation2 + $0x130] sm:$0xff]  ;;  %v5258_v0 = vcombine.low %v123_v47, %v127_v48  ;;  %v5467_v48 = vcombine.high %v331_v40, %v335_v19 }
  0xea   :  { %v323_v47 = vld [vmem:[#allocation2 + $0x790] sm:$0xff] }
  0xeb   :  { %2634 = vmatpush2.bf16.msra.mxu0 %v5440_v2  ;;  %v5251_v2 = vcombine.high %v115_v57, %v119_v60  ;;  %v5458_v63 = vcombine.low %v323_v47, %v327_v49  ;;  %v275_v40 = vld [vmem:[#allocation2 + $0x610] sm:$0xff] }
  0xec   :  { %2675 = vmatpush2.bf16.msra.mxu1 %v5568_v3  ;;  %2635 = vmatprep.subr.bf16.mxu0 %v5433_v4  ;;  %v107_v3 = vld [vmem:[#allocation2 + $0xd0] sm:$0xff] }
  0xed   :  { %2676 = vmatprep.subr.bf16.mxu1 %v5561_v8  ;;  %v111_v4 = vld [vmem:[#allocation2 + $0xf0] sm:$0xff]  ;;  %v5250_v8 = vcombine.low %v115_v57, %v119_v60 }
  0xee   :  { %v191_v57 = vld [vmem:[#allocation2 + $0x370] sm:$0xff] }
  0xef   :  { %2636 = vmatpush2.bf16.msra.mxu0 %v5432_v10  ;;  %v5243_v10 = vcombine.high %v107_v3, %v111_v4  ;;  %v315_v60 = vld [vmem:[#allocation2 + $0x750] sm:$0xff] }
  0xf0   :  { %2677 = vmatpush2.bf16.msra.mxu1 %v5560_v11  ;;  %2637 = vmatprep.subr.bf16.mxu0 %v5425_v12  ;;  %v99_v11 = vld [vmem:[#allocation2 + $0x90] sm:$0xff]  ;;  %v5450_v7 = vcombine.low %v315_v60, %v319_v61 }
  0xf1   :  { %2678 = vmatprep.subr.bf16.mxu1 %v5553_v17  ;;  %v103_v12 = vld [vmem:[#allocation2 + $0xb0] sm:$0xff]  ;;  %v5242_v17 = vcombine.low %v107_v3, %v111_v4 }
  0xf2   :  { %v183_v3 = vld [vmem:[#allocation2 + $0x330] sm:$0xff] }
  0xf3   :  { %2638 = vmatpush2.bf16.msra.mxu0 %v5424_v21  ;;  %v5235_v21 = vcombine.high %v99_v11, %v103_v12  ;;  %v307_v4 = vld [vmem:[#allocation2 + $0x710] sm:$0xff] }
  0xf4   :  { %2679 = vmatpush2.bf16.msra.mxu1 %v5552_v22  ;;  %2639 = vmatprep.subr.bf16.mxu0 %v5417_v23  ;;  %v91_v22 = vld [vmem:[#allocation2 + $0x50] sm:$0xff]  ;;  %v5442_v15 = vcombine.low %v307_v4, %v311_v5 }
  0xf5   :  { %2680 = vmatprep.subr.bf16.mxu1 %v5545_v26  ;;  %v95_v23 = vld [vmem:[#allocation2 + $0x70] sm:$0xff]  ;;  %v5234_v26 = vcombine.low %v99_v11, %v103_v12 }
  0xf6   :  { %v175_v11 = vld [vmem:[#allocation2 + $0x2f0] sm:$0xff] }
  0xf7   :  { %2640 = vmatpush2.bf16.msra.mxu0 %v5416_v54  ;;  %v5227_v54 = vcombine.high %v91_v22, %v95_v23  ;;  %v299_v12 = vld [vmem:[#allocation2 + $0x6d0] sm:$0xff] }
  0xf8   :  { %2681 = vmatpush2.bf16.msra.mxu1 %v5544_v29  ;;  %2641 = vmatprep.subr.bf16.mxu0 %v5409_v30  ;;  %v83_v29 = vld [vmem:[#allocation2 + $0x10] sm:$0xff]  ;;  %v5434_v25 = vcombine.low %v299_v12, %v303_v13 }
  0xf9   :  { %2682 = vmatprep.subr.bf16.mxu1 %v5537_v35  ;;  %v87_v30 = vld [vmem:[#allocation2 + $0x30] sm:$0xff]  ;;  %v5226_v35 = vcombine.low %v91_v22, %v95_v23 }
  0xfa   :  { %v167_v22 = vld [vmem:[#allocation2 + $0x2b0] sm:$0xff] }
  0xfb   :  { %2642 = vmatpush2.bf16.msra.mxu0 %v5408_v37  ;;  %v5219_v37 = vcombine.high %v83_v29, %v87_v30  ;;  %v291_v23 = vld [vmem:[#allocation2 + $0x690] sm:$0xff] }
  0xfc   :  { %2683 = vmatpush2.bf16.msra.mxu1 %v5536_v38  ;;  %2693 = vmatprep.subr.bf16.mxu0 %v5275_v39  ;;  %v203_v38 = vld [vmem:[#allocation2 + $0x3d0] sm:$0xff] }
  0xfd   :  { %2734 = vmatprep.subr.bf16.mxu1 %v5403_v42  ;;  %v207_v39 = vld [vmem:[#allocation2 + $0x3f0] sm:$0xff]  ;;  %v5218_v42 = vcombine.low %v83_v29, %v87_v30 }
  0xfe   :  { %2644 = vmatmul.mubr.bf16.vlgmr.msra.gmra.mxu0 %v6557_v20  ;;  %v159_v29 = vld [vmem:[#allocation2 + $0x270] sm:$0xff] }
  0xff   :  { %2685 = vmatmul.mubr.bf16.vlgmr.msra.gmra.mxu1 %v6569_v32  ;;  %2694 = vmatpush1.bf16.msra.mxu0 %v5274_v44  ;;  %v5339_v44 = vcombine.high %v203_v38, %v207_v39  ;;  %v283_v30 = vld [vmem:[#allocation2 + $0x650] sm:$0xff] }
 0x100   :  { %2735 = vmatpush1.bf16.msra.mxu1 %v5402_v45  ;;  %2695 = vmatprep.subr.bf16.mxu0 %v5267_v46  ;;  %v195_v45 = vld [vmem:[#allocation2 + $0x390] sm:$0xff] }
 0x101   :  { %2736 = vmatprep.subr.bf16.mxu1 %v5395_v50  ;;  %2725 = vmatprep.mubr.bf16.mxu0 %v6538_v58  ;;  %v199_v46 = vld [vmem:[#allocation2 + $0x3b0] sm:$0xff]  ;;  %v5338_v50 = vcombine.low %v203_v38, %v207_v39 }
 0x102   :  { %2766 = vmatprep.mubr.bf16.mxu1 %v6542_v59  ;;  %v147_v38 = vld [vmem:[#allocation2 + $0x210] sm:$0xff] }
 0x103   :  { %2696 = vmatpush1.bf16.msra.mxu0 %v5266_v52  ;;  %v5331_v52 = vcombine.high %v195_v45, %v199_v46  ;;  %v151_v39 = vld [vmem:[#allocation2 + $0x230] sm:$0xff] }
 0x104   :  { %2737 = vmatpush1.bf16.msra.mxu1 %v5394_v55  ;;  %2697 = vmatprep.subr.bf16.mxu0 %v5259_v56  ;;  %v187_v55 = vld [vmem:[#allocation2 + $0x350] sm:$0xff]  ;;  %v5459_v56 = vcombine.high %v323_v47, %v327_v49  ;;  %v144_v49 = vld [vmem:[#allocation2 + $0x1f8] sm:$0xff] }
 0x105   :  { %2738 = vmatprep.subr.bf16.mxu1 %v5387_v62  ;;  %v5330_v62 = vcombine.low %v195_v45, %v199_v46  ;;  %v395_v46 = vld [vmem:[#allocation2 + $0x9d0] sm:$0xff] }
 0x106   :  { %v399_v47 = vld [vmem:[#allocation2 + $0x9f0] sm:$0xff] }
 0x107   :  { %2698 = vmatpush1.bf16.msra.mxu0 %v5258_v0  ;;  %v5323_v0 = vcombine.high %v187_v55, %v191_v57 }
 0x108   :  { %2739 = vmatpush1.bf16.msra.mxu1 %v5386_v1  ;;  %2699 = vmatprep.subr.bf16.mxu0 %v5251_v2  ;;  %v5451_v1 = vcombine.high %v315_v60, %v319_v61  ;;  %v179_v2 = vld [vmem:[#allocation2 + $0x310] sm:$0xff] }
 0x109   :  { %2740 = vmatprep.subr.bf16.mxu1 %v5379_v6  ;;  %v5322_v6 = vcombine.low %v187_v55, %v191_v57  ;;  %v6582_v55 = vld [vmem:[#allocation8] sm:$0xff]  ;;  %v387_v61 = vld [vmem:[#allocation2 + $0x990] sm:$0xff] }
 0x10b   :  { %2700 = vmatpush1.bf16.msra.mxu0 %v5250_v8  ;;  %v5315_v8 = vcombine.high %v179_v2, %v183_v3 }
 0x10c   :  { %2741 = vmatpush1.bf16.msra.mxu1 %v5378_v9  ;;  %2701 = vmatprep.subr.bf16.mxu0 %v5243_v10  ;;  %v5443_v9 = vcombine.high %v307_v4, %v311_v5  ;;  %v171_v10 = vld [vmem:[#allocation2 + $0x2d0] sm:$0xff] }
 0x10d   :  { %2742 = vmatprep.subr.bf16.mxu1 %v5371_v14  ;;  %v5314_v14 = vcombine.low %v179_v2, %v183_v3  ;;  %v5530_v2 = vcombine.low %v395_v46, %v399_v47 }
 0x10f   :  { %2702 = vmatpush1.bf16.msra.mxu0 %v5242_v17  ;;  %v5307_v17 = vcombine.high %v171_v10, %v175_v11 }
 0x110   :  { %2743 = vmatpush1.bf16.msra.mxu1 %v5370_v18  ;;  %2703 = vmatprep.subr.bf16.mxu0 %v5235_v21  ;;  %v5435_v18 = vcombine.high %v299_v12, %v303_v13  ;;  %v163_v21 = vld [vmem:[#allocation2 + $0x290] sm:$0xff] }
 0x111   :  { %2744 = vmatprep.subr.bf16.mxu1 %v5363_v53  ;;  %v5306_v53 = vcombine.low %v171_v10, %v175_v11  ;;  %v124_v10 = vld [vmem:[#allocation2 + $0x158] sm:$0xff] }
 0x112   :  { %v128_v11 = vld [vmem:[#allocation2 + $0x178] sm:$0xff] }
 0x113   :  { %2704 = vmatpush1.bf16.msra.mxu0 %v5234_v26  ;;  %v5299_v26 = vcombine.high %v163_v21, %v167_v22 }
 0x114   :  { %2745 = vmatpush1.bf16.msra.mxu1 %v5362_v27  ;;  %2705 = vmatprep.subr.bf16.mxu0 %v5227_v54  ;;  %v5427_v27 = vcombine.high %v291_v23, %v295_v24  ;;  %v155_v54 = vld [vmem:[#allocation2 + $0x250] sm:$0xff] }
 0x115   :  { %2746 = vmatprep.subr.bf16.mxu1 %v5355_v33  ;;  %v5298_v33 = vcombine.low %v163_v21, %v167_v22  ;;  %v5290_v19 = vcombine.low %v155_v54, %v159_v29 }
 0x117   :  { %2706 = vmatpush1.bf16.msra.mxu0 %v5226_v35  ;;  %v5426_v35 = vcombine.low %v291_v23, %v295_v24  ;;  %v5261_v24 = vcombine.high %v124_v10, %v128_v11 }
 0x118   :  { %2747 = vmatpush1.bf16.msra.mxu1 %v5354_v36  ;;  %2707 = vmatprep.subr.bf16.mxu0 %v5219_v37  ;;  %v5291_v36 = vcombine.high %v155_v54, %v159_v29  ;;  %v5419_v37 = vcombine.high %v283_v30, %v287_v31  ;;  %v120_v54 = vld [vmem:[#allocation2 + $0x138] sm:$0xff] }
 0x119   :  { %2748 = vmatprep.subr.bf16.mxu1 %v5347_v41  ;;  %v279_v41 = vld [vmem:[#allocation2 + $0x630] sm:$0xff] }
 0x11a   :  { %v5411_v45 = vcombine.high %v275_v40, %v279_v41 }
 0x11b   :  { %2708 = vmatpush1.bf16.msra.mxu0 %v5218_v42  ;;  %v6579_v42 = vshrl.u32 %v466_v34, 7  ;;  %v5260_v34 = vcombine.low %v124_v10, %v128_v11 }
 0x11c   :  { %2749 = vmatpush1.bf16.msra.mxu1 %v5346_v43  ;;  %2709 = vmatprep.subr.bf16.mxu0 %v5339_v44  ;;  %v5418_v43 = vcombine.low %v283_v30, %v287_v31  ;;  %v5283_v44 = vcombine.high %v147_v38, %v151_v39 }
 0x11d   :  { %2750 = vmatprep.subr.bf16.mxu1 %v5467_v48  ;;  %v140_v48 = vld [vmem:[#allocation2 + $0x1d8] sm:$0xff]  ;;  %v472_v60 = vsub.s32 1, %v6579_v42 }
 0x11e   :  { %v5277_v57 = vcombine.high %v140_v48, %v144_v49  ;;  %v5276_v3 = vcombine.low %v140_v48, %v144_v49  ;;  %v104_v48 = vld [vmem:[#allocation2 + $0xb8] sm:$0xff] }
 0x11f   :  { %2710 = vmatpush2.bf16.msra.mxu0 %v5338_v50  ;;  %v5282_v50 = vcombine.low %v147_v38, %v151_v39  ;;  %v473_v5 = vrot.slane %v6582_v55, %v472_v60  ;;  %v363_v38 = vld [vmem:[#allocation2 + $0x8d0] sm:$0xff] }
 0x120   :  { %2751 = vmatpush2.bf16.msra.mxu1 %v5466_v51  ;;  %2711 = vmatprep.subr.bf16.mxu0 %v5331_v52  ;;  %v468_v51 = vsub.s32 0, %v6579_v42  ;;  %v5410_v52 = vcombine.low %v275_v40, %v279_v41  ;;  %v367_v39 = vld [vmem:[#allocation2 + $0x8f0] sm:$0xff]  ;;  %v108_v40 = vld [vmem:[#allocation2 + $0xd8] sm:$0xff] }
 0x121   :  { %2752 = vmatprep.subr.bf16.mxu1 %v5459_v56  ;;  %v5531_v56 = vcombine.high %v395_v46, %v399_v47  ;;  %v112_v41 = vld [vmem:[#allocation2 + $0xf8] sm:$0xff]  ;;  %v359_v46 = vld [vmem:[#allocation2 + $0x8b0] sm:$0xff]  ;;  %v5498_v49 = vcombine.low %v363_v38, %v367_v39 }
 0x122   :  { %v100_v47 = vld [vmem:[#allocation2 + $0x98] sm:$0xff] }
 0x123   :  { %2712 = vmatpush2.bf16.msra.mxu0 %v5330_v62  ;;  %v391_v62 = vld [vmem:[#allocation2 + $0x9b0] sm:$0xff] }
 0x124   :  { %2753 = vmatpush2.bf16.msra.mxu1 %v5458_v63  ;;  %2713 = vmatprep.subr.bf16.mxu0 %v5323_v0  ;;  %v132_v63 = vld [vmem:[#allocation2 + $0x198] sm:$0xff]  ;;  %v5523_v4 = vcombine.high %v387_v61, %v391_v62 }
 0x125   :  { %2754 = vmatprep.subr.bf16.mxu1 %v5451_v1  ;;  %v136_v0 = vld [vmem:[#allocation2 + $0x1b8] sm:$0xff]  ;;  %v469_v1 = vrot.slane %v6582_v55, %v468_v51 }
 0x127   :  { %2714 = vmatpush2.bf16.msra.mxu0 %v5322_v6  ;;  %v5269_v6 = vcombine.high %v132_v63, %v136_v0 }
 0x128   :  { %2755 = vmatpush2.bf16.msra.mxu1 %v5450_v7  ;;  %2715 = vmatprep.subr.bf16.mxu0 %v5315_v8  ;;  %v379_v7 = vld [vmem:[#allocation2 + $0x950] sm:$0xff] }
 0x129   :  { %2756 = vmatprep.subr.bf16.mxu1 %v5443_v9  ;;  %v383_v8 = vld [vmem:[#allocation2 + $0x970] sm:$0xff] }
 0x12a   :  { %v5514_v31 = vcombine.low %v379_v7, %v383_v8 }
 0x12b   :  { %2716 = vmatpush2.bf16.msra.mxu0 %v5314_v14  ;;  %v5522_v14 = vcombine.low %v387_v61, %v391_v62  ;;  %v351_v61 = vld [vmem:[#allocation2 + $0x870] sm:$0xff]  ;;  %v92_v62 = vld [vmem:[#allocation2 + $0x58] sm:$0xff] }
 0x12c   :  { %2757 = vmatpush2.bf16.msra.mxu1 %v5442_v15  ;;  %2717 = vmatprep.subr.bf16.mxu0 %v5307_v17  ;;  %v5268_v17 = vcombine.low %v132_v63, %v136_v0  ;;  %v96_v63 = vld [vmem:[#allocation2 + $0x78] sm:$0xff] }
 0x12d   :  { %2758 = vmatprep.subr.bf16.mxu1 %v5435_v18  ;;  %v5515_v18 = vcombine.high %v379_v7, %v383_v8  ;;  %v88_v7 = vld [vmem:[#allocation2 + $0x38] sm:$0xff] }
 0x12f   :  { %2718 = vmatpush2.bf16.msra.mxu0 %v5306_v53  ;;  %v371_v53 = vld [vmem:[#allocation2 + $0x910] sm:$0xff] }
 0x130   :  { %2759 = vmatpush2.bf16.msra.mxu1 %v5434_v25  ;;  %2719 = vmatprep.subr.bf16.mxu0 %v5299_v26  ;;  %v375_v25 = vld [vmem:[#allocation2 + $0x930] sm:$0xff] }
 0x131   :  { %2760 = vmatprep.subr.bf16.mxu1 %v5427_v27  ;;  %v116_v27 = vld [vmem:[#allocation2 + $0x118] sm:$0xff] }
 0x133   :  { %2720 = vmatpush2.bf16.msra.mxu0 %v5298_v33 }
 0x134   :  { %2761 = vmatpush2.bf16.msra.mxu1 %v5426_v35  ;;  %2721 = vmatprep.subr.bf16.mxu0 %v5291_v36  ;;  %v5507_v35 = vcombine.high %v371_v53, %v375_v25 }
 0x135   :  { %2762 = vmatprep.subr.bf16.mxu1 %v5419_v37  ;;  %v5253_v37 = vcombine.high %v116_v27, %v120_v54 }
 0x137   :  { %2722 = vmatpush2.bf16.msra.mxu0 %v5290_v19  ;;  %v5506_v19 = vcombine.low %v371_v53, %v375_v25  ;;  %v455_v53 = vld [vmem:[#allocation2 + $0xbb0] sm:$0xff]  ;;  %v196_v25 = vld [vmem:[#allocation2 + $0x398] sm:$0xff] }
 0x138   :  { %2763 = vmatpush2.bf16.msra.mxu1 %v5418_v43  ;;  %2723 = vmatprep.subr.bf16.mxu0 %v5283_v44  ;;  %v5499_v43 = vcombine.high %v363_v38, %v367_v39  ;;  %v5245_v44 = vcombine.high %v108_v40, %v112_v41 }
 0x139   :  { %2764 = vmatprep.subr.bf16.mxu1 %v5411_v45  ;;  %v355_v45 = vld [vmem:[#allocation2 + $0x890] sm:$0xff] }
 0x13a   :  { %v5490_v0 = vcombine.low %v355_v45, %v359_v46 }
 0x13b   :  { %2724 = vmatpush2.bf16.msra.mxu0 %v5282_v50  ;;  %v5244_v50 = vcombine.low %v108_v40, %v112_v41  ;;  %v435_v41 = vld [vmem:[#allocation2 + $0xb10] sm:$0xff] }
 0x13c   :  { %2765 = vmatpush2.bf16.msra.mxu1 %v5410_v52  ;;  %2775 = vmatprep.subr.bf16.mxu0 %v5531_v56  ;;  %v5491_v52 = vcombine.high %v355_v45, %v359_v46  ;;  %v5237_v56 = vcombine.high %v100_v47, %v104_v48 }
 0x13d   :  { %2816 = vmatprep.subr.bf16.mxu1 %v5277_v57  ;;  %v347_v57 = vld [vmem:[#allocation2 + $0x850] sm:$0xff] }
 0x13e   :  { %v2481_v9 = vpop.f32.mrf.mxu0  ;;  %2726 = vmatmul.mubr.bf16.vlgmr.msra.gmra.mxu0 %v6548_v16  ;;  %v5482_v8 = vcombine.low %v347_v57, %v351_v61 }
 0x13f   :  { %v2482_v12 = vadd.f32 %v2481_v9, %v469_v1  ;;  %v2522_v13 = vpop.f32.mrf.mxu1  ;;  %2767 = vmatmul.mubr.bf16.vlgmr.msra.gmra.mxu1 %v6557_v20  ;;  %2776 = vmatpush1.bf16.msra.mxu0 %v5530_v2  ;;  %v5236_v1 = vcombine.low %v100_v47, %v104_v48  ;;  %v5483_v2 = vcombine.high %v347_v57, %v351_v61  ;;  %v427_v48 = vld [vmem:[#allocation2 + $0xad0] sm:$0xff] }
 0x140   :  { %2817 = vmatpush1.bf16.msra.mxu1 %v5276_v3  ;;  %v2483_v15 = vpop.f32.mrf.mxu0  ;;  %2777 = vmatprep.subr.bf16.mxu0 %v5523_v4  ;;  %v5229_v3 = vcombine.high %v92_v62, %v96_v63  ;;  %v339_v4 = vld [vmem:[#allocation2 + $0x810] sm:$0xff]  ;;  %v5228_v9 = vcombine.low %v92_v62, %v96_v63 }
 0x141   :  { %v6593_v21 = vadd.f32 %v2522_v13, %v2482_v12  ;;  %v2484_v22 = vadd.f32 %v2483_v15, %v473_v5  ;;  %v2524_v23 = vpop.f32.mrf.mxu1  ;;  %2818 = vmatprep.subr.bf16.mxu1 %v5269_v6  ;;  %2807 = vmatprep.mubr.bf16.mxu0 %v6561_v28  ;;  %v343_v5 = vld [vmem:[#allocation2 + $0x830] sm:$0xff]  ;;  %v84_v6 = vld [vmem:[#allocation2 + $0x18] sm:$0xff] }
 0x142   :  { %v2485_v26 = vpop.f32.mrf.mxu0  ;;  %2848 = vmatprep.mubr.bf16.mxu1 %v6538_v58  ;;  %v5252_v58 = vcombine.low %v116_v27, %v120_v54  ;;  %v5475_v10 = vcombine.high %v339_v4, %v343_v5  ;;  %v5221_v11 = vcombine.high %v84_v6, %v88_v7  ;;  %v459_v12 = vld [vmem:[#allocation2 + $0xbd0] sm:$0xff]  ;;  %v208_v15 = vld [vmem:[#allocation2 + $0x3f8] sm:$0xff] }
 0x143   :  { %v6597_v29 = vadd.f32 %v2524_v23, %v2484_v22  ;;  %v2526_v30 = vpop.f32.mrf.mxu1  ;;  %2778 = vmatpush1.bf16.msra.mxu0 %v5522_v14  ;;  %v463_v13 = vld [vmem:[#allocation2 + $0xbf0] sm:$0xff]  ;;  %v204_v14 = vld [vmem:[#allocation2 + $0x3d8] sm:$0xff] }
 0x144   :  { %2819 = vmatpush1.bf16.msra.mxu1 %v5268_v17  ;;  %v2486_v33 = vpop.f32.mrf.mxu0  ;;  %2779 = vmatprep.subr.bf16.mxu0 %v5515_v18  ;;  %v5474_v17 = vcombine.low %v339_v4, %v343_v5  ;;  %v5220_v18 = vcombine.low %v84_v6, %v88_v7  ;;  %v5595_v22 = vcombine.high %v459_v12, %v463_v13  ;;  %v200_v26 = vld [vmem:[#allocation2 + $0x3b8] sm:$0xff]  ;;  %v419_v63 = vld [vmem:[#allocation2 + $0xa90] sm:$0xff] }
 0x145   :  { %v2527_v36 = vpop.f32.mrf.mxu1  ;;  %2820 = vmatprep.subr.bf16.mxu1 %v5261_v24  ;;  %v5341_v23 = vcombine.high %v204_v14, %v208_v15  ;;  %v451_v24 = vld [vmem:[#allocation2 + $0xb90] sm:$0xff]  ;;  %v5594_v27 = vcombine.low %v459_v12, %v463_v13  ;;  %v5340_v54 = vcombine.low %v204_v14, %v208_v15  ;;  %v5332_v38 = vcombine.low %v196_v25, %v200_v26 }
 0x146   :  { %v5587_v30 = vcombine.high %v451_v24, %v455_v53  ;;  %v443_v33 = vld [vmem:[#allocation2 + $0xb50] sm:$0xff]  ;;  %v192_v36 = vld [vmem:[#allocation2 + $0x378] sm:$0xff] }
 0x147   :  { %2780 = vmatpush1.bf16.msra.mxu0 %v5514_v31  ;;  %v5333_v31 = vcombine.high %v196_v25, %v200_v26  ;;  %v411_v7 = vld [vmem:[#allocation2 + $0xa50] sm:$0xff]  ;;  %v268_v26 = vld [vmem:[#allocation2 + $0x5d8] sm:$0xff] }
 0x148   :  { %2821 = vmatpush1.bf16.msra.mxu1 %v5260_v34  ;;  %2781 = vmatprep.subr.bf16.mxu0 %v5507_v35  ;;  %v447_v34 = vld [vmem:[#allocation2 + $0xb70] sm:$0xff]  ;;  %v188_v35 = vld [vmem:[#allocation2 + $0x358] sm:$0xff] }
 0x149   :  { %2822 = vmatprep.subr.bf16.mxu1 %v5253_v37  ;;  %v5586_v37 = vcombine.low %v451_v24, %v455_v53  ;;  %v5579_v39 = vcombine.high %v443_v33, %v447_v34  ;;  %v5325_v40 = vcombine.high %v188_v35, %v192_v36  ;;  %v5324_v45 = vcombine.low %v188_v35, %v192_v36  ;;  %v403_v15 = vld [vmem:[#allocation2 + $0xa10] sm:$0xff]  ;;  %v260_v36 = vld [vmem:[#allocation2 + $0x598] sm:$0xff] }
 0x14b   :  { %2782 = vmatpush1.bf16.msra.mxu0 %v5506_v19  ;;  %v439_v19 = vld [vmem:[#allocation2 + $0xb30] sm:$0xff] }
 0x14c   :  { %2823 = vmatpush1.bf16.msra.mxu1 %v5252_v58  ;;  %2783 = vmatprep.subr.bf16.mxu0 %v5499_v43  ;;  %v180_v58 = vld [vmem:[#allocation2 + $0x318] sm:$0xff]  ;;  %v5571_v46 = vcombine.high %v435_v41, %v439_v19 }
 0x14d   :  { %2824 = vmatprep.subr.bf16.mxu1 %v5245_v44  ;;  %v184_v43 = vld [vmem:[#allocation2 + $0x338] sm:$0xff]  ;;  %v5578_v44 = vcombine.low %v443_v33, %v447_v34 }
 0x14e   :  { %v5317_v47 = vcombine.high %v180_v58, %v184_v43  ;;  %v5316_v57 = vcombine.low %v180_v58, %v184_v43  ;;  %v252_v43 = vld [vmem:[#allocation2 + $0x558] sm:$0xff] }
 0x14f   :  { %2784 = vmatpush1.bf16.msra.mxu0 %v5498_v49  ;;  %v431_v49 = vld [vmem:[#allocation2 + $0xaf0] sm:$0xff] }
 0x150   :  { %2825 = vmatpush1.bf16.msra.mxu1 %v5244_v50  ;;  %2785 = vmatprep.subr.bf16.mxu0 %v5491_v52  ;;  %v172_v50 = vld [vmem:[#allocation2 + $0x2d8] sm:$0xff]  ;;  %v5563_v61 = vcombine.high %v427_v48, %v431_v49 }
 0x151   :  { %2826 = vmatprep.subr.bf16.mxu1 %v5237_v56  ;;  %v176_v52 = vld [vmem:[#allocation2 + $0x2f8] sm:$0xff]  ;;  %v5570_v56 = vcombine.low %v435_v41, %v439_v19 }
 0x152   :  { %v5309_v62 = vcombine.high %v172_v50, %v176_v52  ;;  %v5308_v4 = vcombine.low %v172_v50, %v176_v52 }
 0x153   :  { %2786 = vmatpush1.bf16.msra.mxu0 %v5490_v0  ;;  %v423_v0 = vld [vmem:[#allocation2 + $0xab0] sm:$0xff] }
 0x154   :  { %2827 = vmatpush1.bf16.msra.mxu1 %v5236_v1  ;;  %2787 = vmatprep.subr.bf16.mxu0 %v5483_v2  ;;  %v164_v1 = vld [vmem:[#allocation2 + $0x298] sm:$0xff]  ;;  %v5555_v5 = vcombine.high %v419_v63, %v423_v0 }
 0x155   :  { %2828 = vmatprep.subr.bf16.mxu1 %v5229_v3  ;;  %v168_v2 = vld [vmem:[#allocation2 + $0x2b8] sm:$0xff]  ;;  %v5562_v3 = vcombine.low %v427_v48, %v431_v49 }
 0x156   :  { %v5301_v6 = vcombine.high %v164_v1, %v168_v2  ;;  %v5300_v12 = vcombine.low %v164_v1, %v168_v2  ;;  %v372_v1 = vld [vmem:[#allocation2 + $0x918] sm:$0xff] }
 0x157   :  { %2788 = vmatpush1.bf16.msra.mxu0 %v5482_v8  ;;  %v415_v8 = vld [vmem:[#allocation2 + $0xa70] sm:$0xff]  ;;  %v376_v2 = vld [vmem:[#allocation2 + $0x938] sm:$0xff] }
 0x158   :  { %2829 = vmatpush1.bf16.msra.mxu1 %v5228_v9  ;;  %2789 = vmatprep.subr.bf16.mxu0 %v5475_v10  ;;  %v156_v9 = vld [vmem:[#allocation2 + $0x258] sm:$0xff]  ;;  %v5547_v13 = vcombine.high %v411_v7, %v415_v8 }
 0x159   :  { %2830 = vmatprep.subr.bf16.mxu1 %v5221_v11  ;;  %v160_v10 = vld [vmem:[#allocation2 + $0x278] sm:$0xff]  ;;  %v5554_v11 = vcombine.low %v419_v63, %v423_v0 }
 0x15a   :  { %v5293_v14 = vcombine.high %v156_v9, %v160_v10  ;;  %v5292_v24 = vcombine.low %v156_v9, %v160_v10  ;;  %v244_v63 = vld [vmem:[#allocation2 + $0x518] sm:$0xff] }
 0x15b   :  { %2790 = vmatpush1.bf16.msra.mxu0 %v5474_v17  ;;  %v407_v17 = vld [vmem:[#allocation2 + $0xa30] sm:$0xff]  ;;  %v248_v0 = vld [vmem:[#allocation2 + $0x538] sm:$0xff] }
 0x15c   :  { %2831 = vmatpush1.bf16.msra.mxu1 %v5220_v18  ;;  %2791 = vmatprep.subr.bf16.mxu0 %v5595_v22  ;;  %v148_v18 = vld [vmem:[#allocation2 + $0x218] sm:$0xff]  ;;  %v5539_v53 = vcombine.high %v403_v15, %v407_v17 }
 0x15d   :  { %2832 = vmatprep.subr.bf16.mxu1 %v5341_v23  ;;  %v152_v22 = vld [vmem:[#allocation2 + $0x238] sm:$0xff]  ;;  %v5546_v23 = vcombine.low %v411_v7, %v415_v8  ;;  %v5509_v8 = vcombine.high %v372_v1, %v376_v2 }
 0x15e   :  { %v5285_v25 = vcombine.high %v148_v18, %v152_v22  ;;  %v5284_v33 = vcombine.low %v148_v18, %v152_v22  ;;  %v236_v9 = vld [vmem:[#allocation2 + $0x4d8] sm:$0xff] }
 0x15f   :  { %2792 = vmatpush2.bf16.msra.mxu0 %v5594_v27  ;;  %v272_v27 = vld [vmem:[#allocation2 + $0x5f8] sm:$0xff] }
 0x160   :  { %2833 = vmatpush2.bf16.msra.mxu1 %v5340_v54  ;;  %2793 = vmatprep.subr.bf16.mxu0 %v5587_v30  ;;  %v396_v54 = vld [vmem:[#allocation2 + $0x9d8] sm:$0xff]  ;;  %v5405_v34 = vcombine.high %v268_v26, %v272_v27 }
 0x161   :  { %2834 = vmatprep.subr.bf16.mxu1 %v5333_v31  ;;  %v400_v30 = vld [vmem:[#allocation2 + $0x9f8] sm:$0xff]  ;;  %v5538_v31 = vcombine.low %v403_v15, %v407_v17 }
 0x162   :  { %v5533_v35 = vcombine.high %v396_v54, %v400_v30  ;;  %v5532_v41 = vcombine.low %v396_v54, %v400_v30  ;;  %v240_v10 = vld [vmem:[#allocation2 + $0x4f8] sm:$0xff] }
 0x163   :  { %2794 = vmatpush2.bf16.msra.mxu0 %v5586_v37  ;;  %v264_v37 = vld [vmem:[#allocation2 + $0x5b8] sm:$0xff] }
 0x164   :  { %2835 = vmatpush2.bf16.msra.mxu1 %v5332_v38  ;;  %2795 = vmatprep.subr.bf16.mxu0 %v5579_v39  ;;  %v388_v38 = vld [vmem:[#allocation2 + $0x998] sm:$0xff]  ;;  %v5397_v19 = vcombine.high %v260_v36, %v264_v37  ;;  %v5396_v50 = vcombine.low %v260_v36, %v264_v37 }
 0x165   :  { %2836 = vmatprep.subr.bf16.mxu1 %v5325_v40  ;;  %v392_v39 = vld [vmem:[#allocation2 + $0x9b8] sm:$0xff]  ;;  %v5404_v40 = vcombine.low %v268_v26, %v272_v27 }
 0x166   :  { %v5525_v58 = vcombine.high %v388_v38, %v392_v39  ;;  %v228_v15 = vld [vmem:[#allocation2 + $0x498] sm:$0xff] }
 0x167   :  { %2796 = vmatpush2.bf16.msra.mxu0 %v5578_v44  ;;  %v256_v44 = vld [vmem:[#allocation2 + $0x578] sm:$0xff] }
 0x168   :  { %2837 = vmatpush2.bf16.msra.mxu1 %v5324_v45  ;;  %2797 = vmatprep.subr.bf16.mxu0 %v5571_v46  ;;  %v380_v46 = vld [vmem:[#allocation2 + $0x958] sm:$0xff] }
 0x169   :  { %2838 = vmatprep.subr.bf16.mxu1 %v5317_v47  ;;  %v384_v47 = vld [vmem:[#allocation2 + $0x978] sm:$0xff] }
 0x16a   :  { %v232_v17 = vld [vmem:[#allocation2 + $0x4b8] sm:$0xff] }
 0x16b   :  { %2798 = vmatpush2.bf16.msra.mxu0 %v5570_v56  ;;  %v5524_v56 = vcombine.low %v388_v38, %v392_v39  ;;  %v356_v18 = vld [vmem:[#allocation2 + $0x898] sm:$0xff] }
 0x16c   :  { %2839 = vmatpush2.bf16.msra.mxu1 %v5316_v57  ;;  %2799 = vmatprep.subr.bf16.mxu0 %v5563_v61  ;;  %v5389_v57 = vcombine.high %v252_v43, %v256_v44  ;;  %v360_v22 = vld [vmem:[#allocation2 + $0x8b8] sm:$0xff] }
 0x16d   :  { %2840 = vmatprep.subr.bf16.mxu1 %v5309_v62  ;;  %v5517_v62 = vcombine.high %v380_v46, %v384_v47  ;;  %v220_v26 = vld [vmem:[#allocation2 + $0x458] sm:$0xff] }
 0x16e   :  { %v224_v27 = vld [vmem:[#allocation2 + $0x478] sm:$0xff] }
 0x16f   :  { %2800 = vmatpush2.bf16.msra.mxu0 %v5562_v3  ;;  %v5388_v3 = vcombine.low %v252_v43, %v256_v44  ;;  %v348_v54 = vld [vmem:[#allocation2 + $0x858] sm:$0xff] }
 0x170   :  { %2841 = vmatpush2.bf16.msra.mxu1 %v5308_v4  ;;  %2801 = vmatprep.subr.bf16.mxu0 %v5555_v5  ;;  %v5516_v5 = vcombine.low %v380_v46, %v384_v47  ;;  %v352_v30 = vld [vmem:[#allocation2 + $0x878] sm:$0xff] }
 0x171   :  { %2842 = vmatprep.subr.bf16.mxu1 %v5301_v6  ;;  %v5381_v6 = vcombine.high %v244_v63, %v248_v0  ;;  %v212_v36 = vld [vmem:[#allocation2 + $0x418] sm:$0xff] }
 0x172   :  { %v216_v37 = vld [vmem:[#allocation2 + $0x438] sm:$0xff] }
 0x173   :  { %2802 = vmatpush2.bf16.msra.mxu0 %v5554_v11  ;;  %v364_v11 = vld [vmem:[#allocation2 + $0x8d8] sm:$0xff]  ;;  %v5348_v47 = vcombine.low %v212_v36, %v216_v37 }
 0x174   :  { %2843 = vmatpush2.bf16.msra.mxu1 %v5300_v12  ;;  %2803 = vmatprep.subr.bf16.mxu0 %v5547_v13  ;;  %v5380_v12 = vcombine.low %v244_v63, %v248_v0  ;;  %v5373_v13 = vcombine.high %v236_v9, %v240_v10  ;;  %v340_v38 = vld [vmem:[#allocation2 + $0x818] sm:$0xff] }
 0x175   :  { %2844 = vmatprep.subr.bf16.mxu1 %v5293_v14  ;;  %v344_v39 = vld [vmem:[#allocation2 + $0x838] sm:$0xff] }
 0x176   :  { %v332_v43 = vld [vmem:[#allocation2 + $0x7d8] sm:$0xff] }
 0x177   :  { %2804 = vmatpush2.bf16.msra.mxu0 %v5546_v23  ;;  %v5372_v23 = vcombine.low %v236_v9, %v240_v10  ;;  %v336_v44 = vld [vmem:[#allocation2 + $0x7f8] sm:$0xff] }
 0x178   :  { %2845 = vmatpush2.bf16.msra.mxu1 %v5292_v24  ;;  %2805 = vmatprep.subr.bf16.mxu0 %v5539_v53  ;;  %v5365_v53 = vcombine.high %v228_v15, %v232_v17  ;;  %v464_v46 = vld [vmem:[#allocation2 + $0xbf8] sm:$0xff] }
 0x179   :  { %2846 = vmatprep.subr.bf16.mxu1 %v5285_v25  ;;  %v5493_v25 = vcombine.high %v356_v18, %v360_v22  ;;  %v328_v63 = vld [vmem:[#allocation2 + $0x7b8] sm:$0xff] }
 0x17a   :  { %v452_v0 = vld [vmem:[#allocation2 + $0xb98] sm:$0xff] }
 0x17b   :  { %2806 = vmatpush2.bf16.msra.mxu0 %v5538_v31  ;;  %v5364_v31 = vcombine.low %v228_v15, %v232_v17 }
 0x17c   :  { %2847 = vmatpush2.bf16.msra.mxu1 %v5284_v33  ;;  %2857 = vmatprep.subr.bf16.mxu0 %v5405_v34  ;;  %v5492_v33 = vcombine.low %v356_v18, %v360_v22  ;;  %v5357_v34 = vcombine.high %v220_v26, %v224_v27  ;;  %v300_v22 = vld [vmem:[#allocation2 + $0x6d8] sm:$0xff] }
 0x17d   :  { %2898 = vmatprep.subr.bf16.mxu1 %v5533_v35  ;;  %v5485_v35 = vcombine.high %v348_v54, %v352_v30 }
 0x17e   :  { %v2563_v45 = vpop.f32.mrf.mxu0  ;;  %2808 = vmatmul.mubr.bf16.vlgmr.msra.gmra.mxu0 %v6569_v32 }
 0x17f   :  { %v6601_v48 = vadd.f32 %v2563_v45, %v6593_v21  ;;  %v6603_v49 = vpop.f32.mrf.mxu1  ;;  %2849 = vmatmul.mubr.bf16.vlgmr.msra.gmra.mxu1 %v6548_v16  ;;  %2858 = vmatpush1.bf16.msra.mxu0 %v5404_v40  ;;  %v5356_v40 = vcombine.low %v220_v26, %v224_v27  ;;  %v460_v45 = vld [vmem:[#allocation2 + $0xbd8] sm:$0xff] }
 0x180   :  { %2899 = vmatpush1.bf16.msra.mxu1 %v5532_v41  ;;  %v6606_v52 = vpop.f32.mrf.mxu0  ;;  %2859 = vmatprep.subr.bf16.mxu0 %v5397_v19  ;;  %v5484_v41 = vcombine.low %v348_v54, %v352_v30  ;;  %v5349_v19 = vcombine.high %v212_v36, %v216_v37  ;;  %v292_v30 = vld [vmem:[#allocation2 + $0x698] sm:$0xff] }
 0x181   :  { %v6608_v61 = vpop.f32.mrf.mxu1  ;;  %2900 = vmatprep.subr.bf16.mxu1 %v5525_v58  ;;  %2889 = vmatprep.mubr.bf16.mxu0 %v6542_v59  ;;  %v368_v59 = vld [vmem:[#allocation2 + $0x8f8] sm:$0xff]  ;;  %v5477_v58 = vcombine.high %v340_v38, %v344_v39 }
 0x182   :  { %v2567_v21 = vpop.f32.mrf.mxu0  ;;  %2930 = vmatprep.mubr.bf16.mxu1 %v6561_v28  ;;  %v5508_v28 = vcombine.low %v372_v1, %v376_v2  ;;  %v5501_v14 = vcombine.high %v364_v11, %v368_v59  ;;  %v5500_v24 = vcombine.low %v364_v11, %v368_v59  ;;  %v5468_v1 = vcombine.low %v332_v43, %v336_v44  ;;  %v308_v59 = vld [vmem:[#allocation2 + $0x718] sm:$0xff] }
 0x183   :  { %v2608_v16 = vpop.f32.mrf.mxu1  ;;  %2860 = vmatpush1.bf16.msra.mxu0 %v5396_v50  ;;  %v5476_v50 = vcombine.low %v340_v38, %v344_v39  ;;  %v456_v21 = vld [vmem:[#allocation2 + $0xbb8] sm:$0xff]  ;;  %v5596_v2 = vcombine.low %v460_v45, %v464_v46 }
 0x184   :  { %2901 = vmatpush1.bf16.msra.mxu1 %v5524_v56  ;;  %v2568_v4 = vpop.f32.mrf.mxu0  ;;  %2861 = vmatprep.subr.bf16.mxu0 %v5389_v57  ;;  %v5469_v56 = vcombine.high %v332_v43, %v336_v44  ;;  %v5597_v57 = vcombine.high %v460_v45, %v464_v46  ;;  %v5588_v9 = vcombine.low %v452_v0, %v456_v21  ;;  %v284_v39 = vld [vmem:[#allocation2 + $0x658] sm:$0xff] }
 0x185   :  { %v2609_v7 = vpop.f32.mrf.mxu1  ;;  %2902 = vmatprep.subr.bf16.mxu1 %v5517_v62  ;;  %v324_v62 = vld [vmem:[#allocation2 + $0x798] sm:$0xff] }
 0x186   :  { %v5461_v16 = vcombine.high %v324_v62, %v328_v63  ;;  %v316_v4 = vld [vmem:[#allocation2 + $0x758] sm:$0xff] }
 0x187   :  { %2862 = vmatpush1.bf16.msra.mxu0 %v5388_v3  ;;  %v5589_v3 = vcombine.high %v452_v0, %v456_v21  ;;  %v448_v7 = vld [vmem:[#allocation2 + $0xb78] sm:$0xff]  ;;  %v2566_v21 = vadd.f32 %v6606_v52, %v6597_v29  ;;  %v5951_v29 = vld [vmem:[#allocation5 + $0x2e0] ss:$16 sps:$4 sm:$0xff]   ;;  %v5956_v52 = vld [vmem:[#allocation5 + $0xc4] ss:$16 sps:$4 sm:$0xff]  }
 0x188   :  { %2903 = vmatpush1.bf16.msra.mxu1 %v5516_v5  ;;  %2863 = vmatprep.subr.bf16.mxu0 %v5381_v6  ;;  %v320_v5 = vld [vmem:[#allocation2 + $0x778] sm:$0xff] }
 0x189   :  { %2904 = vmatprep.subr.bf16.mxu1 %v5509_v8  ;;  %v444_v6 = vld [vmem:[#allocation2 + $0xb58] sm:$0xff]  ;;  %v5460_v8 = vcombine.low %v324_v62, %v328_v63  ;;  %v5453_v10 = vcombine.high %v316_v4, %v320_v5 }
 0x18a   :  { %v5581_v11 = vcombine.high %v444_v6, %v448_v7  ;;  %v5580_v15 = vcombine.low %v444_v6, %v448_v7  ;;  %v276_v46 = vld [vmem:[#allocation2 + $0x618] sm:$0xff]  ;;  %v5948_v7 = vld [vmem:[#allocation5 + $0xe0] ss:$16 sps:$4 sm:$0xff]  }
 0x18b   :  { %2864 = vmatpush1.bf16.msra.mxu0 %v5380_v12  ;;  %v312_v12 = vld [vmem:[#allocation2 + $0x738] sm:$0xff] }
 0x18c   :  { %2905 = vmatpush1.bf16.msra.mxu1 %v5508_v28  ;;  %2865 = vmatprep.subr.bf16.mxu0 %v5373_v13  ;;  %v436_v28 = vld [vmem:[#allocation2 + $0xb18] sm:$0xff]  ;;  %v5445_v17 = vcombine.high %v308_v59, %v312_v12 }
 0x18d   :  { %2906 = vmatprep.subr.bf16.mxu1 %v5501_v14  ;;  %v440_v13 = vld [vmem:[#allocation2 + $0xb38] sm:$0xff]  ;;  %v5452_v14 = vcombine.low %v316_v4, %v320_v5  ;;  %v5953_v4 = vld [vmem:[#allocation5 + $0x2e4] ss:$16 sps:$4 sm:$0xff]   ;;  %v2940_v5 = vmax.f32 %v2566_v21, 0.0  ;;  %v6005_v21 = vld [vmem:[#allocation5 + $0x3c0] ss:$16 sps:$4 sm:$0xff]  }
 0x18e   :  { %v5573_v18 = vcombine.high %v436_v28, %v440_v13  ;;  %v5572_v26 = vcombine.low %v436_v28, %v440_v13  ;;  %v5957_v28 = vld [vmem:[#allocation5 + $0x2c0] ss:$16 sps:$4 sm:$0xff]   ;;  %v5962_v13 = vld [vmem:[#allocation5 + $0xa4] ss:$16 sps:$4 sm:$0xff]  }
 0x18f   :  { %2866 = vmatpush1.bf16.msra.mxu0 %v5372_v23  ;;  %v304_v23 = vld [vmem:[#allocation2 + $0x6f8] sm:$0xff] }
 0x190   :  { %2907 = vmatpush1.bf16.msra.mxu1 %v5500_v24  ;;  %2867 = vmatprep.subr.bf16.mxu0 %v5365_v53  ;;  %v428_v24 = vld [vmem:[#allocation2 + $0xad8] sm:$0xff]  ;;  %v5437_v27 = vcombine.high %v300_v22, %v304_v23 }
 0x191   :  { %2908 = vmatprep.subr.bf16.mxu1 %v5493_v25  ;;  %v432_v53 = vld [vmem:[#allocation2 + $0xaf8] sm:$0xff]  ;;  %v5444_v25 = vcombine.low %v308_v59, %v312_v12 }
 0x192   :  { %v5565_v54 = vcombine.high %v428_v24, %v432_v53  ;;  %v5564_v36 = vcombine.low %v428_v24, %v432_v53  ;;  %v5968_v24 = vld [vmem:[#allocation5 + $0x84] ss:$16 sps:$4 sm:$0xff]  }
 0x193   :  { %2868 = vmatpush1.bf16.msra.mxu0 %v5364_v31  ;;  %v296_v31 = vld [vmem:[#allocation2 + $0x6b8] sm:$0xff] }
 0x194   :  { %2909 = vmatpush1.bf16.msra.mxu1 %v5492_v33  ;;  %2869 = vmatprep.subr.bf16.mxu0 %v5357_v34  ;;  %v420_v33 = vld [vmem:[#allocation2 + $0xa98] sm:$0xff]  ;;  %v5429_v37 = vcombine.high %v292_v30, %v296_v31 }
 0x195   :  { %2910 = vmatprep.subr.bf16.mxu1 %v5485_v35  ;;  %v424_v34 = vld [vmem:[#allocation2 + $0xab8] sm:$0xff]  ;;  %v5436_v35 = vcombine.low %v300_v22, %v304_v23  ;;  %v5960_v22 = vld [vmem:[#allocation5 + $0xa0] ss:$16 sps:$4 sm:$0xff]  }
 0x196   :  { %v5557_v38 = vcombine.high %v420_v33, %v424_v34  ;;  %v5556_v43 = vcombine.low %v420_v33, %v424_v34  ;;  %v5963_v23 = vld [vmem:[#allocation5 + $0x2a0] ss:$16 sps:$4 sm:$0xff]   ;;  %v5977_v33 = vld [vmem:[#allocation5 + $0x264] ss:$16 sps:$4 sm:$0xff]  }
 0x197   :  { %2870 = vmatpush1.bf16.msra.mxu0 %v5356_v40  ;;  %v288_v40 = vld [vmem:[#allocation2 + $0x678] sm:$0xff]  ;;  %v5972_v34 = vld [vmem:[#allocation5 + $0x60] ss:$16 sps:$4 sm:$0xff]  }
 0x198   :  { %2911 = vmatpush1.bf16.msra.mxu1 %v5484_v41  ;;  %2871 = vmatprep.subr.bf16.mxu0 %v5349_v19  ;;  %v412_v41 = vld [vmem:[#allocation2 + $0xa58] sm:$0xff]  ;;  %v5421_v44 = vcombine.high %v284_v39, %v288_v40 }
 0x199   :  { %2912 = vmatprep.subr.bf16.mxu1 %v5477_v58  ;;  %v416_v19 = vld [vmem:[#allocation2 + $0xa78] sm:$0xff]  ;;  %v5428_v58 = vcombine.low %v292_v30, %v296_v31  ;;  %v5969_v30 = vld [vmem:[#allocation5 + $0x280] ss:$16 sps:$4 sm:$0xff]   ;;  %v5974_v31 = vld [vmem:[#allocation5 + $0x64] ss:$16 sps:$4 sm:$0xff]  }
 0x19a   :  { %v5549_v45 = vcombine.high %v412_v41, %v416_v19  ;;  %v5548_v62 = vcombine.low %v412_v41, %v416_v19  ;;  %v5989_v41 = vld [vmem:[#allocation5 + $0x224] ss:$16 sps:$4 sm:$0xff]   ;;  %v5984_v19 = vld [vmem:[#allocation5 + $0x20] ss:$16 sps:$4 sm:$0xff]  }
 0x19b   :  { %2872 = vmatpush1.bf16.msra.mxu0 %v5348_v47  ;;  %v280_v47 = vld [vmem:[#allocation2 + $0x638] sm:$0xff] }
 0x19c   :  { %2913 = vmatpush1.bf16.msra.mxu1 %v5476_v50  ;;  %2873 = vmatprep.subr.bf16.mxu0 %v5469_v56  ;;  %v404_v50 = vld [vmem:[#allocation2 + $0xa18] sm:$0xff]  ;;  %v5413_v63 = vcombine.high %v276_v46, %v280_v47 }
 0x19d   :  { %2914 = vmatprep.subr.bf16.mxu1 %v5597_v57  ;;  %v408_v56 = vld [vmem:[#allocation2 + $0xa38] sm:$0xff]  ;;  %v5420_v57 = vcombine.low %v284_v39, %v288_v40  ;;  %v5981_v39 = vld [vmem:[#allocation5 + $0x240] ss:$16 sps:$4 sm:$0xff]   ;;  %v5986_v40 = vld [vmem:[#allocation5 + $0x24] ss:$16 sps:$4 sm:$0xff]  }
 0x19e   :  { %v5541_v0 = vcombine.high %v404_v50, %v408_v56 }
 0x19f   :  { %2874 = vmatpush2.bf16.msra.mxu0 %v5468_v1  ;;  %v480_v1 = vsub.s32 3, %v6579_v42 }
 0x1a0   :  { %2915 = vmatpush2.bf16.msra.mxu1 %v5596_v2  ;;  %2875 = vmatprep.subr.bf16.mxu0 %v5461_v16  ;;  %v5412_v2 = vcombine.low %v276_v46, %v280_v47  ;;  %v5540_v16 = vcombine.low %v404_v50, %v408_v56  ;;  %v5993_v46 = vld [vmem:[#allocation5 + $0x200] ss:$16 sps:$4 sm:$0xff]   ;;  %v5998_v47 = vld [vmem:[#allocation5 + $0x1e4] ss:$16 sps:$4 sm:$0xff]  }
 0x1a1   :  { %2916 = vmatprep.subr.bf16.mxu1 %v5589_v3  ;;  %v5950_v3 = vld [vmem:[#allocation5 + $0xe4] ss:$16 sps:$4 sm:$0xff]   ;;  %v481_v6 = vrot.slane %v6582_v55, %v480_v1  ;;  %v5954_v55 = vld [vmem:[#allocation5 + $0xc0] ss:$16 sps:$4 sm:$0xff]  }
 0x1a2   :  { %v6001_v50 = vld [vmem:[#allocation5 + $0x3e4] ss:$16 sps:$4 sm:$0xff]   ;;  %v5996_v56 = vld [vmem:[#allocation5 + $0x1e0] ss:$16 sps:$4 sm:$0xff]  }
 0x1a3   :  { %2876 = vmatpush2.bf16.msra.mxu0 %v5460_v8  ;;  %v5959_v8 = vld [vmem:[#allocation5 + $0x2c4] ss:$16 sps:$4 sm:$0xff]  }
 0x1a4   :  { %2917 = vmatpush2.bf16.msra.mxu1 %v5588_v9  ;;  %2877 = vmatprep.subr.bf16.mxu0 %v5453_v10  ;;  %v6618_v9 = vpack.c.bf16 %v2940_v5, %v2940_v5  ;;  %v6016_v5 = vld [vmem:[#allocation5 + $0x184] ss:$16 sps:$4 sm:$0xff]  }
 0x1a5   :  { %2918 = vmatprep.subr.bf16.mxu1 %v5581_v11  ;;  %v2607_v11 = vadd.f32 %v6608_v61, %v481_v6  ;;  %v6019_v6 = vld [vmem:[#allocation5 + $0x384] ss:$16 sps:$4 sm:$0xff]  }
 0x1a7   :  { %2878 = vmatpush2.bf16.msra.mxu0 %v5452_v14 }
 0x1a8   :  { %2919 = vmatpush2.bf16.msra.mxu1 %v5580_v15  ;;  %2879 = vmatprep.subr.bf16.mxu0 %v5445_v17  ;;  %v5965_v17 = vld [vmem:[#allocation5 + $0x2a4] ss:$16 sps:$4 sm:$0xff]  }
 0x1a9   :  { %2920 = vmatprep.subr.bf16.mxu1 %v5573_v18 }
 0x1ab   :  { %2880 = vmatpush2.bf16.msra.mxu0 %v5444_v25 }
 0x1ac   :  { %2921 = vmatpush2.bf16.msra.mxu1 %v5572_v26  ;;  %2881 = vmatprep.subr.bf16.mxu0 %v5437_v27  ;;  %v5971_v26 = vld [vmem:[#allocation5 + $0x284] ss:$16 sps:$4 sm:$0xff]  }
 0x1ad   :  { %2922 = vmatprep.subr.bf16.mxu1 %v5565_v54  ;;  %v5966_v54 = vld [vmem:[#allocation5 + $0x80] ss:$16 sps:$4 sm:$0xff]  }
 0x1af   :  { %2882 = vmatpush2.bf16.msra.mxu0 %v5436_v35  ;;  %v5975_v35 = vld [vmem:[#allocation5 + $0x260] ss:$16 sps:$4 sm:$0xff]  }
 0x1b0   :  { %2923 = vmatpush2.bf16.msra.mxu1 %v5564_v36  ;;  %2883 = vmatprep.subr.bf16.mxu0 %v5429_v37  ;;  %v5980_v36 = vld [vmem:[#allocation5 + $0x44] ss:$16 sps:$4 sm:$0xff]  }
 0x1b1   :  { %2924 = vmatprep.subr.bf16.mxu1 %v5557_v38  ;;  %v5983_v37 = vld [vmem:[#allocation5 + $0x244] ss:$16 sps:$4 sm:$0xff]   ;;  %v5978_v38 = vld [vmem:[#allocation5 + $0x40] ss:$16 sps:$4 sm:$0xff]  }
 0x1b3   :  { %2884 = vmatpush2.bf16.msra.mxu0 %v5428_v58  ;;  %v5987_v58 = vld [vmem:[#allocation5 + $0x220] ss:$16 sps:$4 sm:$0xff]  }
 0x1b4   :  { %2925 = vmatpush2.bf16.msra.mxu1 %v5556_v43  ;;  %2885 = vmatprep.subr.bf16.mxu0 %v5421_v44  ;;  %v5992_v43 = vld [vmem:[#allocation5 + $0x4] ss:$16 sps:$4 sm:$0xff]  }
 0x1b5   :  { %2926 = vmatprep.subr.bf16.mxu1 %v5549_v45  ;;  %v5995_v44 = vld [vmem:[#allocation5 + $0x204] ss:$16 sps:$4 sm:$0xff]   ;;  %v5990_v45 = vld [vmem:[#allocation5] ss:$16 sps:$4 sm:$0xff]  }
 0x1b7   :  { %2886 = vmatpush2.bf16.msra.mxu0 %v5420_v57  ;;  %v5999_v57 = vld [vmem:[#allocation5 + $0x3e0] ss:$16 sps:$4 sm:$0xff]  }
 0x1b8   :  { %2927 = vmatpush2.bf16.msra.mxu1 %v5548_v62  ;;  %2887 = vmatprep.subr.bf16.mxu0 %v5413_v63  ;;  %v6004_v62 = vld [vmem:[#allocation5 + $0x1c4] ss:$16 sps:$4 sm:$0xff]  }
 0x1b9   :  { %2928 = vmatprep.subr.bf16.mxu1 %v5541_v0  ;;  %v6007_v63 = vld [vmem:[#allocation5 + $0x3c4] ss:$16 sps:$4 sm:$0xff]   ;;  %v6002_v0 = vld [vmem:[#allocation5 + $0x1c0] ss:$16 sps:$4 sm:$0xff]  }
 0x1bb   :  { %2888 = vmatpush2.bf16.msra.mxu0 %v5412_v2  ;;  %v6010_v2 = vld [vmem:[#allocation5 + $0x1a4] ss:$16 sps:$4 sm:$0xff]  }
 0x1bc   :  { %2929 = vmatpush2.bf16.msra.mxu1 %v5540_v16  ;;  %4512 = vmatprep.subr.bf16.mxu0 %v5950_v3  ;;  %v6013_v16 = vld [vmem:[#allocation5 + $0x3a4] ss:$16 sps:$4 sm:$0xff]   ;;  %v6008_v3 = vld [vmem:[#allocation5 + $0x1a0] ss:$16 sps:$4 sm:$0xff]  }
 0x1bd   :  { %4553 = vmatprep.subr.bf16.mxu1 %v5953_v4  ;;  %v6011_v4 = vld [vmem:[#allocation5 + $0x3a0] ss:$16 sps:$4 sm:$0xff]  }
 0x1be   :  { %v6620_v10 = vpop.f32.mrf.mxu0  ;;  %2890 = vmatmul.mubr.bf16.vlgmr.msra.gmra.mxu0 %v6557_v20 }
 0x1bf   :  { %v6624_v59 = vpop.f32.mrf.mxu1  ;;  %2931 = vmatmul.mubr.bf16.vlgmr.msra.gmra.mxu1 %v6569_v32  ;;  %4513 = vmatpush1.bf16.msra.mxu0 %v5948_v7  ;;  %v476_v7 = vsub.s32 2, %v6579_v42 }
 0x1c0   :  { %4544 = vmatprep.mubr.bf16.mxu0 %v6618_v9  ;;  %4554 = vmatpush1.bf16.msra.mxu1 %v5951_v29  ;;  %v2647_v12 = vpop.f32.mrf.mxu0  ;;  %v6014_v29 = vld [vmem:[#allocation5 + $0x180] ss:$16 sps:$4 sm:$0xff]  }
 0x1c1   :  { %v2648_v14 = vadd.f32 %v2647_v12, %v2607_v11  ;;  %v2688_v15 = vpop.f32.mrf.mxu1  ;;  %4514 = vmatprep.subr.bf16.mxu0 %v5956_v52  ;;  %4555 = vmatprep.subr.bf16.mxu1 %v5959_v8  ;;  %v6017_v52 = vld [vmem:[#allocation5 + $0x380] ss:$16 sps:$4 sm:$0xff]   ;;  %v6022_v8 = vld [vmem:[#allocation5 + $0x164] ss:$16 sps:$4 sm:$0xff]  }
 0x1c2   :  { %v2649_v20 = vpop.f32.mrf.mxu0  ;;  %v6025_v11 = vld [vmem:[#allocation5 + $0x364] ss:$16 sps:$4 sm:$0xff]  }
 0x1c3   :  { %v2689_v18 = vadd.f32 %v2688_v15, %v2648_v14  ;;  %v2690_v61 = vpop.f32.mrf.mxu1  ;;  %4515 = vmatpush1.bf16.msra.mxu0 %v5954_v55  ;;  %v6632_v55 = vld [vmem:[#allocation8] sm:$0xff] }
 0x1c4   :  { %4556 = vmatpush1.bf16.msra.mxu1 %v5957_v28  ;;  %v2650_v32 = vpop.f32.mrf.mxu0  ;;  %4516 = vmatprep.subr.bf16.mxu0 %v5962_v13  ;;  %v477_v12 = vrot.slane %v6632_v55, %v476_v7  ;;  %v6020_v28 = vld [vmem:[#allocation5 + $0x160] ss:$16 sps:$4 sm:$0xff]   ;;  %v6028_v14 = vld [vmem:[#allocation5 + $0x144] ss:$16 sps:$4 sm:$0xff]  }
 0x1c5   :  { %v2942_v53 = vmax.f32 %v2689_v18, 0.0  ;;  %v2691_v25 = vpop.f32.mrf.mxu1  ;;  %4557 = vmatprep.subr.bf16.mxu1 %v5965_v17  ;;  %v6023_v13 = vld [vmem:[#allocation5 + $0x360] ss:$16 sps:$4 sm:$0xff]   ;;  %v6031_v15 = vld [vmem:[#allocation5 + $0x344] ss:$16 sps:$4 sm:$0xff]  }
 0x1c6   :  { %v2605_v17 = vadd.f32 %v6603_v49, %v477_v12  ;;  %v6026_v20 = vld [vmem:[#allocation5 + $0x140] ss:$16 sps:$4 sm:$0xff]   ;;  %v6034_v61 = vld [vmem:[#allocation5 + $0x124] ss:$16 sps:$4 sm:$0xff]  }
 0x1c7   :  { %v6628_v27 = vpack.c.bf16 %v2942_v53, %v2942_v53  ;;  %4517 = vmatpush1.bf16.msra.mxu0 %v5960_v22  ;;  %v6029_v18 = vld [vmem:[#allocation5 + $0x340] ss:$16 sps:$4 sm:$0xff]   ;;  %v6037_v32 = vld [vmem:[#allocation5 + $0x324] ss:$16 sps:$4 sm:$0xff]  }
 0x1c8   :  { %4558 = vmatpush1.bf16.msra.mxu1 %v5963_v23  ;;  %4518 = vmatprep.subr.bf16.mxu0 %v5968_v24  ;;  %v2646_v22 = vadd.f32 %v6620_v10, %v2605_v17  ;;  %v6032_v23 = vld [vmem:[#allocation5 + $0x120] ss:$16 sps:$4 sm:$0xff]   ;;  %v6040_v53 = vld [vmem:[#allocation5 + $0x104] ss:$16 sps:$4 sm:$0xff]  }
 0x1c9   :  { %4585 = vmatprep.mubr.bf16.mxu1 %v6628_v27  ;;  %4559 = vmatprep.subr.bf16.mxu1 %v5971_v26  ;;  %v6035_v24 = vld [vmem:[#allocation5 + $0x320] ss:$16 sps:$4 sm:$0xff]   ;;  %v6043_v49 = vld [vmem:[#allocation5 + $0x304] ss:$16 sps:$4 sm:$0xff]  }
 0x1ca   :  { %v2687_v25 = vadd.f32 %v6624_v59, %v2646_v22  ;;  %v6038_v26 = vld [vmem:[#allocation5 + $0x100] ss:$16 sps:$4 sm:$0xff]   ;;  %v6046_v10 = vld [vmem:[#allocation5 + $0x4e4] ss:$16 sps:$4 sm:$0xff]  }
 0x1cb   :  { %4519 = vmatpush1.bf16.msra.mxu0 %v5966_v54  ;;  %v2939_v54 = vmax.f32 %v6601_v48, 0.0  ;;  %v6049_v59 = vld [vmem:[#allocation5 + $0x4c4] ss:$16 sps:$4 sm:$0xff]   ;;  %v6062_v12 = vld [vmem:[#allocation5 + $0x420] ss:$16 sps:$4 sm:$0xff]  }
 0x1cc   :  { %4560 = vmatpush1.bf16.msra.mxu1 %v5969_v30  ;;  %4520 = vmatprep.subr.bf16.mxu0 %v5974_v31  ;;  %v6041_v30 = vld [vmem:[#allocation5 + $0x300] ss:$16 sps:$4 sm:$0xff]   ;;  %v2941_v31 = vmax.f32 %v2687_v25, 0.0  ;;  %v6070_v17 = vld [vmem:[#allocation5 + $0x5e4] ss:$16 sps:$4 sm:$0xff]  }
 0x1cd   :  { %4561 = vmatprep.subr.bf16.mxu1 %v5977_v33  ;;  %v6097_v33 = vld [vmem:[#allocation5 + $0x6e4] ss:$16 sps:$4 sm:$0xff]   ;;  %v6149_v25 = vld [vmem:[#allocation5 + $0x7c0] ss:$16 sps:$4 sm:$0xff]  }
 0x1ce   :  { %v6073_v22 = vld [vmem:[#allocation5 + $0x5c4] ss:$16 sps:$4 sm:$0xff]  }
 0x1cf   :  { %4521 = vmatpush1.bf16.msra.mxu0 %v5972_v34  ;;  %v6044_v34 = vld [vmem:[#allocation5 + $0x4e0] ss:$16 sps:$4 sm:$0xff]  }
 0x1d0   :  { %4562 = vmatpush1.bf16.msra.mxu1 %v5975_v35  ;;  %4522 = vmatprep.subr.bf16.mxu0 %v5980_v36  ;;  %v6641_v35 = vpack.c.bf16 %v2939_v54, %v2939_v54  ;;  %v6095_v36 = vld [vmem:[#allocation5 + $0x6e0] ss:$16 sps:$4 sm:$0xff]   ;;  %v6079_v54 = vld [vmem:[#allocation5 + $0x584] ss:$16 sps:$4 sm:$0xff]  }
 0x1d1   :  { %4563 = vmatprep.subr.bf16.mxu1 %v5983_v37  ;;  %v6643_v37 = vpack.c.bf16 %v2941_v31, %v2941_v31  ;;  %v6077_v31 = vld [vmem:[#allocation5 + $0x580] ss:$16 sps:$4 sm:$0xff]  }
 0x1d3   :  { %4523 = vmatpush1.bf16.msra.mxu0 %v5978_v38  ;;  %v6103_v38 = vld [vmem:[#allocation5 + $0x6c4] ss:$16 sps:$4 sm:$0xff]  }
 0x1d4   :  { %4564 = vmatpush1.bf16.msra.mxu1 %v5981_v39  ;;  %4524 = vmatprep.subr.bf16.mxu0 %v5986_v40  ;;  %v6047_v40 = vld [vmem:[#allocation5 + $0x4c0] ss:$16 sps:$4 sm:$0xff]  }
 0x1d5   :  { %4565 = vmatprep.subr.bf16.mxu1 %v5989_v41 }
 0x1d7   :  { %4525 = vmatpush1.bf16.msra.mxu0 %v5984_v19  ;;  %v6052_v19 = vld [vmem:[#allocation5 + $0x4a4] ss:$16 sps:$4 sm:$0xff]  }
 0x1d8   :  { %4566 = vmatpush1.bf16.msra.mxu1 %v5987_v58  ;;  %4526 = vmatprep.subr.bf16.mxu0 %v5992_v43  ;;  %v6101_v58 = vld [vmem:[#allocation5 + $0x6c0] ss:$16 sps:$4 sm:$0xff]  }
 0x1d9   :  { %4567 = vmatprep.subr.bf16.mxu1 %v5995_v44  ;;  %v6109_v44 = vld [vmem:[#allocation5 + $0x6a4] ss:$16 sps:$4 sm:$0xff]  }
 0x1db   :  { %4527 = vmatpush1.bf16.msra.mxu0 %v5990_v45 }
 0x1dc   :  { %4568 = vmatpush1.bf16.msra.mxu1 %v5993_v46  ;;  %4528 = vmatprep.subr.bf16.mxu0 %v5998_v47  ;;  %v6050_v47 = vld [vmem:[#allocation5 + $0x4a0] ss:$16 sps:$4 sm:$0xff]  }
 0x1dd   :  { %4569 = vmatprep.subr.bf16.mxu1 %v6001_v50 }
 0x1df   :  { %4529 = vmatpush2.bf16.msra.mxu0 %v5996_v56  ;;  %v6055_v56 = vld [vmem:[#allocation5 + $0x484] ss:$16 sps:$4 sm:$0xff]  }
 0x1e0   :  { %4570 = vmatpush2.bf16.msra.mxu1 %v5999_v57  ;;  %4530 = vmatprep.subr.bf16.mxu0 %v6004_v62  ;;  %v6107_v57 = vld [vmem:[#allocation5 + $0x6a0] ss:$16 sps:$4 sm:$0xff]  }
 0x1e1   :  { %4571 = vmatprep.subr.bf16.mxu1 %v6007_v63  ;;  %v6115_v63 = vld [vmem:[#allocation5 + $0x684] ss:$16 sps:$4 sm:$0xff]  }
 0x1e3   :  { %4531 = vmatpush2.bf16.msra.mxu0 %v6002_v0  ;;  %v6053_v0 = vld [vmem:[#allocation5 + $0x480] ss:$16 sps:$4 sm:$0xff]  }
 0x1e4   :  { %4572 = vmatpush2.bf16.msra.mxu1 %v6005_v21  ;;  %4532 = vmatprep.subr.bf16.mxu0 %v6010_v2  ;;  %v6058_v21 = vld [vmem:[#allocation5 + $0x464] ss:$16 sps:$4 sm:$0xff]   ;;  %v6113_v2 = vld [vmem:[#allocation5 + $0x680] ss:$16 sps:$4 sm:$0xff]  }
 0x1e5   :  { %4573 = vmatprep.subr.bf16.mxu1 %v6013_v16  ;;  %v6121_v16 = vld [vmem:[#allocation5 + $0x664] ss:$16 sps:$4 sm:$0xff]  }
 0x1e7   :  { %4533 = vmatpush2.bf16.msra.mxu0 %v6008_v3  ;;  %v6056_v3 = vld [vmem:[#allocation5 + $0x460] ss:$16 sps:$4 sm:$0xff]  }
 0x1e8   :  { %4574 = vmatpush2.bf16.msra.mxu1 %v6011_v4  ;;  %4534 = vmatprep.subr.bf16.mxu0 %v6016_v5  ;;  %v6061_v4 = vld [vmem:[#allocation5 + $0x444] ss:$16 sps:$4 sm:$0xff]   ;;  %v6119_v5 = vld [vmem:[#allocation5 + $0x660] ss:$16 sps:$4 sm:$0xff]  }
 0x1e9   :  { %4575 = vmatprep.subr.bf16.mxu1 %v6019_v6  ;;  %v6127_v6 = vld [vmem:[#allocation5 + $0x644] ss:$16 sps:$4 sm:$0xff]  }
 0x1eb   :  { %4535 = vmatpush2.bf16.msra.mxu0 %v6014_v29  ;;  %v6059_v29 = vld [vmem:[#allocation5 + $0x440] ss:$16 sps:$4 sm:$0xff]  }
 0x1ec   :  { %4576 = vmatpush2.bf16.msra.mxu1 %v6017_v52  ;;  %4536 = vmatprep.subr.bf16.mxu0 %v6022_v8  ;;  %v6064_v52 = vld [vmem:[#allocation5 + $0x424] ss:$16 sps:$4 sm:$0xff]   ;;  %v6125_v8 = vld [vmem:[#allocation5 + $0x640] ss:$16 sps:$4 sm:$0xff]  }
 0x1ed   :  { %4577 = vmatprep.subr.bf16.mxu1 %v6025_v11  ;;  %v6133_v11 = vld [vmem:[#allocation5 + $0x624] ss:$16 sps:$4 sm:$0xff]  }
 0x1ef   :  { %4537 = vmatpush2.bf16.msra.mxu0 %v6020_v28  ;;  %v6067_v28 = vld [vmem:[#allocation5 + $0x404] ss:$16 sps:$4 sm:$0xff]  }
 0x1f0   :  { %4578 = vmatpush2.bf16.msra.mxu1 %v6023_v13  ;;  %4538 = vmatprep.subr.bf16.mxu0 %v6028_v14  ;;  %v6131_v13 = vld [vmem:[#allocation5 + $0x620] ss:$16 sps:$4 sm:$0xff]   ;;  %v6139_v14 = vld [vmem:[#allocation5 + $0x604] ss:$16 sps:$4 sm:$0xff]  }
 0x1f1   :  { %4579 = vmatprep.subr.bf16.mxu1 %v6031_v15  ;;  %v6065_v15 = vld [vmem:[#allocation5 + $0x400] ss:$16 sps:$4 sm:$0xff]  }
 0x1f3   :  { %4539 = vmatpush2.bf16.msra.mxu0 %v6026_v20  ;;  %v6137_v20 = vld [vmem:[#allocation5 + $0x600] ss:$16 sps:$4 sm:$0xff]  }
 0x1f4   :  { %4580 = vmatpush2.bf16.msra.mxu1 %v6029_v18  ;;  %4540 = vmatprep.subr.bf16.mxu0 %v6034_v61  ;;  %v6145_v18 = vld [vmem:[#allocation5 + $0x7e4] ss:$16 sps:$4 sm:$0xff]   ;;  %v6068_v61 = vld [vmem:[#allocation5 + $0x5e0] ss:$16 sps:$4 sm:$0xff]  }
 0x1f5   :  { %4581 = vmatprep.subr.bf16.mxu1 %v6037_v32  ;;  %v6143_v32 = vld [vmem:[#allocation5 + $0x7e0] ss:$16 sps:$4 sm:$0xff]  }
 0x1f7   :  { %4541 = vmatpush2.bf16.msra.mxu0 %v6032_v23  ;;  %v6151_v23 = vld [vmem:[#allocation5 + $0x7c4] ss:$16 sps:$4 sm:$0xff]  }
 0x1f8   :  { %4582 = vmatpush2.bf16.msra.mxu1 %v6035_v24  ;;  %4542 = vmatprep.subr.bf16.mxu0 %v6040_v53  ;;  %v6071_v24 = vld [vmem:[#allocation5 + $0x5c0] ss:$16 sps:$4 sm:$0xff]   ;;  %v6076_v53 = vld [vmem:[#allocation5 + $0x5a4] ss:$16 sps:$4 sm:$0xff]  }
 0x1f9   :  { %4583 = vmatprep.subr.bf16.mxu1 %v6043_v49  ;;  %v6157_v49 = vld [vmem:[#allocation5 + $0x7a4] ss:$16 sps:$4 sm:$0xff]  }
 0x1fb   :  { %4543 = vmatpush2.bf16.msra.mxu0 %v6038_v26  ;;  %v6074_v26 = vld [vmem:[#allocation5 + $0x5a0] ss:$16 sps:$4 sm:$0xff]  }
 0x1fc   :  { %4584 = vmatpush2.bf16.msra.mxu1 %v6041_v30  ;;  %4594 = vmatprep.subr.bf16.mxu0 %v6046_v10  ;;  %v6155_v30 = vld [vmem:[#allocation5 + $0x7a0] ss:$16 sps:$4 sm:$0xff]   ;;  %v6163_v10 = vld [vmem:[#allocation5 + $0x784] ss:$16 sps:$4 sm:$0xff]  }
 0x1fd   :  { %4635 = vmatprep.subr.bf16.mxu1 %v6097_v33  ;;  %v6082_v33 = vld [vmem:[#allocation5 + $0x564] ss:$16 sps:$4 sm:$0xff]  }
 0x1fe   :  { %v6645_v48 = vpop.f32.mrf.mxu0  ;;  %4545 = vmatmul.mubr.bf16.vlgmr.msra.gmra.mxu0 %v6641_v35 }
 0x1ff   :  { %v6648_v39 = vpop.f32.mrf.mxu1  ;;  %4586 = vmatmul.mubr.bf16.vlgmr.msra.gmra.mxu1 %v6643_v37  ;;  %4595 = vmatpush1.bf16.msra.mxu0 %v6044_v34  ;;  %v6161_v34 = vld [vmem:[#allocation5 + $0x780] ss:$16 sps:$4 sm:$0xff]  }
 0x200   :  { %v6651_v41 = vpop.f32.mrf.mxu0  ;;  %4596 = vmatprep.subr.bf16.mxu0 %v6049_v59  ;;  %4636 = vmatpush1.bf16.msra.mxu1 %v6095_v36  ;;  %v6169_v59 = vld [vmem:[#allocation5 + $0x764] ss:$16 sps:$4 sm:$0xff]   ;;  %v6080_v36 = vld [vmem:[#allocation5 + $0x560] ss:$16 sps:$4 sm:$0xff]  }
 0x201   :  { %v6653_v43 = vpop.f32.mrf.mxu1  ;;  %4637 = vmatprep.subr.bf16.mxu1 %v6103_v38  ;;  %v6085_v38 = vld [vmem:[#allocation5 + $0x544] ss:$16 sps:$4 sm:$0xff]  }
 0x202   :  { %v2731_v45 = vpop.f32.mrf.mxu0 }
 0x203   :  { %v2772_v46 = vpop.f32.mrf.mxu1  ;;  %4597 = vmatpush1.bf16.msra.mxu0 %v6047_v40  ;;  %v6167_v40 = vld [vmem:[#allocation5 + $0x760] ss:$16 sps:$4 sm:$0xff]  }
 0x204   :  { %v2732_v50 = vpop.f32.mrf.mxu0  ;;  %4598 = vmatprep.subr.bf16.mxu0 %v6052_v19  ;;  %4638 = vmatpush1.bf16.msra.mxu1 %v6101_v58  ;;  %v6175_v19 = vld [vmem:[#allocation5 + $0x744] ss:$16 sps:$4 sm:$0xff]   ;;  %v6083_v58 = vld [vmem:[#allocation5 + $0x540] ss:$16 sps:$4 sm:$0xff]   ;;  %v484_v46 = vsub.s32 4, %v6579_v42 }
 0x205   :  { %v2773_v62 = vpop.f32.mrf.mxu1  ;;  %4639 = vmatprep.subr.bf16.mxu1 %v6109_v44  ;;  %v6088_v44 = vld [vmem:[#allocation5 + $0x524] ss:$16 sps:$4 sm:$0xff]   ;;  %v6173_v45 = vld [vmem:[#allocation5 + $0x740] ss:$16 sps:$4 sm:$0xff]   ;;  %v488_v50 = vsub.s32 5, %v6579_v42 }
 0x206   :  { %v6179_v62 = vld [vmem:[#allocation5 + $0x720] ss:$16 sps:$4 sm:$0xff]  }
 0x207   :  { %4599 = vmatpush1.bf16.msra.mxu0 %v6050_v47  ;;  %v6181_v47 = vld [vmem:[#allocation5 + $0x724] ss:$16 sps:$4 sm:$0xff]  }
 0x208   :  { %4600 = vmatprep.subr.bf16.mxu0 %v6055_v56  ;;  %4640 = vmatpush1.bf16.msra.mxu1 %v6107_v57  ;;  %v6086_v56 = vld [vmem:[#allocation5 + $0x520] ss:$16 sps:$4 sm:$0xff]   ;;  %v6091_v57 = vld [vmem:[#allocation5 + $0x504] ss:$16 sps:$4 sm:$0xff]  }
 0x209   :  { %4641 = vmatprep.subr.bf16.mxu1 %v6115_v63  ;;  %v485_v63 = vrot.slane %v6632_v55, %v484_v46  ;;  %v492_v46 = vsub.s32 6, %v6579_v42 }
 0x20b   :  { %4601 = vmatpush1.bf16.msra.mxu0 %v6053_v0  ;;  %v6187_v0 = vld [vmem:[#allocation5 + $0x704] ss:$16 sps:$4 sm:$0xff]  }
 0x20c   :  { %4602 = vmatprep.subr.bf16.mxu0 %v6058_v21  ;;  %4642 = vmatpush1.bf16.msra.mxu1 %v6113_v2  ;;  %v489_v21 = vrot.slane %v6632_v55, %v488_v50  ;;  %v6089_v2 = vld [vmem:[#allocation5 + $0x500] ss:$16 sps:$4 sm:$0xff]   ;;  %v6172_v50 = vld [vmem:[#allocation5 + $0x14c] ss:$16 sps:$4 sm:$0xff]  }
 0x20d   :  { %4643 = vmatprep.subr.bf16.mxu1 %v6121_v16  ;;  %v6094_v16 = vld [vmem:[#allocation5 + $0xec] ss:$16 sps:$4 sm:$0xff]  }
 0x20f   :  { %4603 = vmatpush1.bf16.msra.mxu0 %v6056_v3  ;;  %v6185_v3 = vld [vmem:[#allocation5 + $0x700] ss:$16 sps:$4 sm:$0xff]  }
 0x210   :  { %4604 = vmatprep.subr.bf16.mxu0 %v6061_v4  ;;  %4644 = vmatpush1.bf16.msra.mxu1 %v6119_v5  ;;  %v2728_v4 = vadd.f32 %v6645_v48, %v485_v63  ;;  %v6193_v5 = vld [vmem:[#allocation5 + $0x2ec] ss:$16 sps:$4 sm:$0xff]  }
 0x211   :  { %4645 = vmatprep.subr.bf16.mxu1 %v6127_v6  ;;  %v2730_v6 = vadd.f32 %v6651_v41, %v489_v21  ;;  %v6178_v63 = vld [vmem:[#allocation5 + $0x12c] ss:$16 sps:$4 sm:$0xff]  }
 0x213   :  { %4605 = vmatpush1.bf16.msra.mxu0 %v6059_v29  ;;  %v2769_v29 = vadd.f32 %v6648_v39, %v2728_v4  ;;  %v6092_v39 = vld [vmem:[#allocation5 + $0xe8] ss:$16 sps:$4 sm:$0xff]  }
 0x214   :  { %4606 = vmatprep.subr.bf16.mxu0 %v6064_v52  ;;  %4646 = vmatpush1.bf16.msra.mxu1 %v6125_v8  ;;  %v2771_v8 = vadd.f32 %v6653_v43, %v2730_v6  ;;  %v6098_v43 = vld [vmem:[#allocation5 + $0xc8] ss:$16 sps:$4 sm:$0xff]  }
 0x215   :  { %4647 = vmatprep.subr.bf16.mxu1 %v6133_v11 }
 0x217   :  { %4607 = vmatpush1.bf16.msra.mxu0 %v6062_v12 }
 0x218   :  { %4608 = vmatprep.subr.bf16.mxu0 %v6067_v28  ;;  %4648 = vmatpush1.bf16.msra.mxu1 %v6131_v13 }
 0x219   :  { %4649 = vmatprep.subr.bf16.mxu1 %v6139_v14 }
 0x21b   :  { %4609 = vmatpush1.bf16.msra.mxu0 %v6065_v15 }
 0x21c   :  { %4610 = vmatprep.subr.bf16.mxu0 %v6070_v17  ;;  %4650 = vmatpush1.bf16.msra.mxu1 %v6137_v20 }
 0x21d   :  { %4651 = vmatprep.subr.bf16.mxu1 %v6145_v18 }
 0x21f   :  { %4611 = vmatpush2.bf16.msra.mxu0 %v6068_v61 }
 0x220   :  { %4612 = vmatprep.subr.bf16.mxu0 %v6073_v22  ;;  %4652 = vmatpush2.bf16.msra.mxu1 %v6143_v32  ;;  %v6100_v32 = vld [vmem:[#allocation5 + $0xcc] ss:$16 sps:$4 sm:$0xff]  }
 0x221   :  { %4653 = vmatprep.subr.bf16.mxu1 %v6151_v23  ;;  %v6106_v23 = vld [vmem:[#allocation5 + $0xac] ss:$16 sps:$4 sm:$0xff]  }
 0x223   :  { %4613 = vmatpush2.bf16.msra.mxu0 %v6071_v24  ;;  %v6104_v24 = vld [vmem:[#allocation5 + $0xa8] ss:$16 sps:$4 sm:$0xff]  }
 0x224   :  { %4614 = vmatprep.subr.bf16.mxu0 %v6076_v53  ;;  %4654 = vmatpush2.bf16.msra.mxu1 %v6149_v25  ;;  %v6112_v53 = vld [vmem:[#allocation5 + $0x8c] ss:$16 sps:$4 sm:$0xff]   ;;  %v6110_v25 = vld [vmem:[#allocation5 + $0x88] ss:$16 sps:$4 sm:$0xff]  }
 0x225   :  { %4655 = vmatprep.subr.bf16.mxu1 %v6157_v49  ;;  %v6118_v49 = vld [vmem:[#allocation5 + $0x6c] ss:$16 sps:$4 sm:$0xff]  }
 0x227   :  { %4615 = vmatpush2.bf16.msra.mxu0 %v6074_v26  ;;  %v6116_v26 = vld [vmem:[#allocation5 + $0x68] ss:$16 sps:$4 sm:$0xff]  }
 0x228   :  { %4616 = vmatprep.subr.bf16.mxu0 %v6079_v54  ;;  %4656 = vmatpush2.bf16.msra.mxu1 %v6155_v30  ;;  %v6124_v54 = vld [vmem:[#allocation5 + $0x4c] ss:$16 sps:$4 sm:$0xff]   ;;  %v6122_v30 = vld [vmem:[#allocation5 + $0x48] ss:$16 sps:$4 sm:$0xff]  }
 0x229   :  { %4657 = vmatprep.subr.bf16.mxu1 %v6163_v10  ;;  %v6130_v10 = vld [vmem:[#allocation5 + $0x2c] ss:$16 sps:$4 sm:$0xff]  }
 0x22b   :  { %4617 = vmatpush2.bf16.msra.mxu0 %v6077_v31  ;;  %v6136_v31 = vld [vmem:[#allocation5 + $0xc] ss:$16 sps:$4 sm:$0xff]  }
 0x22c   :  { %4618 = vmatprep.subr.bf16.mxu0 %v6082_v33  ;;  %4658 = vmatpush2.bf16.msra.mxu1 %v6161_v34  ;;  %v6134_v33 = vld [vmem:[#allocation5 + $0x8] ss:$16 sps:$4 sm:$0xff]   ;;  %v6142_v34 = vld [vmem:[#allocation5 + $0x1ec] ss:$16 sps:$4 sm:$0xff]  }
 0x22d   :  { %4659 = vmatprep.subr.bf16.mxu1 %v6169_v59  ;;  %v6140_v59 = vld [vmem:[#allocation5 + $0x1e8] ss:$16 sps:$4 sm:$0xff]  }
 0x22f   :  { %4619 = vmatpush2.bf16.msra.mxu0 %v6080_v36  ;;  %v6148_v36 = vld [vmem:[#allocation5 + $0x1cc] ss:$16 sps:$4 sm:$0xff]  }
 0x230   :  { %4620 = vmatprep.subr.bf16.mxu0 %v6085_v38  ;;  %4660 = vmatpush2.bf16.msra.mxu1 %v6167_v40  ;;  %v6146_v38 = vld [vmem:[#allocation5 + $0x1c8] ss:$16 sps:$4 sm:$0xff]   ;;  %v6154_v40 = vld [vmem:[#allocation5 + $0x1ac] ss:$16 sps:$4 sm:$0xff]  }
 0x231   :  { %4661 = vmatprep.subr.bf16.mxu1 %v6175_v19  ;;  %v6152_v19 = vld [vmem:[#allocation5 + $0x1a8] ss:$16 sps:$4 sm:$0xff]  }
 0x233   :  { %4621 = vmatpush2.bf16.msra.mxu0 %v6083_v58  ;;  %v6160_v58 = vld [vmem:[#allocation5 + $0x18c] ss:$16 sps:$4 sm:$0xff]  }
 0x234   :  { %4622 = vmatprep.subr.bf16.mxu0 %v6088_v44  ;;  %4662 = vmatpush2.bf16.msra.mxu1 %v6173_v45  ;;  %v6158_v44 = vld [vmem:[#allocation5 + $0x188] ss:$16 sps:$4 sm:$0xff]   ;;  %v6166_v45 = vld [vmem:[#allocation5 + $0x16c] ss:$16 sps:$4 sm:$0xff]  }
 0x235   :  { %4663 = vmatprep.subr.bf16.mxu1 %v6181_v47  ;;  %v6164_v47 = vld [vmem:[#allocation5 + $0x168] ss:$16 sps:$4 sm:$0xff]  }
 0x237   :  { %4623 = vmatpush2.bf16.msra.mxu0 %v6086_v56  ;;  %v496_v56 = vsub.s32 7, %v6579_v42 }
 0x238   :  { %4624 = vmatprep.subr.bf16.mxu0 %v6091_v57  ;;  %4664 = vmatpush2.bf16.msra.mxu1 %v6179_v62  ;;  %v493_v57 = vrot.slane %v6632_v55, %v492_v46  ;;  %v6170_v62 = vld [vmem:[#allocation5 + $0x148] ss:$16 sps:$4 sm:$0xff]  }
 0x239   :  { %4665 = vmatprep.subr.bf16.mxu1 %v6187_v0  ;;  %v497_v0 = vrot.slane %v6632_v55, %v496_v56  ;;  %v6190_v55 = vld [vmem:[#allocation5 + $0x4ec] ss:$16 sps:$4 sm:$0xff]   ;;  %v6230_v46 = vld [vmem:[#allocation5 + $0x408] ss:$16 sps:$4 sm:$0xff]  }
 0x23a   :  { %v6233_v56 = vld [vmem:[#allocation5 + $0x208] ss:$16 sps:$4 sm:$0xff]  }
 0x23b   :  { %4625 = vmatpush2.bf16.msra.mxu0 %v6089_v2  ;;  %v6176_v2 = vld [vmem:[#allocation5 + $0x128] ss:$16 sps:$4 sm:$0xff]  }
 0x23c   :  { %4676 = vmatprep.subr.bf16.mxu0 %v6094_v16  ;;  %4666 = vmatpush2.bf16.msra.mxu1 %v6185_v3  ;;  %v6184_v3 = vld [vmem:[#allocation5 + $0x10c] ss:$16 sps:$4 sm:$0xff]  }
 0x23d   :  { %4717 = vmatprep.subr.bf16.mxu1 %v6193_v5 }
 0x23e   :  { %v2809_v52 = vpop.f32.mrf.mxu0 }
 0x23f   :  { %v2810_v11 = vadd.f32 %v2809_v52, %v2769_v29  ;;  %v6663_v12 = vpop.f32.mrf.mxu1 }
 0x240   :  { %v2811_v28 = vpop.f32.mrf.mxu0  ;;  %v2851_v21 = vadd.f32 %v6663_v12, %v493_v57  ;;  %v6236_v57 = vld [vmem:[#allocation5 + $0x5e8] ss:$16 sps:$4 sm:$0xff]  }
 0x241   :  { %v2812_v13 = vadd.f32 %v2811_v28, %v2771_v8  ;;  %v6665_v14 = vpop.f32.mrf.mxu1  ;;  %v2943_v48 = vmax.f32 %v2810_v11, 0.0  ;;  %v6182_v28 = vld [vmem:[#allocation5 + $0x108] ss:$16 sps:$4 sm:$0xff]  }
 0x242   :  { %v2813_v15 = vpop.f32.mrf.mxu0  ;;  %v2853_v4 = vadd.f32 %v6665_v14, %v497_v0  ;;  %v6196_v14 = vld [vmem:[#allocation5 + $0x4cc] ss:$16 sps:$4 sm:$0xff]   ;;  %v6239_v0 = vld [vmem:[#allocation5 + $0x3e8] ss:$16 sps:$4 sm:$0xff]  }
 0x243   :  { %v2944_v17 = vmax.f32 %v2812_v13, 0.0  ;;  %v2854_v41 = vpop.f32.mrf.mxu1  ;;  %v6669_v22 = vpack.c.bf16 %v2943_v48, %v2943_v48 }
 0x244   :  { %v2814_v20 = vpop.f32.mrf.mxu0 }
 0x245   :  { %v6667_v18 = vpack.c.bf16 %v2944_v17, %v2944_v17  ;;  %v2855_v61 = vpop.f32.mrf.mxu1 }
 0x246   :  { %v6188_v61 = vld [vmem:[#allocation5 + $0x4e8] ss:$16 sps:$4 sm:$0xff]  }
 0x247   :  { %4626 = vmatprep.mubr.bf16.mxu0 %v6667_v18 }
 0x248   :  { %4627 = vmatmul.mubr.bf16.vlgmr.msra.gmra.mxu0 %v6669_v22 }
 0x249   :  { %4677 = vmatpush1.bf16.msra.mxu0 %v6092_v39  ;;  %4708 = vmatprep.mubr.bf16.mxu0 %v6618_v9  ;;  %v6128_v9 = vld [vmem:[#allocation5 + $0x28] ss:$16 sps:$4 sm:$0xff]  }
 0x24a   :  { %4678 = vmatprep.subr.bf16.mxu0 %v6100_v32  ;;  %v6191_v32 = vld [vmem:[#allocation5 + $0x2e8] ss:$16 sps:$4 sm:$0xff]  }
 0x24d   :  { %4679 = vmatpush1.bf16.msra.mxu0 %v6098_v43 }
 0x24e   :  { %4680 = vmatprep.subr.bf16.mxu0 %v6106_v23  ;;  %v6194_v23 = vld [vmem:[#allocation5 + $0x4c8] ss:$16 sps:$4 sm:$0xff]  }
 0x251   :  { %4681 = vmatpush1.bf16.msra.mxu0 %v6104_v24  ;;  %v6199_v24 = vld [vmem:[#allocation5 + $0x2cc] ss:$16 sps:$4 sm:$0xff]  }
 0x252   :  { %4682 = vmatprep.subr.bf16.mxu0 %v6112_v53  ;;  %v6202_v53 = vld [vmem:[#allocation5 + $0x4ac] ss:$16 sps:$4 sm:$0xff]  }
 0x255   :  { %4683 = vmatpush1.bf16.msra.mxu0 %v6110_v25  ;;  %v6197_v25 = vld [vmem:[#allocation5 + $0x2c8] ss:$16 sps:$4 sm:$0xff]  }
 0x256   :  { %4684 = vmatprep.subr.bf16.mxu0 %v6118_v49  ;;  %v6205_v49 = vld [vmem:[#allocation5 + $0x2ac] ss:$16 sps:$4 sm:$0xff]  }
 0x259   :  { %4685 = vmatpush1.bf16.msra.mxu0 %v6116_v26  ;;  %v6208_v26 = vld [vmem:[#allocation5 + $0x48c] ss:$16 sps:$4 sm:$0xff]  }
 0x25a   :  { %4686 = vmatprep.subr.bf16.mxu0 %v6124_v54  ;;  %v6206_v54 = vld [vmem:[#allocation5 + $0x488] ss:$16 sps:$4 sm:$0xff]  }
 0x25d   :  { %4687 = vmatpush1.bf16.msra.mxu0 %v6122_v30  ;;  %v6211_v30 = vld [vmem:[#allocation5 + $0x28c] ss:$16 sps:$4 sm:$0xff]  }
 0x25e   :  { %4688 = vmatprep.subr.bf16.mxu0 %v6130_v10  ;;  %v6214_v10 = vld [vmem:[#allocation5 + $0x46c] ss:$16 sps:$4 sm:$0xff]  }
 0x261   :  { %4689 = vmatpush1.bf16.msra.mxu0 %v6128_v9  ;;  %v6209_v9 = vld [vmem:[#allocation5 + $0x288] ss:$16 sps:$4 sm:$0xff]  }
 0x262   :  { %4690 = vmatprep.subr.bf16.mxu0 %v6136_v31  ;;  %v6217_v31 = vld [vmem:[#allocation5 + $0x26c] ss:$16 sps:$4 sm:$0xff]  }
 0x265   :  { %4691 = vmatpush1.bf16.msra.mxu0 %v6134_v33  ;;  %v6220_v33 = vld [vmem:[#allocation5 + $0x44c] ss:$16 sps:$4 sm:$0xff]  }
 0x266   :  { %4692 = vmatprep.subr.bf16.mxu0 %v6142_v34  ;;  %v6215_v34 = vld [vmem:[#allocation5 + $0x268] ss:$16 sps:$4 sm:$0xff]  }
 0x269   :  { %4693 = vmatpush2.bf16.msra.mxu0 %v6140_v59  ;;  %v6218_v59 = vld [vmem:[#allocation5 + $0x448] ss:$16 sps:$4 sm:$0xff]  }
 0x26a   :  { %4694 = vmatprep.subr.bf16.mxu0 %v6148_v36  ;;  %v6223_v36 = vld [vmem:[#allocation5 + $0x24c] ss:$16 sps:$4 sm:$0xff]  }
 0x26d   :  { %4695 = vmatpush2.bf16.msra.mxu0 %v6146_v38  ;;  %v6226_v38 = vld [vmem:[#allocation5 + $0x42c] ss:$16 sps:$4 sm:$0xff]  }
 0x26e   :  { %4696 = vmatprep.subr.bf16.mxu0 %v6154_v40  ;;  %v6221_v40 = vld [vmem:[#allocation5 + $0x248] ss:$16 sps:$4 sm:$0xff]  }
 0x271   :  { %4697 = vmatpush2.bf16.msra.mxu0 %v6152_v19  ;;  %v6224_v19 = vld [vmem:[#allocation5 + $0x428] ss:$16 sps:$4 sm:$0xff]  }
 0x272   :  { %4698 = vmatprep.subr.bf16.mxu0 %v6160_v58  ;;  %v6229_v58 = vld [vmem:[#allocation5 + $0x22c] ss:$16 sps:$4 sm:$0xff]  }
 0x275   :  { %4699 = vmatpush2.bf16.msra.mxu0 %v6158_v44  ;;  %v6232_v44 = vld [vmem:[#allocation5 + $0x40c] ss:$16 sps:$4 sm:$0xff]  }
 0x276   :  { %4700 = vmatprep.subr.bf16.mxu0 %v6166_v45  ;;  %v6227_v45 = vld [vmem:[#allocation5 + $0x228] ss:$16 sps:$4 sm:$0xff]  }
 0x279   :  { %4701 = vmatpush2.bf16.msra.mxu0 %v6164_v47  ;;  %v6235_v47 = vld [vmem:[#allocation5 + $0x20c] ss:$16 sps:$4 sm:$0xff]  }
 0x27a   :  { %4702 = vmatprep.subr.bf16.mxu0 %v6172_v50  ;;  %v6238_v50 = vld [vmem:[#allocation5 + $0x5ec] ss:$16 sps:$4 sm:$0xff]  }
 0x27d   :  { %4703 = vmatpush2.bf16.msra.mxu0 %v6170_v62  ;;  %v6241_v62 = vld [vmem:[#allocation5 + $0x3ec] ss:$16 sps:$4 sm:$0xff]  }
 0x27e   :  { %v2891_v16 = vpop.f32.mrf.mxu0  ;;  %4704 = vmatprep.subr.bf16.mxu0 %v6178_v63  ;;  %v6244_v63 = vld [vmem:[#allocation5 + $0x5cc] ss:$16 sps:$4 sm:$0xff]  }
 0x27f   :  { %v2892_v5 = vadd.f32 %v2891_v16, %v2851_v21  ;;  %v2932_v6 = vpop.f32.mrf.mxu1  ;;  %v6242_v21 = vld [vmem:[#allocation5 + $0x5c8] ss:$16 sps:$4 sm:$0xff]   ;;  %v6250_v16 = vld [vmem:[#allocation5 + $0x5ac] ss:$16 sps:$4 sm:$0xff]  }
 0x280   :  { %v2893_v29 = vpop.f32.mrf.mxu0 }
 0x281   :  { %v2933_v52 = vadd.f32 %v2932_v6, %v2892_v5  ;;  %v2894_v8 = vadd.f32 %v2893_v29, %v2853_v4  ;;  %v2934_v11 = vpop.f32.mrf.mxu1  ;;  %4705 = vmatpush2.bf16.msra.mxu0 %v6176_v2  ;;  %v6247_v2 = vld [vmem:[#allocation5 + $0x3cc] ss:$16 sps:$4 sm:$0xff]   ;;  %v6248_v4 = vld [vmem:[#allocation5 + $0x5a8] ss:$16 sps:$4 sm:$0xff]  }
 0x282   :  { %v2895_v13 = vpop.f32.mrf.mxu0  ;;  %4706 = vmatprep.subr.bf16.mxu0 %v6184_v3  ;;  %v6245_v3 = vld [vmem:[#allocation5 + $0x3c8] ss:$16 sps:$4 sm:$0xff]   ;;  %v6253_v5 = vld [vmem:[#allocation5 + $0x3ac] ss:$16 sps:$4 sm:$0xff]  }
 0x283   :  { %v2935_v48 = vadd.f32 %v2934_v11, %v2894_v8  ;;  %v2936_v12 = vpop.f32.mrf.mxu1  ;;  %v2945_v17 = vmax.f32 %v2933_v52, 0.0  ;;  %v6256_v6 = vld [vmem:[#allocation5 + $0x58c] ss:$16 sps:$4 sm:$0xff]   ;;  %v6251_v29 = vld [vmem:[#allocation5 + $0x3a8] ss:$16 sps:$4 sm:$0xff]  }
 0x284   :  { %v2896_v15 = vpop.f32.mrf.mxu0  ;;  %v6254_v52 = vld [vmem:[#allocation5 + $0x588] ss:$16 sps:$4 sm:$0xff]   ;;  %v6259_v8 = vld [vmem:[#allocation5 + $0x38c] ss:$16 sps:$4 sm:$0xff]  }
 0x285   :  { %v2946_v41 = vmax.f32 %v2935_v48, 0.0  ;;  %v2937_v20 = vpop.f32.mrf.mxu1  ;;  %4707 = vmatpush2.bf16.msra.mxu0 %v6182_v28  ;;  %v6683_v43 = vpack.c.bf16 %v2945_v17, %v2945_v17  ;;  %v6262_v11 = vld [vmem:[#allocation5 + $0x56c] ss:$16 sps:$4 sm:$0xff]   ;;  %v6257_v28 = vld [vmem:[#allocation5 + $0x388] ss:$16 sps:$4 sm:$0xff]  }
 0x286   :  { %4758 = vmatprep.subr.bf16.mxu0 %v6190_v55  ;;  %v6260_v13 = vld [vmem:[#allocation5 + $0x568] ss:$16 sps:$4 sm:$0xff]   ;;  %v6265_v55 = vld [vmem:[#allocation5 + $0x36c] ss:$16 sps:$4 sm:$0xff]  }
 0x287   :  { %v6680_v39 = vpack.c.bf16 %v2946_v41, %v2946_v41  ;;  %v6268_v48 = vld [vmem:[#allocation5 + $0x54c] ss:$16 sps:$4 sm:$0xff]   ;;  %v6263_v12 = vld [vmem:[#allocation5 + $0x368] ss:$16 sps:$4 sm:$0xff]  }
 0x288   :  { %4709 = vmatmul.mubr.bf16.vlgmr.msra.gmra.mxu0 %v6641_v35  ;;  %v6200_v35 = vld [vmem:[#allocation5 + $0x4a8] ss:$16 sps:$4 sm:$0xff]   ;;  %v6271_v41 = vld [vmem:[#allocation5 + $0x34c] ss:$16 sps:$4 sm:$0xff]  }
 0x289   :  { %4759 = vmatpush1.bf16.msra.mxu0 %v6188_v61  ;;  %4790 = vmatprep.mubr.bf16.mxu0 %v6667_v18  ;;  %v6203_v18 = vld [vmem:[#allocation5 + $0x2a8] ss:$16 sps:$4 sm:$0xff]   ;;  %v6274_v20 = vld [vmem:[#allocation5 + $0x52c] ss:$16 sps:$4 sm:$0xff]  }
 0x28a   :  { %4667 = vmatprep.mubr.bf16.mxu1 %v6680_v39  ;;  %4760 = vmatprep.subr.bf16.mxu0 %v6196_v14  ;;  %v6689_v15 = vld [vmem:[#allocation8 + $0x8] sm:$0xf] }
 0x28b   :  { %4668 = vmatmul.mubr.bf16.vlgmr.msra.gmra.mxu1 %v6683_v43  ;;  %v6266_v17 = vld [vmem:[#allocation5 + $0x548] ss:$16 sps:$4 sm:$0xff]   ;;  %v3215_v61 = vrot.slane %v6689_v15, %v468_v51 }
 0x28c   :  { %4718 = vmatpush1.bf16.msra.mxu1 %v6191_v32  ;;  %4749 = vmatprep.mubr.bf16.mxu1 %v6628_v27  ;;  %v6212_v27 = vld [vmem:[#allocation5 + $0x468] ss:$16 sps:$4 sm:$0xff]  }
 0x28d   :  { %4761 = vmatpush1.bf16.msra.mxu0 %v6194_v23  ;;  %4719 = vmatprep.subr.bf16.mxu1 %v6199_v24  ;;  %v6269_v14 = vld [vmem:[#allocation5 + $0x348] ss:$16 sps:$4 sm:$0xff]   ;;  %v3219_v23 = vrot.slane %v6689_v15, %v472_v60  ;;  %v6277_v24 = vld [vmem:[#allocation5 + $0x32c] ss:$16 sps:$4 sm:$0xff]  }
 0x28e   :  { %4762 = vmatprep.subr.bf16.mxu0 %v6202_v53  ;;  %v6272_v32 = vld [vmem:[#allocation5 + $0x528] ss:$16 sps:$4 sm:$0xff]  }
 0x28f   :  { %v6332_v60 = vld [vmem:[#allocation7 + $0x78] sm:$0xff]  }
 0x290   :  { %4720 = vmatpush1.bf16.msra.mxu1 %v6197_v25  ;;  %v6280_v25 = vld [vmem:[#allocation5 + $0x50c] ss:$16 sps:$4 sm:$0xff]  }
 0x291   :  { %4763 = vmatpush1.bf16.msra.mxu0 %v6200_v35  ;;  %4721 = vmatprep.subr.bf16.mxu1 %v6205_v49 }
 0x292   :  { %4764 = vmatprep.subr.bf16.mxu0 %v6208_v26 }
 0x294   :  { %4722 = vmatpush1.bf16.msra.mxu1 %v6203_v18  ;;  %v6275_v18 = vld [vmem:[#allocation5 + $0x328] ss:$16 sps:$4 sm:$0xff]  }
 0x295   :  { %4765 = vmatpush1.bf16.msra.mxu0 %v6206_v54  ;;  %4723 = vmatprep.subr.bf16.mxu1 %v6211_v30 }
 0x296   :  { %4766 = vmatprep.subr.bf16.mxu0 %v6214_v10  ;;  %v6278_v10 = vld [vmem:[#allocation5 + $0x508] ss:$16 sps:$4 sm:$0xff]  }
 0x298   :  { %4724 = vmatpush1.bf16.msra.mxu1 %v6209_v9  ;;  %v6283_v9 = vld [vmem:[#allocation5 + $0x30c] ss:$16 sps:$4 sm:$0xff]  }
 0x299   :  { %4767 = vmatpush1.bf16.msra.mxu0 %v6212_v27  ;;  %4725 = vmatprep.subr.bf16.mxu1 %v6217_v31 }
 0x29a   :  { %4768 = vmatprep.subr.bf16.mxu0 %v6220_v33 }
 0x29c   :  { %4726 = vmatpush1.bf16.msra.mxu1 %v6215_v34 }
 0x29d   :  { %4769 = vmatpush1.bf16.msra.mxu0 %v6218_v59  ;;  %4727 = vmatprep.subr.bf16.mxu1 %v6223_v36  ;;  %v6281_v59 = vld [vmem:[#allocation5 + $0x308] ss:$16 sps:$4 sm:$0xff]  }
 0x29e   :  { %4770 = vmatprep.subr.bf16.mxu0 %v6226_v38  ;;  %v6286_v38 = vld [vmem:[#allocation5 + $0x6ec] ss:$16 sps:$4 sm:$0xff]  }
 0x2a0   :  { %4728 = vmatpush1.bf16.msra.mxu1 %v6221_v40  ;;  %v6333_v40 = vld [vmem:[#allocation7 + $0x38] sm:$0xff]  }
 0x2a1   :  { %4771 = vmatpush1.bf16.msra.mxu0 %v6224_v19  ;;  %4729 = vmatprep.subr.bf16.mxu1 %v6229_v58  ;;  %v6334_v19 = vld [vmem:[#allocation7 + $0x70] sm:$0xff]   ;;  %v6284_v58 = vld [vmem:[#allocation5 + $0x6e8] ss:$16 sps:$4 sm:$0xff]  }
 0x2a2   :  { %4772 = vmatprep.subr.bf16.mxu0 %v6232_v44  ;;  %v6289_v44 = vld [vmem:[#allocation5 + $0x6cc] ss:$16 sps:$4 sm:$0xff]  }
 0x2a4   :  { %4730 = vmatpush1.bf16.msra.mxu1 %v6227_v45  ;;  %v6335_v45 = vld [vmem:[#allocation7 + $0x30] sm:$0xff]  }
 0x2a5   :  { %4773 = vmatpush1.bf16.msra.mxu0 %v6230_v46  ;;  %4731 = vmatprep.subr.bf16.mxu1 %v6235_v47  ;;  %v6336_v46 = vld [vmem:[#allocation7 + $0x68] sm:$0xff]  }
 0x2a6   :  { %4774 = vmatprep.subr.bf16.mxu0 %v6238_v50  ;;  %v6287_v47 = vld [vmem:[#allocation5 + $0x6c8] ss:$16 sps:$4 sm:$0xff]   ;;  %v6292_v50 = vld [vmem:[#allocation5 + $0x6ac] ss:$16 sps:$4 sm:$0xff]  }
 0x2a8   :  { %4732 = vmatpush1.bf16.msra.mxu1 %v6233_v56  ;;  %v6337_v56 = vld [vmem:[#allocation7 + $0x28] sm:$0xff]  }
 0x2a9   :  { %4775 = vmatpush2.bf16.msra.mxu0 %v6236_v57  ;;  %4733 = vmatprep.subr.bf16.mxu1 %v6241_v62  ;;  %v6338_v57 = vld [vmem:[#allocation7 + $0x60] sm:$0xff]   ;;  %v6295_v62 = vld [vmem:[#allocation5 + $0x68c] ss:$16 sps:$4 sm:$0xff]  }
 0x2aa   :  { %4776 = vmatprep.subr.bf16.mxu0 %v6244_v63  ;;  %v6339_v63 = vld [vmem:[#allocation7 + $0x20] sm:$0xff]  }
 0x2ac   :  { %4734 = vmatpush2.bf16.msra.mxu1 %v6239_v0  ;;  %v6340_v0 = vld [vmem:[#allocation7 + $0x58] sm:$0xff]  }
 0x2ad   :  { %4777 = vmatpush2.bf16.msra.mxu0 %v6242_v21  ;;  %4735 = vmatprep.subr.bf16.mxu1 %v6247_v2  ;;  %v6298_v21 = vld [vmem:[#allocation5 + $0x66c] ss:$16 sps:$4 sm:$0xff]   ;;  %v6342_v2 = vld [vmem:[#allocation7 + $0x50] sm:$0xff]  }
 0x2ae   :  { %4778 = vmatprep.subr.bf16.mxu0 %v6250_v16  ;;  %v6296_v16 = vld [vmem:[#allocation5 + $0x668] ss:$16 sps:$4 sm:$0xff]  }
 0x2b0   :  { %4736 = vmatpush2.bf16.msra.mxu1 %v6245_v3  ;;  %v6301_v3 = vld [vmem:[#allocation5 + $0x64c] ss:$16 sps:$4 sm:$0xff]  }
 0x2b1   :  { %4779 = vmatpush2.bf16.msra.mxu0 %v6248_v4  ;;  %4737 = vmatprep.subr.bf16.mxu1 %v6253_v5  ;;  %v6343_v4 = vld [vmem:[#allocation7 + $0x10] sm:$0xff]   ;;  %v6344_v5 = vld [vmem:[#allocation7 + $0x48] sm:$0xff]  }
 0x2b2   :  { %4780 = vmatprep.subr.bf16.mxu0 %v6256_v6  ;;  %v6299_v6 = vld [vmem:[#allocation5 + $0x648] ss:$16 sps:$4 sm:$0xff]  }
 0x2b4   :  { %4738 = vmatpush2.bf16.msra.mxu1 %v6251_v29  ;;  %v6304_v29 = vld [vmem:[#allocation5 + $0x62c] ss:$16 sps:$4 sm:$0xff]  }
 0x2b5   :  { %4781 = vmatpush2.bf16.msra.mxu0 %v6254_v52  ;;  %4739 = vmatprep.subr.bf16.mxu1 %v6259_v8  ;;  %v6345_v52 = vld [vmem:[#allocation7 + $0x8] sm:$0xff]   ;;  %v6346_v8 = vld [vmem:[#allocation7 + $0x40] sm:$0xff]  }
 0x2b6   :  { %4782 = vmatprep.subr.bf16.mxu0 %v6262_v11  ;;  %v6302_v11 = vld [vmem:[#allocation5 + $0x628] ss:$16 sps:$4 sm:$0xff]  }
 0x2b8   :  { %4740 = vmatpush2.bf16.msra.mxu1 %v6257_v28  ;;  %v6307_v28 = vld [vmem:[#allocation5 + $0x60c] ss:$16 sps:$4 sm:$0xff]  }
 0x2b9   :  { %4783 = vmatpush2.bf16.msra.mxu0 %v6260_v13  ;;  %4741 = vmatprep.subr.bf16.mxu1 %v6265_v55  ;;  %v6347_v13 = vld [vmem:[#allocation7] sm:$0xff]   ;;  %v6305_v55 = vld [vmem:[#allocation5 + $0x608] ss:$16 sps:$4 sm:$0xff]  }
 0x2ba   :  { %4784 = vmatprep.subr.bf16.mxu0 %v6268_v48  ;;  %v6310_v48 = vld [vmem:[#allocation5 + $0x7ec] ss:$16 sps:$4 sm:$0xff]  }
 0x2bc   :  { %4742 = vmatpush2.bf16.msra.mxu1 %v6263_v12  ;;  %v6308_v12 = vld [vmem:[#allocation5 + $0x7e8] ss:$16 sps:$4 sm:$0xff]  }
 0x2bd   :  { %4785 = vmatpush2.bf16.msra.mxu0 %v6266_v17  ;;  %4743 = vmatprep.subr.bf16.mxu1 %v6271_v41  ;;  %v6313_v17 = vld [vmem:[#allocation5 + $0x7cc] ss:$16 sps:$4 sm:$0xff]   ;;  %v6311_v41 = vld [vmem:[#allocation5 + $0x7c8] ss:$16 sps:$4 sm:$0xff]  }
 0x2be   :  { %v4546_v53 = vpop.f32.mrf.mxu0  ;;  %4786 = vmatprep.subr.bf16.mxu0 %v6274_v20  ;;  %v6316_v20 = vld [vmem:[#allocation5 + $0x7ac] ss:$16 sps:$4 sm:$0xff]  }
 0x2bf   :  { %v4547_v35 = vadd.f32 %v4546_v53, %v3215_v61  ;;  %v4587_v49 = vpop.f32.mrf.mxu1  ;;  %v6314_v61 = vld [vmem:[#allocation5 + $0x7a8] ss:$16 sps:$4 sm:$0xff]   ;;  %v6325_v53 = vld [vmem:[#allocation5 + $0x74c] ss:$16 sps:$4 sm:$0xff]  }
 0x2c0   :  { %4744 = vmatpush2.bf16.msra.mxu1 %v6269_v14  ;;  %v4548_v26 = vpop.f32.mrf.mxu0  ;;  %v6319_v14 = vld [vmem:[#allocation5 + $0x78c] ss:$16 sps:$4 sm:$0xff]  }
 0x2c1   :  { %v6697_v54 = vadd.f32 %v4587_v49, %v4547_v35  ;;  %v4549_v51 = vadd.f32 %v4548_v26, %v3219_v23  ;;  %v4589_v30 = vpop.f32.mrf.mxu1  ;;  %4787 = vmatpush2.bf16.msra.mxu0 %v6272_v32  ;;  %4745 = vmatprep.subr.bf16.mxu1 %v6277_v24  ;;  %v6317_v32 = vld [vmem:[#allocation5 + $0x788] ss:$16 sps:$4 sm:$0xff]   ;;  %v6322_v23 = vld [vmem:[#allocation5 + $0x76c] ss:$16 sps:$4 sm:$0xff]  }
 0x2c2   :  { %v4550_v27 = vpop.f32.mrf.mxu0  ;;  %4788 = vmatprep.subr.bf16.mxu0 %v6280_v25  ;;  %v6320_v24 = vld [vmem:[#allocation5 + $0x768] ss:$16 sps:$4 sm:$0xff]   ;;  %v6328_v35 = vld [vmem:[#allocation5 + $0x72c] ss:$16 sps:$4 sm:$0xff]  }
 0x2c3   :  { %v6699_v31 = vadd.f32 %v4589_v30, %v4549_v51  ;;  %v4591_v33 = vpop.f32.mrf.mxu1  ;;  %v6323_v25 = vld [vmem:[#allocation5 + $0x748] ss:$16 sps:$4 sm:$0xff]   ;;  %v6331_v26 = vld [vmem:[#allocation5 + $0x70c] ss:$16 sps:$4 sm:$0xff]  }
 0x2c4   :  { %4746 = vmatpush2.bf16.msra.mxu1 %v6275_v18  ;;  %v4551_v34 = vpop.f32.mrf.mxu0  ;;  %v6326_v49 = vld [vmem:[#allocation5 + $0x728] ss:$16 sps:$4 sm:$0xff]  }
 0x2c5   :  { %v4592_v36 = vpop.f32.mrf.mxu1  ;;  %4789 = vmatpush2.bf16.msra.mxu0 %v6278_v10  ;;  %4747 = vmatprep.subr.bf16.mxu1 %v6283_v9  ;;  %v6329_v18 = vld [vmem:[#allocation5 + $0x708] ss:$16 sps:$4 sm:$0xff]  }
 0x2c6   :  { %5887 = vmatprep.subr.bf16.mxu0 %v6332_v60  ;;  %v6348_v33 = vld [vmem:[#allocation7 + $0xf8] sm:$0xff]   ;;  %v6351_v36 = vld [vmem:[#allocation7 + $0xb0] sm:$0xff]  }
 0x2c7   :  { %v6349_v34 = vld [vmem:[#allocation7 + $0xb8] sm:$0xff]  }
 0x2c8   :  { %4748 = vmatpush2.bf16.msra.mxu1 %v6281_v59  ;;  %4791 = vmatmul.mubr.bf16.vlgmr.msra.gmra.mxu0 %v6669_v22  ;;  %v6290_v22 = vld [vmem:[#allocation5 + $0x6a8] ss:$16 sps:$4 sm:$0xff]   ;;  %v6350_v59 = vld [vmem:[#allocation7 + $0xf0] sm:$0xff]  }
 0x2c9   :  { %4799 = vmatprep.subr.bf16.mxu1 %v6286_v38  ;;  %5888 = vmatpush3.bf16.msra.mxu0 %v6333_v40  ;;  %v6352_v38 = vld [vmem:[#allocation7 + $0xe8] sm:$0xff]  }
 0x2ca   :  { %5889 = vmatprep.subr.bf16.mxu0 %v6334_v19  ;;  %v6353_v40 = vld [vmem:[#allocation7 + $0xa8] sm:$0xff]   ;;  %v6354_v19 = vld [vmem:[#allocation7 + $0xe0] sm:$0xff]  }
 0x2cb   :  { %4750 = vmatmul.mubr.bf16.vlgmr.msra.gmra.mxu1 %v6643_v37  ;;  %v6293_v37 = vld [vmem:[#allocation5 + $0x688] ss:$16 sps:$4 sm:$0xff]  }
 0x2cc   :  { %4800 = vmatpush1.bf16.msra.mxu1 %v6284_v58  ;;  %4831 = vmatprep.mubr.bf16.mxu1 %v6680_v39  ;;  %v6341_v39 = vld [vmem:[#allocation7 + $0x18] sm:$0xff]   ;;  %v6358_v58 = vld [vmem:[#allocation7 + $0xd0] sm:$0xff]  }
 0x2cd   :  { %4801 = vmatprep.subr.bf16.mxu1 %v6289_v44  ;;  %5890 = vmatpush3.bf16.msra.mxu0 %v6335_v45  ;;  %v6359_v44 = vld [vmem:[#allocation7 + $0x90] sm:$0xff]  }
 0x2ce   :  { %5891 = vmatprep.subr.bf16.mxu0 %v6336_v46 }
 0x2d0   :  { %4802 = vmatpush1.bf16.msra.mxu1 %v6287_v47 }
 0x2d1   :  { %4803 = vmatprep.subr.bf16.mxu1 %v6292_v50  ;;  %5892 = vmatpush3.bf16.msra.mxu0 %v6337_v56  ;;  %v6360_v50 = vld [vmem:[#allocation7 + $0xc8] sm:$0xff]  }
 0x2d2   :  { %5893 = vmatprep.subr.bf16.mxu0 %v6338_v57 }
 0x2d4   :  { %4804 = vmatpush1.bf16.msra.mxu1 %v6290_v22  ;;  %v6361_v22 = vld [vmem:[#allocation7 + $0x88] sm:$0xff]  }
 0x2d5   :  { %4805 = vmatprep.subr.bf16.mxu1 %v6295_v62  ;;  %5894 = vmatpush3.bf16.msra.mxu0 %v6339_v63 }
 0x2d6   :  { %5895 = vmatprep.subr.bf16.mxu0 %v6340_v0 }
 0x2d8   :  { %4806 = vmatpush1.bf16.msra.mxu1 %v6293_v37 }
 0x2d9   :  { %4807 = vmatprep.subr.bf16.mxu1 %v6298_v21  ;;  %5896 = vmatpush3.bf16.msra.mxu0 %v6341_v39  ;;  %v6362_v39 = vld [vmem:[#allocation7 + $0xc0] sm:$0xff]  }
 0x2da   :  { %5897 = vmatprep.subr.bf16.mxu0 %v6342_v2 }
 0x2dc   :  { %4808 = vmatpush1.bf16.msra.mxu1 %v6296_v16  ;;  %v6363_v16 = vld [vmem:[#allocation7 + $0x80] sm:$0xff]  }
 0x2dd   :  { %4809 = vmatprep.subr.bf16.mxu1 %v6301_v3  ;;  %5898 = vmatpush3.bf16.msra.mxu0 %v6343_v4 }
 0x2de   :  { %5899 = vmatprep.subr.bf16.mxu0 %v6344_v5 }
 0x2e0   :  { %4810 = vmatpush1.bf16.msra.mxu1 %v6299_v6  ;;  %v3223_v6 = vrot.slane %v6689_v15, %v476_v7 }
 0x2e1   :  { %4811 = vmatprep.subr.bf16.mxu1 %v6304_v29  ;;  %5900 = vmatpush3.bf16.msra.mxu0 %v6345_v52  ;;  %v3227_v29 = vrot.slane %v6689_v15, %v480_v1 }
 0x2e2   :  { %5901 = vmatprep.subr.bf16.mxu0 %v6346_v8 }
 0x2e4   :  { %4812 = vmatpush1.bf16.msra.mxu1 %v6302_v11 }
 0x2e5   :  { %4813 = vmatprep.subr.bf16.mxu1 %v6307_v28  ;;  %5902 = vmatpush3.bf16.msra.mxu0 %v6347_v13 }
 0x2e8   :  { %4814 = vmatpush1.bf16.msra.mxu1 %v6305_v55 }
 0x2e9   :  { %4815 = vmatprep.subr.bf16.mxu1 %v6310_v48 }
 0x2ec   :  { %4816 = vmatpush2.bf16.msra.mxu1 %v6308_v12 }
 0x2ed   :  { %4817 = vmatprep.subr.bf16.mxu1 %v6313_v17 }
 0x2f0   :  { %4818 = vmatpush2.bf16.msra.mxu1 %v6311_v41 }
 0x2f1   :  { %4819 = vmatprep.subr.bf16.mxu1 %v6316_v20 }
 0x2f4   :  { %4820 = vmatpush2.bf16.msra.mxu1 %v6314_v61 }
 0x2f5   :  { %4821 = vmatprep.subr.bf16.mxu1 %v6319_v14 }
 0x2f8   :  { %4822 = vmatpush2.bf16.msra.mxu1 %v6317_v32 }
 0x2f9   :  { %4823 = vmatprep.subr.bf16.mxu1 %v6322_v23 }
 0x2fc   :  { %4824 = vmatpush2.bf16.msra.mxu1 %v6320_v24 }
 0x2fd   :  { %4825 = vmatprep.subr.bf16.mxu1 %v6325_v53 }
 0x300   :  { %4826 = vmatpush2.bf16.msra.mxu1 %v6323_v25 }
 0x301   :  { %4827 = vmatprep.subr.bf16.mxu1 %v6328_v35 }
 0x304   :  { %4828 = vmatpush2.bf16.msra.mxu1 %v6326_v49 }
 0x305   :  { %4829 = vmatprep.subr.bf16.mxu1 %v6331_v26 }
 0x308   :  { %4830 = vmatpush2.bf16.msra.mxu1 %v6329_v18  ;;  %v4628_v51 = vpop.f32.mrf.mxu0 }
 0x309   :  { %v4629_v30 = vadd.f32 %v4628_v51, %v6697_v54  ;;  %5909 = vmatprep.subr.bf16.mxu1 %v6348_v33  ;;  %v6355_v54 = vld [vmem:[#allocation7 + $0xa0] sm:$0xff]  }
 0x30a   :  { %v4630_v10 = vpop.f32.mrf.mxu0 }
 0x30b   :  { %4832 = vmatmul.mubr.bf16.vlgmr.msra.gmra.mxu1 %v6683_v43  ;;  %v4631_v9 = vadd.f32 %v4630_v10, %v6699_v31  ;;  %v6356_v43 = vld [vmem:[#allocation7 + $0xd8] sm:$0xff]  }
 0x30c   :  { %v4632_v27 = vpop.f32.mrf.mxu0  ;;  %5910 = vmatpush3.bf16.msra.mxu1 %v6349_v34  ;;  %v6357_v31 = vld [vmem:[#allocation7 + $0x98] sm:$0xff]  }
 0x30d   :  { %5911 = vmatprep.subr.bf16.mxu1 %v6350_v59 }
 0x30e   :  { %v4633_v60 = vpop.f32.mrf.mxu0 }
 0x310   :  { %5912 = vmatpush3.bf16.msra.mxu1 %v6351_v36 }
 0x311   :  { %5913 = vmatprep.subr.bf16.mxu1 %v6352_v38 }
 0x314   :  { %5914 = vmatpush3.bf16.msra.mxu1 %v6353_v40 }
 0x315   :  { %5915 = vmatprep.subr.bf16.mxu1 %v6354_v19 }
 0x318   :  { %5916 = vmatpush3.bf16.msra.mxu1 %v6355_v54 }
 0x319   :  { %5917 = vmatprep.subr.bf16.mxu1 %v6356_v43 }
 0x31c   :  { %5918 = vmatpush3.bf16.msra.mxu1 %v6357_v31 }
 0x31d   :  { %5919 = vmatprep.subr.bf16.mxu1 %v6358_v58 }
 0x320   :  { %5920 = vmatpush3.bf16.msra.mxu1 %v6359_v44 }
 0x321   :  { %5921 = vmatprep.subr.bf16.mxu1 %v6360_v50 }
 0x324   :  { %5922 = vmatpush3.bf16.msra.mxu1 %v6361_v22 }
 0x325   :  { %5923 = vmatprep.subr.bf16.mxu1 %v6362_v39 }
 0x328   :  { %5924 = vmatpush3.bf16.msra.mxu1 %v6363_v16 }
 0x348   :  { %v4710_v45 = vpop.f32.mrf.mxu0 }
 0x349   :  { %v4711_v8 = vadd.f32 %v4710_v45, %v3223_v6 }
 0x34a   :  { %v4712_v46 = vpop.f32.mrf.mxu0 }
 0x34b   :  { %v4669_v47 = vpop.f32.mrf.mxu1  ;;  %v4713_v13 = vadd.f32 %v4712_v46, %v3227_v29 }
 0x34c   :  { %v4670_v56 = vadd.f32 %v4669_v47, %v4629_v30  ;;  %v4714_v57 = vpop.f32.mrf.mxu0 }
 0x34d   :  { %v4671_v62 = vpop.f32.mrf.mxu1 }
 0x34e   :  { %v4672_v63 = vadd.f32 %v4671_v62, %v4631_v9  ;;  %v4715_v0 = vpop.f32.mrf.mxu0  ;;  %v4840_v37 = vmax.f32 %v4670_v56, 0.0  ;;  %v5854_v9 = vld [vmem:[#allocation8 + $0xc] ss:$0 sm:$0xff] }
 0x34f   :  { %v4673_v21 = vpop.f32.mrf.mxu1 }
 0x350   :  { %v4841_v2 = vmax.f32 %v4672_v63, 0.0  ;;  %v4844_v5 = vpack.c.bf16 %v4840_v37, %v4840_v37 }
 0x351   :  { %v4674_v3 = vpop.f32.mrf.mxu1 }
 0x352   :  { %v4845_v4 = vpack.c.bf16 %v4841_v2, %v4841_v2 }
 0x354   :  { %5142 = vmatprep.mubr.bf16.mxu0 %v4845_v4 }
 0x355   :  { %5143 = vmatmul.mubr.bf16.vlgmr.msra.gmra.mxu0 %v4844_v5 }
 0x388   :  { %v4792_v52 = vpop.f32.mrf.mxu0 }
 0x38a   :  { %v4794_v11 = vpop.f32.mrf.mxu0 }
 0x38b   :  { %v4751_v28 = vpop.f32.mrf.mxu1 }
 0x38c   :  { %v4752_v55 = vadd.f32 %v4751_v28, %v4711_v8  ;;  %v4796_v48 = vpop.f32.mrf.mxu0 }
 0x38d   :  { %v4753_v12 = vpop.f32.mrf.mxu1 }
 0x38e   :  { %v4754_v17 = vadd.f32 %v4753_v12, %v4713_v13  ;;  %v4797_v41 = vpop.f32.mrf.mxu0  ;;  %v4793_v20 = vadd.f32 %v4792_v52, %v4752_v55 }
 0x38f   :  { %v4755_v61 = vpop.f32.mrf.mxu1 }
 0x390   :  { %v4795_v14 = vadd.f32 %v4794_v11, %v4754_v17 }
 0x391   :  { %v4756_v32 = vpop.f32.mrf.mxu1 }
 0x3cb   :  { %v4833_v23 = vpop.f32.mrf.mxu1 }
 0x3cc   :  { %v4834_v7 = vadd.f32 %v4833_v23, %v4793_v20 }
 0x3cd   :  { %v4835_v24 = vpop.f32.mrf.mxu1 }
 0x3ce   :  { %v4836_v42 = vadd.f32 %v4835_v24, %v4795_v14  ;;  %v4842_v53 = vmax.f32 %v4834_v7, 0.0 }
 0x3cf   :  { %v4837_v1 = vpop.f32.mrf.mxu1 }
 0x3d0   :  { %v4843_v15 = vmax.f32 %v4836_v42, 0.0  ;;  %v4846_v49 = vpack.c.bf16 %v4842_v53, %v4842_v53 }
 0x3d1   :  { %v4838_v25 = vpop.f32.mrf.mxu1 }
 0x3d2   :  { %v4847_v35 = vpack.c.bf16 %v4843_v15, %v4843_v15 }
 0x3d4   :  { %5182 = vmatprep.mubr.bf16.mxu1 %v4847_v35 }
 0x3d5   :  { %5183 = vmatmul.mubr.bf16.vlgmr.msra.gmra.mxu1 %v4846_v49 }
 0x415   :  { %v5903_v26 = vpop.f32.mrf.mxu0 }
 0x417   :  { %v5904_v18 = vpop.f32.mrf.mxu0 }
 0x418   :  { %v5905_v51 = vadd.f32 %v5904_v18, %v5903_v26 }
 0x419   :  { %v5906_v30 = vpop.f32.mrf.mxu0 }
 0x41a   :  { %v5145_v33 = vadd.f32 %v5905_v51, %v5854_v9 }
 0x41b   :  { %v5907_v10 = vpop.f32.mrf.mxu0 }
 0x495   :  { %v5925_v27 = vpop.f32.mrf.mxu1 }
 0x497   :  { %v5926_v60 = vpop.f32.mrf.mxu1 }
 0x498   :  { %v5927_v34 = vadd.f32 %v5926_v60, %v5925_v27 }
 0x499   :  { %v5928_v59 = vpop.f32.mrf.mxu1 }
 0x49a   :  { %v5185_v36 = vadd.f32 %v5927_v34, %v5145_v33 }
 0x49b   :  { %v5929_v38 = vpop.f32.mrf.mxu1 }
 0x49c   :  { %5190 = vst [vmem:[#allocation10] sm:$0xff] %v5185_v36 }
 0x49d   :  { %6456 = shalt.err (!%p6453_p10)
}
 0x49e   :  { %5200 = dma.vmem_to_hbm [thread:$0]  %s5198_s22, 128, %s6721_s5, [#allocation4]  }
 0x49f   :  { %6471 = dma.done.wait [#allocation4], 128  }
 0x4a0   :  { %6472 = vsyncadd [#allocation4], 4294967168 }
 0x4a1   :  { %5204 = vsyncpa [#allocation3], 1 }
 0x4a2   :  { %5205 = vsyncpa [#allocation6], 1 }
 0x4a3   :  { %5206 = vsyncpa [#allocation9], 1 }
 0x4a4   :  { %5207 = vsyncpa [#allocation4], 1 }

</bundles_post_ra>
